<compile_context>
chip_gen: v7x
topology: tpu7x:2x2x1
jax: 0.10.0
libtpu: 0.0.40
codegen_flags: <defaults>
</compile_context>

<pallas_src>
import math

import jax
import jax.numpy as jnp
import numpy as np
from jax.experimental import pallas as pl
from jax.experimental.pallas import tpu as pltpu

# Small, forward-consistent hyperparameters.
BATCH = 2
SEQ_LEN = 16      # seq_len
PRED_LEN = 8      # pred_len
D_MODEL = 32      # d_model
NHEAD = 4
NUM_LAYERS = 2
D_FF = 4 * D_MODEL
D_HEAD = D_MODEL // NHEAD
LN_EPS = 1e-5
NEG_BIAS = -1e9   # additive mask for cross-batch attention entries

# Packed-slab layout constants (all lane offsets 128-aligned).
QKV_OFF = 0                 # (D, 3D)   lanes [0, 96)
WO_OFF = 128                # (D, D)    lanes [128, 160)
FF1_OFF = 256               # (D, D_FF) lanes [256, 384)
W1_LANES = 384
OUTP_ROWS = 40              # rows [0, D) = W_out^T (lane-padded), row D = b_out
LANE = 128


def _layer_norm(x, w, b):
    mu = jnp.mean(x, axis=-1, keepdims=True)
    xc = x - mu
    var = jnp.mean(xc * xc, axis=-1, keepdims=True)
    return xc * jax.lax.rsqrt(var + LN_EPS) * w + b


def transformer_kernel(h_ref, mask_ref, w1_ref, w2_ref, bias_ref, outp_ref, o_ref):
    D, Dh, Dff = D_MODEL, D_HEAD, D_FF

    h = h_ref[...]                      # (B*S, D) f32
    attn_mask = mask_ref[...]           # (B*S, B*S) constant block-diagonal additive bias

    for l in range(NUM_LAYERS):
        # --- fused QKV projection: one (B*S, D) x (D, 3D) MXU pass (1/sqrt(Dh) pre-folded into Q) ---
        w_qkv = w1_ref[l, :, QKV_OFF:QKV_OFF + 3 * D]
        b_qkv = bias_ref[l, 0:1, 0:3 * D]
        qkv = jnp.dot(h, w_qkv, preferred_element_type=jnp.float32) + b_qkv

        # --- per-head attention, out-projection accumulated per head (no lane concat) ---
        attn = bias_ref[l, 1:2, 0:D]                            # out-proj bias, broadcasts to (B*S, D)
        for hd in range(NHEAD):
            lo = hd * Dh
            q = qkv[:, lo:lo + Dh]
            k = qkv[:, D + lo:D + lo + Dh]
            v = qkv[:, 2 * D + lo:2 * D + lo + Dh]
            s = jax.lax.dot_general(q, k, (((1,), (1,)), ((), ())),
                                    preferred_element_type=jnp.float32) + attn_mask
            s = s - jnp.max(s, axis=-1, keepdims=True)
            p = jnp.exp(s)
            p = p * pl.reciprocal(jnp.sum(p, axis=-1, keepdims=True), approx=True)
            ctx_h = jnp.dot(p, v, preferred_element_type=jnp.float32)         # (B*S, Dh)
            wo_h = w1_ref[l, lo:lo + Dh, WO_OFF:WO_OFF + D]                   # (Dh, D)
            attn = attn + jnp.dot(ctx_h, wo_h, preferred_element_type=jnp.float32)

        # TODO(synk): dropout(p=0.1) has no effect in eval mode; implemented as identity.
        h = _layer_norm(h + attn, bias_ref[l, 2:3, 0:D], bias_ref[l, 3:4, 0:D])

        # --- feed forward (ReLU) ---
        ff = jnp.dot(h, w1_ref[l, :, FF1_OFF:FF1_OFF + Dff],
                     preferred_element_type=jnp.float32) + bias_ref[l, 4:5, 0:Dff]
        ff = jnp.maximum(ff, 0.0)
        ff = jnp.dot(ff, w2_ref[l], preferred_element_type=jnp.float32) + bias_ref[l, 5:6, 0:D]
        h = _layer_norm(h + ff, bias_ref[l, 6:7, 0:D], bias_ref[l, 7:8, 0:D])

    # Output projection over the WHOLE slab: lane-dense (B*S, 128) store.  Last-token
    # selection and the [:, :PRED_LEN] slice happen in the wrapper.
    o_ref[...] = (jnp.dot(h, outp_ref[0:D_MODEL, :], preferred_element_type=jnp.float32)
                  + outp_ref[D_MODEL:D_MODEL + 1, :])


def _full_spec(shape):
    if len(shape) == 2:
        return pl.BlockSpec(shape, lambda i: (0, 0))
    return pl.BlockSpec(shape, lambda i: (0, 0, 0))


def simple_transformer_forward(x, kp):
    B, S, _ = x.shape
    # input_projection (Linear(1, D) == broadcast multiply) + pos_encoding in the wrapper:
    # free layout plumbing in XLA, avoids a degenerate 1-lane (S, 1) layout in-kernel.
    h0 = (x * kp["w_in_t"] + kp["b_in"] + kp["pos"]).reshape(B * S, D_MODEL)

    in_arrays = (h0, kp["attn_bias"], kp["w1"], kp["w2"], kp["bias"], kp["outp"])

    out_full = pl.pallas_call(
        transformer_kernel,
        out_shape=jax.ShapeDtypeStruct((B * S, LANE), jnp.float32),
        grid_spec=pltpu.PrefetchScalarGridSpec(
            num_scalar_prefetch=0,
            grid=(1,),                                          # whole problem in one step
            in_specs=[_full_spec(a.shape) for a in in_arrays],
            out_specs=pl.BlockSpec((B * S, LANE), lambda i: (0, 0)),
        ),
        compiler_params=pltpu.CompilerParams(dimension_semantics=("arbitrary",)),
    )(*in_arrays)

    # Last token of each sequence + un-pad the lane-dense output.
    return out_full.reshape(B, S, LANE)[:, S - 1, :PRED_LEN]    # (B, PRED_LEN)


def init_raw_params(key):
    """PyTorch-shaped deterministic synthetic parameters."""
    f32 = jnp.float32
    L, D, Dff, S, P = NUM_LAYERS, D_MODEL, D_FF, SEQ_LEN, PRED_LEN
    ks = jax.random.split(key, 13)
    return dict(
        w_in=0.05 * jax.random.normal(ks[0], (D, 1), f32),       # input_projection.weight
        b_in=0.02 * jax.random.normal(ks[1], (D,), f32),
        pos=0.05 * jax.random.normal(ks[2], (S, D), f32),        # pos_encoding
        in_proj_w=0.05 * jax.random.normal(ks[3], (L, 3 * D, D), f32),
        in_proj_b=0.02 * jax.random.normal(ks[4], (L, 3 * D), f32),
        out_proj_w=0.05 * jax.random.normal(ks[5], (L, D, D), f32),
        out_proj_b=0.02 * jax.random.normal(ks[6], (L, D), f32),
        ff1_w=0.05 * jax.random.normal(ks[7], (L, Dff, D), f32),
        ff1_b=0.02 * jax.random.normal(ks[8], (L, Dff), f32),
        ff2_w=0.05 * jax.random.normal(ks[9], (L, D, Dff), f32),
        ff2_b=0.02 * jax.random.normal(ks[10], (L, D), f32),
        ln1_w=jnp.ones((L, D), f32), ln1_b=jnp.zeros((L, D), f32),
        ln2_w=jnp.ones((L, D), f32), ln2_b=jnp.zeros((L, D), f32),
        w_out=0.05 * jax.random.normal(ks[11], (P, D), f32),     # output_projection.weight
        b_out=0.02 * jax.random.normal(ks[12], (P,), f32),
    )


def prepare_kernel_params(p):
    """Re-layout PyTorch-shaped params into a few packed slabs for the kernel."""
    L, D, Dff, P = NUM_LAYERS, D_MODEL, D_FF, PRED_LEN
    scale = 1.0 / math.sqrt(D_HEAD)

    # Fused QKV weight/bias with the attention scale folded into the Q rows.
    w_qkv_t = p["in_proj_w"].transpose(0, 2, 1)                  # (L, D, 3D)
    b_qkv = p["in_proj_b"]                                       # (L, 3D)
    w_qkv_t = w_qkv_t.at[:, :, :D].multiply(scale)
    b_qkv = b_qkv.at[:, :D].multiply(scale)

    w_o_t = p["out_proj_w"].transpose(0, 2, 1)                   # (L, D, D)
    ff1_w_t = p["ff1_w"].transpose(0, 2, 1)                      # (L, D, Dff)
    ff2_w_t = p["ff2_w"].transpose(0, 2, 1)                      # (L, Dff, D)

    # Weight slab 1: lane-concat [QKV | W_o | FF1], each at a 128-aligned lane offset.
    w1 = jnp.zeros((L, D, W1_LANES), jnp.float32)
    w1 = w1.at[:, :, QKV_OFF:QKV_OFF + 3 * D].set(w_qkv_t)
    w1 = w1.at[:, :, WO_OFF:WO_OFF + D].set(w_o_t)
    w1 = w1.at[:, :, FF1_OFF:FF1_OFF + Dff].set(ff1_w_t)

    # Bias / LayerNorm slab: (L, 8, 128), one sublane row per parameter, lane offset 0.
    bias = jnp.zeros((L, 8, LANE), jnp.float32)
    bias = bias.at[:, 0, :3 * D].set(b_qkv)
    bias = bias.at[:, 1, :D].set(p["out_proj_b"])
    bias = bias.at[:, 2, :D].set(p["ln1_w"])
    bias = bias.at[:, 3, :D].set(p["ln1_b"])
    bias = bias.at[:, 4, :Dff].set(p["ff1_b"])
    bias = bias.at[:, 5, :D].set(p["ff2_b"])
    bias = bias.at[:, 6, :D].set(p["ln2_w"])
    bias = bias.at[:, 7, :D].set(p["ln2_b"])

    # Output-projection slab: rows [0, D) = W_out^T lane-padded to 128, row D = b_out.
    outp = jnp.zeros((OUTP_ROWS, LANE), jnp.float32)
    outp = outp.at[:D, :P].set(p["w_out"].T)
    outp = outp.at[D, :P].set(p["b_out"])

    # Constant block-diagonal additive attention bias, hoisted out of the kernel.
    rb = np.arange(BATCH * SEQ_LEN)[:, None] // SEQ_LEN
    cb = np.arange(BATCH * SEQ_LEN)[None, :] // SEQ_LEN
    attn_bias = jnp.asarray(np.where(rb == cb, 0.0, NEG_BIAS), jnp.float32)

    return dict(
        w_in_t=p["w_in"].T,                                      # (1, D)
        b_in=p["b_in"].reshape(1, D),
        pos=p["pos"],                                            # (S, D)
        w1=w1, w2=ff2_w_t, bias=bias, outp=outp, attn_bias=attn_bias,
    )


def reference_forward(x, p):
    """Pure-JAX reference mirroring PyTorch eval-mode semantics (unfused, PyTorch layouts)."""
    scale = 1.0 / math.sqrt(D_HEAD)

    def ln(v, w, b):
        mu = jnp.mean(v, -1, keepdims=True)
        vc = v - mu
        var = jnp.mean(vc * vc, -1, keepdims=True)
        return vc * jax.lax.rsqrt(var + LN_EPS) * w + b

    B, S, _ = x.shape
    h = x @ p["w_in"].T + p["b_in"]                              # (B, S, D)
    h = h + p["pos"][None]
    for l in range(NUM_LAYERS):
        qkv = h @ p["in_proj_w"][l].T + p["in_proj_b"][l]        # (B, S, 3D)
        q, k, v = jnp.split(qkv, 3, axis=-1)

        def heads(t):                                            # (B,S,D) -> (B,H,S,Dh)
            return t.reshape(B, S, NHEAD, D_HEAD).transpose(0, 2, 1, 3)

        qh, kh, vh = heads(q), heads(k), heads(v)
        s = jnp.einsum("bhqd,bhkd->bhqk", qh, kh) * scale
        a = jax.nn.softmax(s, axis=-1)
        ctx = jnp.einsum("bhqk,bhkd->bhqd", a, vh)
        ctx = ctx.transpose(0, 2, 1, 3).reshape(B, S, D_MODEL)
        attn = ctx @ p["out_proj_w"][l].T + p["out_proj_b"][l]
        h = ln(h + attn, p["ln1_w"][l], p["ln1_b"][l])
        ff = jax.nn.relu(h @ p["ff1_w"][l].T + p["ff1_b"][l])
        ff = ff @ p["ff2_w"][l].T + p["ff2_b"][l]
        h = ln(h + ff, p["ln2_w"][l], p["ln2_b"][l])
    return h[:, -1, :] @ p["w_out"].T + p["b_out"]


if __name__ == "__main__":
    key = jax.random.PRNGKey(0)
    pkey, xkey = jax.random.split(key)
    raw_params = init_raw_params(pkey)
    kparams = prepare_kernel_params(raw_params)
    x = jax.random.normal(xkey, (BATCH, SEQ_LEN, 1), jnp.float32)

    out = simple_transformer_forward(x, kparams)
    out = jax.block_until_ready(out)
    assert out.shape == (BATCH, PRED_LEN)

    ref = reference_forward(x, raw_params)
    np.testing.assert_allclose(np.asarray(out), np.asarray(ref), rtol=2e-3, atol=2e-3)

    print("KERNEL_OK")
</pallas_src>

<mosaic_0001>
module attributes {stable_mosaic.version = 11 : i64} {
  func.func @transformer_kernel(%arg0: i32, %arg1: memref<32x32xf32, #tpu.memory_space<vmem>>, %arg2: memref<32x32xf32, #tpu.memory_space<vmem>>, %arg3: memref<2x32x384xf32, #tpu.memory_space<vmem>>, %arg4: memref<2x128x32xf32, #tpu.memory_space<vmem>>, %arg5: memref<2x8x128xf32, #tpu.memory_space<vmem>>, %arg6: memref<40x128xf32, #tpu.memory_space<vmem>>, %arg7: memref<32x128xf32, #tpu.memory_space<vmem>>) attributes {dimension_semantics = [#tpu.dimension_semantics<arbitrary>], iteration_bounds = array<i64: 1>, scalar_prefetch = 0 : i64, scratch_operands = 0 : i64, tpu.core_type = #tpu.core_type<tc>, window_params = [{pipeline_mode = #tpu.pipeline_mode<synchronous>, transform_indices = @transform_0, window_bounds = array<i64: 32, 32>}, {pipeline_mode = #tpu.pipeline_mode<synchronous>, transform_indices = @transform_1, window_bounds = array<i64: 32, 32>}, {pipeline_mode = #tpu.pipeline_mode<synchronous>, transform_indices = @transform_2, window_bounds = array<i64: 2, 32, 384>}, {pipeline_mode = #tpu.pipeline_mode<synchronous>, transform_indices = @transform_3, window_bounds = array<i64: 2, 128, 32>}, {pipeline_mode = #tpu.pipeline_mode<synchronous>, transform_indices = @transform_4, window_bounds = array<i64: 2, 8, 128>}, {pipeline_mode = #tpu.pipeline_mode<synchronous>, transform_indices = @transform_5, window_bounds = array<i64: 40, 128>}, {pipeline_mode = #tpu.pipeline_mode<synchronous>, transform_indices = @transform_6, window_bounds = array<i64: 32, 128>}]} {
    %c0 = arith.constant 0 : index
    %c0_0 = arith.constant 0 : index
    %0 = vector.load %arg1[%c0, %c0_0] : memref<32x32xf32, #tpu.memory_space<vmem>>, vector<32x32xf32>
    %c0_1 = arith.constant 0 : index
    %c0_2 = arith.constant 0 : index
    %1 = vector.load %arg2[%c0_1, %c0_2] : memref<32x32xf32, #tpu.memory_space<vmem>>, vector<32x32xf32>
    %c0_3 = arith.constant 0 : index
    %c0_4 = arith.constant 0 : index
    %c0_5 = arith.constant 0 : index
    %2 = vector.load %arg3[%c0_3, %c0_4, %c0_5] : memref<2x32x384xf32, #tpu.memory_space<vmem>>, vector<1x32x96xf32>
    %3 = vector.shape_cast %2 : vector<1x32x96xf32> to vector<32x96xf32>
    %c0_6 = arith.constant 0 : index
    %c0_7 = arith.constant 0 : index
    %c0_8 = arith.constant 0 : index
    %4 = vector.load %arg5[%c0_6, %c0_7, %c0_8] : memref<2x8x128xf32, #tpu.memory_space<vmem>>, vector<1x1x96xf32>
    %5 = vector.shape_cast %4 : vector<1x1x96xf32> to vector<1x96xf32>
    %cst = arith.constant dense<0.000000e+00> : vector<32x96xf32>
    %6 = tpu.matmul %0, %3, %cst {dimension_numbers = #tpu.dot_dimension_numbers<[1], [0], [0], [1], [0, 0, 1, 1], [], []>} : vector<32x32xf32>, vector<32x96xf32>, vector<32x96xf32> -> vector<32x96xf32>
    %7 = vector.broadcast %5 : vector<1x96xf32> to vector<32x96xf32>
    %8 = arith.addf %6, %7 : vector<32x96xf32>
    %c0_9 = arith.constant 0 : index
    %c1 = arith.constant 1 : index
    %c0_10 = arith.constant 0 : index
    %9 = vector.load %arg5[%c0_9, %c1, %c0_10] : memref<2x8x128xf32, #tpu.memory_space<vmem>>, vector<1x1x32xf32>
    %10 = vector.shape_cast %9 : vector<1x1x32xf32> to vector<1x32xf32>
    %11 = vector.extract_strided_slice %8 {offsets = [0, 0], sizes = [32, 8], strides = [1, 1]} : vector<32x96xf32> to vector<32x8xf32>
    %12 = vector.extract_strided_slice %8 {offsets = [0, 32], sizes = [32, 8], strides = [1, 1]} : vector<32x96xf32> to vector<32x8xf32>
    %13 = vector.extract_strided_slice %8 {offsets = [0, 64], sizes = [32, 8], strides = [1, 1]} : vector<32x96xf32> to vector<32x8xf32>
    %cst_11 = arith.constant dense<0.000000e+00> : vector<32x32xf32>
    %14 = tpu.matmul %11, %12, %cst_11 {dimension_numbers = #tpu.dot_dimension_numbers<[1], [1], [0], [0], [0, 0, 1, 0], [], []>} : vector<32x8xf32>, vector<32x8xf32>, vector<32x32xf32> -> vector<32x32xf32>
    %15 = arith.addf %14, %1 : vector<32x32xf32>
    %cst_12 = arith.constant dense<0xFF800000> : vector<32xf32>
    %16 = vector.multi_reduction <maximumf>, %15, %cst_12 [1] : vector<32x32xf32> to vector<32xf32>
    %17 = vector.shape_cast %16 : vector<32xf32> to vector<32x1xf32>
    %18 = vector.broadcast %17 : vector<32x1xf32> to vector<32x32xf32>
    %19 = arith.subf %15, %18 : vector<32x32xf32>
    %20 = math.exp %19 : vector<32x32xf32>
    %cst_13 = arith.constant dense<0.000000e+00> : vector<32xf32>
    %21 = vector.multi_reduction <add>, %20, %cst_13 [1] : vector<32x32xf32> to vector<32xf32>
    %22 = vector.shape_cast %21 : vector<32xf32> to vector<32x1xf32>
    %23 = tpu.reciprocal %22 {approx = true} : vector<32x1xf32> -> vector<32x1xf32>
    %24 = vector.broadcast %23 : vector<32x1xf32> to vector<32x32xf32>
    %25 = arith.mulf %20, %24 : vector<32x32xf32>
    %cst_14 = arith.constant dense<0.000000e+00> : vector<32x8xf32>
    %26 = tpu.matmul %25, %13, %cst_14 {dimension_numbers = #tpu.dot_dimension_numbers<[1], [0], [0], [1], [0, 0, 1, 1], [], []>} : vector<32x32xf32>, vector<32x8xf32>, vector<32x8xf32> -> vector<32x8xf32>
    %c0_15 = arith.constant 0 : index
    %c0_16 = arith.constant 0 : index
    %c128 = arith.constant 128 : index
    %27 = vector.load %arg3[%c0_15, %c0_16, %c128] : memref<2x32x384xf32, #tpu.memory_space<vmem>>, vector<1x8x32xf32>
    %28 = vector.shape_cast %27 : vector<1x8x32xf32> to vector<8x32xf32>
    %cst_17 = arith.constant dense<0.000000e+00> : vector<32x32xf32>
    %29 = tpu.matmul %26, %28, %cst_17 {dimension_numbers = #tpu.dot_dimension_numbers<[1], [0], [0], [1], [0, 0, 1, 1], [], []>} : vector<32x8xf32>, vector<8x32xf32>, vector<32x32xf32> -> vector<32x32xf32>
    %30 = vector.broadcast %10 : vector<1x32xf32> to vector<32x32xf32>
    %31 = arith.addf %30, %29 : vector<32x32xf32>
    %32 = vector.extract_strided_slice %8 {offsets = [0, 8], sizes = [32, 8], strides = [1, 1]} : vector<32x96xf32> to vector<32x8xf32>
    %33 = vector.extract_strided_slice %8 {offsets = [0, 40], sizes = [32, 8], strides = [1, 1]} : vector<32x96xf32> to vector<32x8xf32>
    %34 = vector.extract_strided_slice %8 {offsets = [0, 72], sizes = [32, 8], strides = [1, 1]} : vector<32x96xf32> to vector<32x8xf32>
    %cst_18 = arith.constant dense<0.000000e+00> : vector<32x32xf32>
    %35 = tpu.matmul %32, %33, %cst_18 {dimension_numbers = #tpu.dot_dimension_numbers<[1], [1], [0], [0], [0, 0, 1, 0], [], []>} : vector<32x8xf32>, vector<32x8xf32>, vector<32x32xf32> -> vector<32x32xf32>
    %36 = arith.addf %35, %1 : vector<32x32xf32>
    %cst_19 = arith.constant dense<0xFF800000> : vector<32xf32>
    %37 = vector.multi_reduction <maximumf>, %36, %cst_19 [1] : vector<32x32xf32> to vector<32xf32>
    %38 = vector.shape_cast %37 : vector<32xf32> to vector<32x1xf32>
    %39 = vector.broadcast %38 : vector<32x1xf32> to vector<32x32xf32>
    %40 = arith.subf %36, %39 : vector<32x32xf32>
    %41 = math.exp %40 : vector<32x32xf32>
    %cst_20 = arith.constant dense<0.000000e+00> : vector<32xf32>
    %42 = vector.multi_reduction <add>, %41, %cst_20 [1] : vector<32x32xf32> to vector<32xf32>
    %43 = vector.shape_cast %42 : vector<32xf32> to vector<32x1xf32>
    %44 = tpu.reciprocal %43 {approx = true} : vector<32x1xf32> -> vector<32x1xf32>
    %45 = vector.broadcast %44 : vector<32x1xf32> to vector<32x32xf32>
    %46 = arith.mulf %41, %45 : vector<32x32xf32>
    %cst_21 = arith.constant dense<0.000000e+00> : vector<32x8xf32>
    %47 = tpu.matmul %46, %34, %cst_21 {dimension_numbers = #tpu.dot_dimension_numbers<[1], [0], [0], [1], [0, 0, 1, 1], [], []>} : vector<32x32xf32>, vector<32x8xf32>, vector<32x8xf32> -> vector<32x8xf32>
    %c0_22 = arith.constant 0 : index
    %c8 = arith.constant 8 : index
    %c128_23 = arith.constant 128 : index
    %48 = vector.load %arg3[%c0_22, %c8, %c128_23] : memref<2x32x384xf32, #tpu.memory_space<vmem>>, vector<1x8x32xf32>
    %49 = vector.shape_cast %48 : vector<1x8x32xf32> to vector<8x32xf32>
    %cst_24 = arith.constant dense<0.000000e+00> : vector<32x32xf32>
    %50 = tpu.matmul %47, %49, %cst_24 {dimension_numbers = #tpu.dot_dimension_numbers<[1], [0], [0], [1], [0, 0, 1, 1], [], []>} : vector<32x8xf32>, vector<8x32xf32>, vector<32x32xf32> -> vector<32x32xf32>
    %51 = arith.addf %31, %50 : vector<32x32xf32>
    %52 = vector.extract_strided_slice %8 {offsets = [0, 16], sizes = [32, 8], strides = [1, 1]} : vector<32x96xf32> to vector<32x8xf32>
    %53 = vector.extract_strided_slice %8 {offsets = [0, 48], sizes = [32, 8], strides = [1, 1]} : vector<32x96xf32> to vector<32x8xf32>
    %54 = vector.extract_strided_slice %8 {offsets = [0, 80], sizes = [32, 8], strides = [1, 1]} : vector<32x96xf32> to vector<32x8xf32>
    %cst_25 = arith.constant dense<0.000000e+00> : vector<32x32xf32>
    %55 = tpu.matmul %52, %53, %cst_25 {dimension_numbers = #tpu.dot_dimension_numbers<[1], [1], [0], [0], [0, 0, 1, 0], [], []>} : vector<32x8xf32>, vector<32x8xf32>, vector<32x32xf32> -> vector<32x32xf32>
    %56 = arith.addf %55, %1 : vector<32x32xf32>
    %cst_26 = arith.constant dense<0xFF800000> : vector<32xf32>
    %57 = vector.multi_reduction <maximumf>, %56, %cst_26 [1] : vector<32x32xf32> to vector<32xf32>
    %58 = vector.shape_cast %57 : vector<32xf32> to vector<32x1xf32>
    %59 = vector.broadcast %58 : vector<32x1xf32> to vector<32x32xf32>
    %60 = arith.subf %56, %59 : vector<32x32xf32>
    %61 = math.exp %60 : vector<32x32xf32>
    %cst_27 = arith.constant dense<0.000000e+00> : vector<32xf32>
    %62 = vector.multi_reduction <add>, %61, %cst_27 [1] : vector<32x32xf32> to vector<32xf32>
    %63 = vector.shape_cast %62 : vector<32xf32> to vector<32x1xf32>
    %64 = tpu.reciprocal %63 {approx = true} : vector<32x1xf32> -> vector<32x1xf32>
    %65 = vector.broadcast %64 : vector<32x1xf32> to vector<32x32xf32>
    %66 = arith.mulf %61, %65 : vector<32x32xf32>
    %cst_28 = arith.constant dense<0.000000e+00> : vector<32x8xf32>
    %67 = tpu.matmul %66, %54, %cst_28 {dimension_numbers = #tpu.dot_dimension_numbers<[1], [0], [0], [1], [0, 0, 1, 1], [], []>} : vector<32x32xf32>, vector<32x8xf32>, vector<32x8xf32> -> vector<32x8xf32>
    %c0_29 = arith.constant 0 : index
    %c16 = arith.constant 16 : index
    %c128_30 = arith.constant 128 : index
    %68 = vector.load %arg3[%c0_29, %c16, %c128_30] : memref<2x32x384xf32, #tpu.memory_space<vmem>>, vector<1x8x32xf32>
    %69 = vector.shape_cast %68 : vector<1x8x32xf32> to vector<8x32xf32>
    %cst_31 = arith.constant dense<0.000000e+00> : vector<32x32xf32>
    %70 = tpu.matmul %67, %69, %cst_31 {dimension_numbers = #tpu.dot_dimension_numbers<[1], [0], [0], [1], [0, 0, 1, 1], [], []>} : vector<32x8xf32>, vector<8x32xf32>, vector<32x32xf32> -> vector<32x32xf32>
    %71 = arith.addf %51, %70 : vector<32x32xf32>
    %72 = vector.extract_strided_slice %8 {offsets = [0, 24], sizes = [32, 8], strides = [1, 1]} : vector<32x96xf32> to vector<32x8xf32>
    %73 = vector.extract_strided_slice %8 {offsets = [0, 56], sizes = [32, 8], strides = [1, 1]} : vector<32x96xf32> to vector<32x8xf32>
    %74 = vector.extract_strided_slice %8 {offsets = [0, 88], sizes = [32, 8], strides = [1, 1]} : vector<32x96xf32> to vector<32x8xf32>
    %cst_32 = arith.constant dense<0.000000e+00> : vector<32x32xf32>
    %75 = tpu.matmul %72, %73, %cst_32 {dimension_numbers = #tpu.dot_dimension_numbers<[1], [1], [0], [0], [0, 0, 1, 0], [], []>} : vector<32x8xf32>, vector<32x8xf32>, vector<32x32xf32> -> vector<32x32xf32>
    %76 = arith.addf %75, %1 : vector<32x32xf32>
    %cst_33 = arith.constant dense<0xFF800000> : vector<32xf32>
    %77 = vector.multi_reduction <maximumf>, %76, %cst_33 [1] : vector<32x32xf32> to vector<32xf32>
    %78 = vector.shape_cast %77 : vector<32xf32> to vector<32x1xf32>
    %79 = vector.broadcast %78 : vector<32x1xf32> to vector<32x32xf32>
    %80 = arith.subf %76, %79 : vector<32x32xf32>
    %81 = math.exp %80 : vector<32x32xf32>
    %cst_34 = arith.constant dense<0.000000e+00> : vector<32xf32>
    %82 = vector.multi_reduction <add>, %81, %cst_34 [1] : vector<32x32xf32> to vector<32xf32>
    %83 = vector.shape_cast %82 : vector<32xf32> to vector<32x1xf32>
    %84 = tpu.reciprocal %83 {approx = true} : vector<32x1xf32> -> vector<32x1xf32>
    %85 = vector.broadcast %84 : vector<32x1xf32> to vector<32x32xf32>
    %86 = arith.mulf %81, %85 : vector<32x32xf32>
    %cst_35 = arith.constant dense<0.000000e+00> : vector<32x8xf32>
    %87 = tpu.matmul %86, %74, %cst_35 {dimension_numbers = #tpu.dot_dimension_numbers<[1], [0], [0], [1], [0, 0, 1, 1], [], []>} : vector<32x32xf32>, vector<32x8xf32>, vector<32x8xf32> -> vector<32x8xf32>
    %c0_36 = arith.constant 0 : index
    %c24 = arith.constant 24 : index
    %c128_37 = arith.constant 128 : index
    %88 = vector.load %arg3[%c0_36, %c24, %c128_37] : memref<2x32x384xf32, #tpu.memory_space<vmem>>, vector<1x8x32xf32>
    %89 = vector.shape_cast %88 : vector<1x8x32xf32> to vector<8x32xf32>
    %cst_38 = arith.constant dense<0.000000e+00> : vector<32x32xf32>
    %90 = tpu.matmul %87, %89, %cst_38 {dimension_numbers = #tpu.dot_dimension_numbers<[1], [0], [0], [1], [0, 0, 1, 1], [], []>} : vector<32x8xf32>, vector<8x32xf32>, vector<32x32xf32> -> vector<32x32xf32>
    %91 = arith.addf %71, %90 : vector<32x32xf32>
    %92 = arith.addf %0, %91 : vector<32x32xf32>
    %c0_39 = arith.constant 0 : index
    %c2 = arith.constant 2 : index
    %c0_40 = arith.constant 0 : index
    %93 = vector.load %arg5[%c0_39, %c2, %c0_40] : memref<2x8x128xf32, #tpu.memory_space<vmem>>, vector<1x1x32xf32>
    %94 = vector.shape_cast %93 : vector<1x1x32xf32> to vector<1x32xf32>
    %c0_41 = arith.constant 0 : index
    %c3 = arith.constant 3 : index
    %c0_42 = arith.constant 0 : index
    %95 = vector.load %arg5[%c0_41, %c3, %c0_42] : memref<2x8x128xf32, #tpu.memory_space<vmem>>, vector<1x1x32xf32>
    %96 = vector.shape_cast %95 : vector<1x1x32xf32> to vector<1x32xf32>
    %cst_43 = arith.constant dense<0.000000e+00> : vector<32xf32>
    %97 = vector.multi_reduction <add>, %92, %cst_43 [1] : vector<32x32xf32> to vector<32xf32>
    %98 = vector.shape_cast %97 : vector<32xf32> to vector<32x1xf32>
    %cst_44 = arith.constant 3.200000e+01 : f32
    %99 = vector.broadcast %cst_44 : f32 to vector<32x1xf32>
    %100 = arith.divf %98, %99 : vector<32x1xf32>
    %101 = vector.broadcast %100 : vector<32x1xf32> to vector<32x32xf32>
    %102 = arith.subf %92, %101 : vector<32x32xf32>
    %103 = arith.mulf %102, %102 : vector<32x32xf32>
    %cst_45 = arith.constant dense<0.000000e+00> : vector<32xf32>
    %104 = vector.multi_reduction <add>, %103, %cst_45 [1] : vector<32x32xf32> to vector<32xf32>
    %105 = vector.shape_cast %104 : vector<32xf32> to vector<32x1xf32>
    %cst_46 = arith.constant 3.200000e+01 : f32
    %106 = vector.broadcast %cst_46 : f32 to vector<32x1xf32>
    %107 = arith.divf %105, %106 : vector<32x1xf32>
    %cst_47 = arith.constant 9.99999974E-6 : f32
    %108 = vector.broadcast %cst_47 : f32 to vector<32x1xf32>
    %109 = arith.addf %107, %108 : vector<32x1xf32>
    %110 = math.rsqrt %109 : vector<32x1xf32>
    %111 = vector.broadcast %110 : vector<32x1xf32> to vector<32x32xf32>
    %112 = arith.mulf %102, %111 : vector<32x32xf32>
    %113 = vector.broadcast %94 : vector<1x32xf32> to vector<32x32xf32>
    %114 = arith.mulf %112, %113 : vector<32x32xf32>
    %115 = vector.broadcast %96 : vector<1x32xf32> to vector<32x32xf32>
    %116 = arith.addf %114, %115 : vector<32x32xf32>
    %c0_48 = arith.constant 0 : index
    %c0_49 = arith.constant 0 : index
    %c256 = arith.constant 256 : index
    %117 = vector.load %arg3[%c0_48, %c0_49, %c256] : memref<2x32x384xf32, #tpu.memory_space<vmem>>, vector<1x32x128xf32>
    %118 = vector.shape_cast %117 : vector<1x32x128xf32> to vector<32x128xf32>
    %cst_50 = arith.constant dense<0.000000e+00> : vector<32x128xf32>
    %119 = tpu.matmul %116, %118, %cst_50 {dimension_numbers = #tpu.dot_dimension_numbers<[1], [0], [0], [1], [0, 0, 1, 1], [], []>} : vector<32x32xf32>, vector<32x128xf32>, vector<32x128xf32> -> vector<32x128xf32>
    %c0_51 = arith.constant 0 : index
    %c4 = arith.constant 4 : index
    %c0_52 = arith.constant 0 : index
    %120 = vector.load %arg5[%c0_51, %c4, %c0_52] : memref<2x8x128xf32, #tpu.memory_space<vmem>>, vector<1x1x128xf32>
    %121 = vector.shape_cast %120 : vector<1x1x128xf32> to vector<1x128xf32>
    %122 = vector.broadcast %121 : vector<1x128xf32> to vector<32x128xf32>
    %123 = arith.addf %119, %122 : vector<32x128xf32>
    %cst_53 = arith.constant 0.000000e+00 : f32
    %124 = vector.broadcast %cst_53 : f32 to vector<32x128xf32>
    %125 = arith.maximumf %123, %124 : vector<32x128xf32>
    %c0_54 = arith.constant 0 : index
    %c0_55 = arith.constant 0 : index
    %c0_56 = arith.constant 0 : index
    %126 = vector.load %arg4[%c0_54, %c0_55, %c0_56] : memref<2x128x32xf32, #tpu.memory_space<vmem>>, vector<1x128x32xf32>
    %127 = vector.shape_cast %126 : vector<1x128x32xf32> to vector<128x32xf32>
    %cst_57 = arith.constant dense<0.000000e+00> : vector<32x32xf32>
    %128 = tpu.matmul %125, %127, %cst_57 {dimension_numbers = #tpu.dot_dimension_numbers<[1], [0], [0], [1], [0, 0, 1, 1], [], []>} : vector<32x128xf32>, vector<128x32xf32>, vector<32x32xf32> -> vector<32x32xf32>
    %c0_58 = arith.constant 0 : index
    %c5 = arith.constant 5 : index
    %c0_59 = arith.constant 0 : index
    %129 = vector.load %arg5[%c0_58, %c5, %c0_59] : memref<2x8x128xf32, #tpu.memory_space<vmem>>, vector<1x1x32xf32>
    %130 = vector.shape_cast %129 : vector<1x1x32xf32> to vector<1x32xf32>
    %131 = vector.broadcast %130 : vector<1x32xf32> to vector<32x32xf32>
    %132 = arith.addf %128, %131 : vector<32x32xf32>
    %133 = arith.addf %116, %132 : vector<32x32xf32>
    %c0_60 = arith.constant 0 : index
    %c6 = arith.constant 6 : index
    %c0_61 = arith.constant 0 : index
    %134 = vector.load %arg5[%c0_60, %c6, %c0_61] : memref<2x8x128xf32, #tpu.memory_space<vmem>>, vector<1x1x32xf32>
    %135 = vector.shape_cast %134 : vector<1x1x32xf32> to vector<1x32xf32>
    %c0_62 = arith.constant 0 : index
    %c7 = arith.constant 7 : index
    %c0_63 = arith.constant 0 : index
    %136 = vector.load %arg5[%c0_62, %c7, %c0_63] : memref<2x8x128xf32, #tpu.memory_space<vmem>>, vector<1x1x32xf32>
    %137 = vector.shape_cast %136 : vector<1x1x32xf32> to vector<1x32xf32>
    %cst_64 = arith.constant dense<0.000000e+00> : vector<32xf32>
    %138 = vector.multi_reduction <add>, %133, %cst_64 [1] : vector<32x32xf32> to vector<32xf32>
    %139 = vector.shape_cast %138 : vector<32xf32> to vector<32x1xf32>
    %cst_65 = arith.constant 3.200000e+01 : f32
    %140 = vector.broadcast %cst_65 : f32 to vector<32x1xf32>
    %141 = arith.divf %139, %140 : vector<32x1xf32>
    %142 = vector.broadcast %141 : vector<32x1xf32> to vector<32x32xf32>
    %143 = arith.subf %133, %142 : vector<32x32xf32>
    %144 = arith.mulf %143, %143 : vector<32x32xf32>
    %cst_66 = arith.constant dense<0.000000e+00> : vector<32xf32>
    %145 = vector.multi_reduction <add>, %144, %cst_66 [1] : vector<32x32xf32> to vector<32xf32>
    %146 = vector.shape_cast %145 : vector<32xf32> to vector<32x1xf32>
    %cst_67 = arith.constant 3.200000e+01 : f32
    %147 = vector.broadcast %cst_67 : f32 to vector<32x1xf32>
    %148 = arith.divf %146, %147 : vector<32x1xf32>
    %cst_68 = arith.constant 9.99999974E-6 : f32
    %149 = vector.broadcast %cst_68 : f32 to vector<32x1xf32>
    %150 = arith.addf %148, %149 : vector<32x1xf32>
    %151 = math.rsqrt %150 : vector<32x1xf32>
    %152 = vector.broadcast %151 : vector<32x1xf32> to vector<32x32xf32>
    %153 = arith.mulf %143, %152 : vector<32x32xf32>
    %154 = vector.broadcast %135 : vector<1x32xf32> to vector<32x32xf32>
    %155 = arith.mulf %153, %154 : vector<32x32xf32>
    %156 = vector.broadcast %137 : vector<1x32xf32> to vector<32x32xf32>
    %157 = arith.addf %155, %156 : vector<32x32xf32>
    %c1_69 = arith.constant 1 : index
    %c0_70 = arith.constant 0 : index
    %c0_71 = arith.constant 0 : index
    %158 = vector.load %arg3[%c1_69, %c0_70, %c0_71] : memref<2x32x384xf32, #tpu.memory_space<vmem>>, vector<1x32x96xf32>
    %159 = vector.shape_cast %158 : vector<1x32x96xf32> to vector<32x96xf32>
    %c1_72 = arith.constant 1 : index
    %c0_73 = arith.constant 0 : index
    %c0_74 = arith.constant 0 : index
    %160 = vector.load %arg5[%c1_72, %c0_73, %c0_74] : memref<2x8x128xf32, #tpu.memory_space<vmem>>, vector<1x1x96xf32>
    %161 = vector.shape_cast %160 : vector<1x1x96xf32> to vector<1x96xf32>
    %cst_75 = arith.constant dense<0.000000e+00> : vector<32x96xf32>
    %162 = tpu.matmul %157, %159, %cst_75 {dimension_numbers = #tpu.dot_dimension_numbers<[1], [0], [0], [1], [0, 0, 1, 1], [], []>} : vector<32x32xf32>, vector<32x96xf32>, vector<32x96xf32> -> vector<32x96xf32>
    %163 = vector.broadcast %161 : vector<1x96xf32> to vector<32x96xf32>
    %164 = arith.addf %162, %163 : vector<32x96xf32>
    %c1_76 = arith.constant 1 : index
    %c1_77 = arith.constant 1 : index
    %c0_78 = arith.constant 0 : index
    %165 = vector.load %arg5[%c1_76, %c1_77, %c0_78] : memref<2x8x128xf32, #tpu.memory_space<vmem>>, vector<1x1x32xf32>
    %166 = vector.shape_cast %165 : vector<1x1x32xf32> to vector<1x32xf32>
    %167 = vector.extract_strided_slice %164 {offsets = [0, 0], sizes = [32, 8], strides = [1, 1]} : vector<32x96xf32> to vector<32x8xf32>
    %168 = vector.extract_strided_slice %164 {offsets = [0, 32], sizes = [32, 8], strides = [1, 1]} : vector<32x96xf32> to vector<32x8xf32>
    %169 = vector.extract_strided_slice %164 {offsets = [0, 64], sizes = [32, 8], strides = [1, 1]} : vector<32x96xf32> to vector<32x8xf32>
    %cst_79 = arith.constant dense<0.000000e+00> : vector<32x32xf32>
    %170 = tpu.matmul %167, %168, %cst_79 {dimension_numbers = #tpu.dot_dimension_numbers<[1], [1], [0], [0], [0, 0, 1, 0], [], []>} : vector<32x8xf32>, vector<32x8xf32>, vector<32x32xf32> -> vector<32x32xf32>
    %171 = arith.addf %170, %1 : vector<32x32xf32>
    %cst_80 = arith.constant dense<0xFF800000> : vector<32xf32>
    %172 = vector.multi_reduction <maximumf>, %171, %cst_80 [1] : vector<32x32xf32> to vector<32xf32>
    %173 = vector.shape_cast %172 : vector<32xf32> to vector<32x1xf32>
    %174 = vector.broadcast %173 : vector<32x1xf32> to vector<32x32xf32>
    %175 = arith.subf %171, %174 : vector<32x32xf32>
    %176 = math.exp %175 : vector<32x32xf32>
    %cst_81 = arith.constant dense<0.000000e+00> : vector<32xf32>
    %177 = vector.multi_reduction <add>, %176, %cst_81 [1] : vector<32x32xf32> to vector<32xf32>
    %178 = vector.shape_cast %177 : vector<32xf32> to vector<32x1xf32>
    %179 = tpu.reciprocal %178 {approx = true} : vector<32x1xf32> -> vector<32x1xf32>
    %180 = vector.broadcast %179 : vector<32x1xf32> to vector<32x32xf32>
    %181 = arith.mulf %176, %180 : vector<32x32xf32>
    %cst_82 = arith.constant dense<0.000000e+00> : vector<32x8xf32>
    %182 = tpu.matmul %181, %169, %cst_82 {dimension_numbers = #tpu.dot_dimension_numbers<[1], [0], [0], [1], [0, 0, 1, 1], [], []>} : vector<32x32xf32>, vector<32x8xf32>, vector<32x8xf32> -> vector<32x8xf32>
    %c1_83 = arith.constant 1 : index
    %c0_84 = arith.constant 0 : index
    %c128_85 = arith.constant 128 : index
    %183 = vector.load %arg3[%c1_83, %c0_84, %c128_85] : memref<2x32x384xf32, #tpu.memory_space<vmem>>, vector<1x8x32xf32>
    %184 = vector.shape_cast %183 : vector<1x8x32xf32> to vector<8x32xf32>
    %cst_86 = arith.constant dense<0.000000e+00> : vector<32x32xf32>
    %185 = tpu.matmul %182, %184, %cst_86 {dimension_numbers = #tpu.dot_dimension_numbers<[1], [0], [0], [1], [0, 0, 1, 1], [], []>} : vector<32x8xf32>, vector<8x32xf32>, vector<32x32xf32> -> vector<32x32xf32>
    %186 = vector.broadcast %166 : vector<1x32xf32> to vector<32x32xf32>
    %187 = arith.addf %186, %185 : vector<32x32xf32>
    %188 = vector.extract_strided_slice %164 {offsets = [0, 8], sizes = [32, 8], strides = [1, 1]} : vector<32x96xf32> to vector<32x8xf32>
    %189 = vector.extract_strided_slice %164 {offsets = [0, 40], sizes = [32, 8], strides = [1, 1]} : vector<32x96xf32> to vector<32x8xf32>
    %190 = vector.extract_strided_slice %164 {offsets = [0, 72], sizes = [32, 8], strides = [1, 1]} : vector<32x96xf32> to vector<32x8xf32>
    %cst_87 = arith.constant dense<0.000000e+00> : vector<32x32xf32>
    %191 = tpu.matmul %188, %189, %cst_87 {dimension_numbers = #tpu.dot_dimension_numbers<[1], [1], [0], [0], [0, 0, 1, 0], [], []>} : vector<32x8xf32>, vector<32x8xf32>, vector<32x32xf32> -> vector<32x32xf32>
    %192 = arith.addf %191, %1 : vector<32x32xf32>
    %cst_88 = arith.constant dense<0xFF800000> : vector<32xf32>
    %193 = vector.multi_reduction <maximumf>, %192, %cst_88 [1] : vector<32x32xf32> to vector<32xf32>
    %194 = vector.shape_cast %193 : vector<32xf32> to vector<32x1xf32>
    %195 = vector.broadcast %194 : vector<32x1xf32> to vector<32x32xf32>
    %196 = arith.subf %192, %195 : vector<32x32xf32>
    %197 = math.exp %196 : vector<32x32xf32>
    %cst_89 = arith.constant dense<0.000000e+00> : vector<32xf32>
    %198 = vector.multi_reduction <add>, %197, %cst_89 [1] : vector<32x32xf32> to vector<32xf32>
    %199 = vector.shape_cast %198 : vector<32xf32> to vector<32x1xf32>
    %200 = tpu.reciprocal %199 {approx = true} : vector<32x1xf32> -> vector<32x1xf32>
    %201 = vector.broadcast %200 : vector<32x1xf32> to vector<32x32xf32>
    %202 = arith.mulf %197, %201 : vector<32x32xf32>
    %cst_90 = arith.constant dense<0.000000e+00> : vector<32x8xf32>
    %203 = tpu.matmul %202, %190, %cst_90 {dimension_numbers = #tpu.dot_dimension_numbers<[1], [0], [0], [1], [0, 0, 1, 1], [], []>} : vector<32x32xf32>, vector<32x8xf32>, vector<32x8xf32> -> vector<32x8xf32>
    %c1_91 = arith.constant 1 : index
    %c8_92 = arith.constant 8 : index
    %c128_93 = arith.constant 128 : index
    %204 = vector.load %arg3[%c1_91, %c8_92, %c128_93] : memref<2x32x384xf32, #tpu.memory_space<vmem>>, vector<1x8x32xf32>
    %205 = vector.shape_cast %204 : vector<1x8x32xf32> to vector<8x32xf32>
    %cst_94 = arith.constant dense<0.000000e+00> : vector<32x32xf32>
    %206 = tpu.matmul %203, %205, %cst_94 {dimension_numbers = #tpu.dot_dimension_numbers<[1], [0], [0], [1], [0, 0, 1, 1], [], []>} : vector<32x8xf32>, vector<8x32xf32>, vector<32x32xf32> -> vector<32x32xf32>
    %207 = arith.addf %187, %206 : vector<32x32xf32>
    %208 = vector.extract_strided_slice %164 {offsets = [0, 16], sizes = [32, 8], strides = [1, 1]} : vector<32x96xf32> to vector<32x8xf32>
    %209 = vector.extract_strided_slice %164 {offsets = [0, 48], sizes = [32, 8], strides = [1, 1]} : vector<32x96xf32> to vector<32x8xf32>
    %210 = vector.extract_strided_slice %164 {offsets = [0, 80], sizes = [32, 8], strides = [1, 1]} : vector<32x96xf32> to vector<32x8xf32>
    %cst_95 = arith.constant dense<0.000000e+00> : vector<32x32xf32>
    %211 = tpu.matmul %208, %209, %cst_95 {dimension_numbers = #tpu.dot_dimension_numbers<[1], [1], [0], [0], [0, 0, 1, 0], [], []>} : vector<32x8xf32>, vector<32x8xf32>, vector<32x32xf32> -> vector<32x32xf32>
    %212 = arith.addf %211, %1 : vector<32x32xf32>
    %cst_96 = arith.constant dense<0xFF800000> : vector<32xf32>
    %213 = vector.multi_reduction <maximumf>, %212, %cst_96 [1] : vector<32x32xf32> to vector<32xf32>
    %214 = vector.shape_cast %213 : vector<32xf32> to vector<32x1xf32>
    %215 = vector.broadcast %214 : vector<32x1xf32> to vector<32x32xf32>
    %216 = arith.subf %212, %215 : vector<32x32xf32>
    %217 = math.exp %216 : vector<32x32xf32>
    %cst_97 = arith.constant dense<0.000000e+00> : vector<32xf32>
    %218 = vector.multi_reduction <add>, %217, %cst_97 [1] : vector<32x32xf32> to vector<32xf32>
    %219 = vector.shape_cast %218 : vector<32xf32> to vector<32x1xf32>
    %220 = tpu.reciprocal %219 {approx = true} : vector<32x1xf32> -> vector<32x1xf32>
    %221 = vector.broadcast %220 : vector<32x1xf32> to vector<32x32xf32>
    %222 = arith.mulf %217, %221 : vector<32x32xf32>
    %cst_98 = arith.constant dense<0.000000e+00> : vector<32x8xf32>
    %223 = tpu.matmul %222, %210, %cst_98 {dimension_numbers = #tpu.dot_dimension_numbers<[1], [0], [0], [1], [0, 0, 1, 1], [], []>} : vector<32x32xf32>, vector<32x8xf32>, vector<32x8xf32> -> vector<32x8xf32>
    %c1_99 = arith.constant 1 : index
    %c16_100 = arith.constant 16 : index
    %c128_101 = arith.constant 128 : index
    %224 = vector.load %arg3[%c1_99, %c16_100, %c128_101] : memref<2x32x384xf32, #tpu.memory_space<vmem>>, vector<1x8x32xf32>
    %225 = vector.shape_cast %224 : vector<1x8x32xf32> to vector<8x32xf32>
    %cst_102 = arith.constant dense<0.000000e+00> : vector<32x32xf32>
    %226 = tpu.matmul %223, %225, %cst_102 {dimension_numbers = #tpu.dot_dimension_numbers<[1], [0], [0], [1], [0, 0, 1, 1], [], []>} : vector<32x8xf32>, vector<8x32xf32>, vector<32x32xf32> -> vector<32x32xf32>
    %227 = arith.addf %207, %226 : vector<32x32xf32>
    %228 = vector.extract_strided_slice %164 {offsets = [0, 24], sizes = [32, 8], strides = [1, 1]} : vector<32x96xf32> to vector<32x8xf32>
    %229 = vector.extract_strided_slice %164 {offsets = [0, 56], sizes = [32, 8], strides = [1, 1]} : vector<32x96xf32> to vector<32x8xf32>
    %230 = vector.extract_strided_slice %164 {offsets = [0, 88], sizes = [32, 8], strides = [1, 1]} : vector<32x96xf32> to vector<32x8xf32>
    %cst_103 = arith.constant dense<0.000000e+00> : vector<32x32xf32>
    %231 = tpu.matmul %228, %229, %cst_103 {dimension_numbers = #tpu.dot_dimension_numbers<[1], [1], [0], [0], [0, 0, 1, 0], [], []>} : vector<32x8xf32>, vector<32x8xf32>, vector<32x32xf32> -> vector<32x32xf32>
    %232 = arith.addf %231, %1 : vector<32x32xf32>
    %cst_104 = arith.constant dense<0xFF800000> : vector<32xf32>
    %233 = vector.multi_reduction <maximumf>, %232, %cst_104 [1] : vector<32x32xf32> to vector<32xf32>
    %234 = vector.shape_cast %233 : vector<32xf32> to vector<32x1xf32>
    %235 = vector.broadcast %234 : vector<32x1xf32> to vector<32x32xf32>
    %236 = arith.subf %232, %235 : vector<32x32xf32>
    %237 = math.exp %236 : vector<32x32xf32>
    %cst_105 = arith.constant dense<0.000000e+00> : vector<32xf32>
    %238 = vector.multi_reduction <add>, %237, %cst_105 [1] : vector<32x32xf32> to vector<32xf32>
    %239 = vector.shape_cast %238 : vector<32xf32> to vector<32x1xf32>
    %240 = tpu.reciprocal %239 {approx = true} : vector<32x1xf32> -> vector<32x1xf32>
    %241 = vector.broadcast %240 : vector<32x1xf32> to vector<32x32xf32>
    %242 = arith.mulf %237, %241 : vector<32x32xf32>
    %cst_106 = arith.constant dense<0.000000e+00> : vector<32x8xf32>
    %243 = tpu.matmul %242, %230, %cst_106 {dimension_numbers = #tpu.dot_dimension_numbers<[1], [0], [0], [1], [0, 0, 1, 1], [], []>} : vector<32x32xf32>, vector<32x8xf32>, vector<32x8xf32> -> vector<32x8xf32>
    %c1_107 = arith.constant 1 : index
    %c24_108 = arith.constant 24 : index
    %c128_109 = arith.constant 128 : index
    %244 = vector.load %arg3[%c1_107, %c24_108, %c128_109] : memref<2x32x384xf32, #tpu.memory_space<vmem>>, vector<1x8x32xf32>
    %245 = vector.shape_cast %244 : vector<1x8x32xf32> to vector<8x32xf32>
    %cst_110 = arith.constant dense<0.000000e+00> : vector<32x32xf32>
    %246 = tpu.matmul %243, %245, %cst_110 {dimension_numbers = #tpu.dot_dimension_numbers<[1], [0], [0], [1], [0, 0, 1, 1], [], []>} : vector<32x8xf32>, vector<8x32xf32>, vector<32x32xf32> -> vector<32x32xf32>
    %247 = arith.addf %227, %246 : vector<32x32xf32>
    %248 = arith.addf %157, %247 : vector<32x32xf32>
    %c1_111 = arith.constant 1 : index
    %c2_112 = arith.constant 2 : index
    %c0_113 = arith.constant 0 : index
    %249 = vector.load %arg5[%c1_111, %c2_112, %c0_113] : memref<2x8x128xf32, #tpu.memory_space<vmem>>, vector<1x1x32xf32>
    %250 = vector.shape_cast %249 : vector<1x1x32xf32> to vector<1x32xf32>
    %c1_114 = arith.constant 1 : index
    %c3_115 = arith.constant 3 : index
    %c0_116 = arith.constant 0 : index
    %251 = vector.load %arg5[%c1_114, %c3_115, %c0_116] : memref<2x8x128xf32, #tpu.memory_space<vmem>>, vector<1x1x32xf32>
    %252 = vector.shape_cast %251 : vector<1x1x32xf32> to vector<1x32xf32>
    %cst_117 = arith.constant dense<0.000000e+00> : vector<32xf32>
    %253 = vector.multi_reduction <add>, %248, %cst_117 [1] : vector<32x32xf32> to vector<32xf32>
    %254 = vector.shape_cast %253 : vector<32xf32> to vector<32x1xf32>
    %cst_118 = arith.constant 3.200000e+01 : f32
    %255 = vector.broadcast %cst_118 : f32 to vector<32x1xf32>
    %256 = arith.divf %254, %255 : vector<32x1xf32>
    %257 = vector.broadcast %256 : vector<32x1xf32> to vector<32x32xf32>
    %258 = arith.subf %248, %257 : vector<32x32xf32>
    %259 = arith.mulf %258, %258 : vector<32x32xf32>
    %cst_119 = arith.constant dense<0.000000e+00> : vector<32xf32>
    %260 = vector.multi_reduction <add>, %259, %cst_119 [1] : vector<32x32xf32> to vector<32xf32>
    %261 = vector.shape_cast %260 : vector<32xf32> to vector<32x1xf32>
    %cst_120 = arith.constant 3.200000e+01 : f32
    %262 = vector.broadcast %cst_120 : f32 to vector<32x1xf32>
    %263 = arith.divf %261, %262 : vector<32x1xf32>
    %cst_121 = arith.constant 9.99999974E-6 : f32
    %264 = vector.broadcast %cst_121 : f32 to vector<32x1xf32>
    %265 = arith.addf %263, %264 : vector<32x1xf32>
    %266 = math.rsqrt %265 : vector<32x1xf32>
    %267 = vector.broadcast %266 : vector<32x1xf32> to vector<32x32xf32>
    %268 = arith.mulf %258, %267 : vector<32x32xf32>
    %269 = vector.broadcast %250 : vector<1x32xf32> to vector<32x32xf32>
    %270 = arith.mulf %268, %269 : vector<32x32xf32>
    %271 = vector.broadcast %252 : vector<1x32xf32> to vector<32x32xf32>
    %272 = arith.addf %270, %271 : vector<32x32xf32>
    %c1_122 = arith.constant 1 : index
    %c0_123 = arith.constant 0 : index
    %c256_124 = arith.constant 256 : index
    %273 = vector.load %arg3[%c1_122, %c0_123, %c256_124] : memref<2x32x384xf32, #tpu.memory_space<vmem>>, vector<1x32x128xf32>
    %274 = vector.shape_cast %273 : vector<1x32x128xf32> to vector<32x128xf32>
    %cst_125 = arith.constant dense<0.000000e+00> : vector<32x128xf32>
    %275 = tpu.matmul %272, %274, %cst_125 {dimension_numbers = #tpu.dot_dimension_numbers<[1], [0], [0], [1], [0, 0, 1, 1], [], []>} : vector<32x32xf32>, vector<32x128xf32>, vector<32x128xf32> -> vector<32x128xf32>
    %c1_126 = arith.constant 1 : index
    %c4_127 = arith.constant 4 : index
    %c0_128 = arith.constant 0 : index
    %276 = vector.load %arg5[%c1_126, %c4_127, %c0_128] : memref<2x8x128xf32, #tpu.memory_space<vmem>>, vector<1x1x128xf32>
    %277 = vector.shape_cast %276 : vector<1x1x128xf32> to vector<1x128xf32>
    %278 = vector.broadcast %277 : vector<1x128xf32> to vector<32x128xf32>
    %279 = arith.addf %275, %278 : vector<32x128xf32>
    %cst_129 = arith.constant 0.000000e+00 : f32
    %280 = vector.broadcast %cst_129 : f32 to vector<32x128xf32>
    %281 = arith.maximumf %279, %280 : vector<32x128xf32>
    %c1_130 = arith.constant 1 : index
    %c0_131 = arith.constant 0 : index
    %c0_132 = arith.constant 0 : index
    %282 = vector.load %arg4[%c1_130, %c0_131, %c0_132] : memref<2x128x32xf32, #tpu.memory_space<vmem>>, vector<1x128x32xf32>
    %283 = vector.shape_cast %282 : vector<1x128x32xf32> to vector<128x32xf32>
    %cst_133 = arith.constant dense<0.000000e+00> : vector<32x32xf32>
    %284 = tpu.matmul %281, %283, %cst_133 {dimension_numbers = #tpu.dot_dimension_numbers<[1], [0], [0], [1], [0, 0, 1, 1], [], []>} : vector<32x128xf32>, vector<128x32xf32>, vector<32x32xf32> -> vector<32x32xf32>
    %c1_134 = arith.constant 1 : index
    %c5_135 = arith.constant 5 : index
    %c0_136 = arith.constant 0 : index
    %285 = vector.load %arg5[%c1_134, %c5_135, %c0_136] : memref<2x8x128xf32, #tpu.memory_space<vmem>>, vector<1x1x32xf32>
    %286 = vector.shape_cast %285 : vector<1x1x32xf32> to vector<1x32xf32>
    %287 = vector.broadcast %286 : vector<1x32xf32> to vector<32x32xf32>
    %288 = arith.addf %284, %287 : vector<32x32xf32>
    %289 = arith.addf %272, %288 : vector<32x32xf32>
    %c1_137 = arith.constant 1 : index
    %c6_138 = arith.constant 6 : index
    %c0_139 = arith.constant 0 : index
    %290 = vector.load %arg5[%c1_137, %c6_138, %c0_139] : memref<2x8x128xf32, #tpu.memory_space<vmem>>, vector<1x1x32xf32>
    %291 = vector.shape_cast %290 : vector<1x1x32xf32> to vector<1x32xf32>
    %c1_140 = arith.constant 1 : index
    %c7_141 = arith.constant 7 : index
    %c0_142 = arith.constant 0 : index
    %292 = vector.load %arg5[%c1_140, %c7_141, %c0_142] : memref<2x8x128xf32, #tpu.memory_space<vmem>>, vector<1x1x32xf32>
    %293 = vector.shape_cast %292 : vector<1x1x32xf32> to vector<1x32xf32>
    %cst_143 = arith.constant dense<0.000000e+00> : vector<32xf32>
    %294 = vector.multi_reduction <add>, %289, %cst_143 [1] : vector<32x32xf32> to vector<32xf32>
    %295 = vector.shape_cast %294 : vector<32xf32> to vector<32x1xf32>
    %cst_144 = arith.constant 3.200000e+01 : f32
    %296 = vector.broadcast %cst_144 : f32 to vector<32x1xf32>
    %297 = arith.divf %295, %296 : vector<32x1xf32>
    %298 = vector.broadcast %297 : vector<32x1xf32> to vector<32x32xf32>
    %299 = arith.subf %289, %298 : vector<32x32xf32>
    %300 = arith.mulf %299, %299 : vector<32x32xf32>
    %cst_145 = arith.constant dense<0.000000e+00> : vector<32xf32>
    %301 = vector.multi_reduction <add>, %300, %cst_145 [1] : vector<32x32xf32> to vector<32xf32>
    %302 = vector.shape_cast %301 : vector<32xf32> to vector<32x1xf32>
    %cst_146 = arith.constant 3.200000e+01 : f32
    %303 = vector.broadcast %cst_146 : f32 to vector<32x1xf32>
    %304 = arith.divf %302, %303 : vector<32x1xf32>
    %cst_147 = arith.constant 9.99999974E-6 : f32
    %305 = vector.broadcast %cst_147 : f32 to vector<32x1xf32>
    %306 = arith.addf %304, %305 : vector<32x1xf32>
    %307 = math.rsqrt %306 : vector<32x1xf32>
    %308 = vector.broadcast %307 : vector<32x1xf32> to vector<32x32xf32>
    %309 = arith.mulf %299, %308 : vector<32x32xf32>
    %310 = vector.broadcast %291 : vector<1x32xf32> to vector<32x32xf32>
    %311 = arith.mulf %309, %310 : vector<32x32xf32>
    %312 = vector.broadcast %293 : vector<1x32xf32> to vector<32x32xf32>
    %313 = arith.addf %311, %312 : vector<32x32xf32>
    %c0_148 = arith.constant 0 : index
    %c0_149 = arith.constant 0 : index
    %314 = vector.load %arg6[%c0_148, %c0_149] : memref<40x128xf32, #tpu.memory_space<vmem>>, vector<32x128xf32>
    %cst_150 = arith.constant dense<0.000000e+00> : vector<32x128xf32>
    %315 = tpu.matmul %313, %314, %cst_150 {dimension_numbers = #tpu.dot_dimension_numbers<[1], [0], [0], [1], [0, 0, 1, 1], [], []>} : vector<32x32xf32>, vector<32x128xf32>, vector<32x128xf32> -> vector<32x128xf32>
    %c32 = arith.constant 32 : index
    %c0_151 = arith.constant 0 : index
    %316 = vector.load %arg6[%c32, %c0_151] : memref<40x128xf32, #tpu.memory_space<vmem>>, vector<1x128xf32>
    %317 = vector.broadcast %316 : vector<1x128xf32> to vector<32x128xf32>
    %318 = arith.addf %315, %317 : vector<32x128xf32>
    %c0_152 = arith.constant 0 : index
    %c0_153 = arith.constant 0 : index
    %319 = vector.load %arg7[%c0_152, %c0_153] : memref<32x128xf32, #tpu.memory_space<vmem>>, vector<32x128xf32>
    tpu.vector_store %arg7[%c0_152, %c0_153], %318 {strides = array<i32>} : memref<32x128xf32, #tpu.memory_space<vmem>>, vector<32x128xf32>,
    return
  }
  func.func @transform_0(%arg0: i32) -> (i32, i32) {
    %c0_i32 = arith.constant 0 : i32
    %c0_i32_0 = arith.constant 0 : i32
    %c0_i32_1 = arith.constant 0 : i32
    return %c0_i32, %c0_i32_0 : i32, i32
  }
  func.func @transform_1(%arg0: i32) -> (i32, i32) {
    %c0_i32 = arith.constant 0 : i32
    %c0_i32_0 = arith.constant 0 : i32
    %c0_i32_1 = arith.constant 0 : i32
    return %c0_i32, %c0_i32_0 : i32, i32
  }
  func.func @transform_2(%arg0: i32) -> (i32, i32, i32) {
    %c0_i32 = arith.constant 0 : i32
    %c0_i32_0 = arith.constant 0 : i32
    %c0_i32_1 = arith.constant 0 : i32
    %c0_i32_2 = arith.constant 0 : i32
    return %c0_i32, %c0_i32_0, %c0_i32_1 : i32, i32, i32
  }
  func.func @transform_3(%arg0: i32) -> (i32, i32, i32) {
    %c0_i32 = arith.constant 0 : i32
    %c0_i32_0 = arith.constant 0 : i32
    %c0_i32_1 = arith.constant 0 : i32
    %c0_i32_2 = arith.constant 0 : i32
    return %c0_i32, %c0_i32_0, %c0_i32_1 : i32, i32, i32
  }
  func.func @transform_4(%arg0: i32) -> (i32, i32, i32) {
    %c0_i32 = arith.constant 0 : i32
    %c0_i32_0 = arith.constant 0 : i32
    %c0_i32_1 = arith.constant 0 : i32
    %c0_i32_2 = arith.constant 0 : i32
    return %c0_i32, %c0_i32_0, %c0_i32_1 : i32, i32, i32
  }
  func.func @transform_5(%arg0: i32) -> (i32, i32) {
    %c0_i32 = arith.constant 0 : i32
    %c0_i32_0 = arith.constant 0 : i32
    %c0_i32_1 = arith.constant 0 : i32
    return %c0_i32, %c0_i32_0 : i32, i32
  }
  func.func @transform_6(%arg0: i32) -> (i32, i32) {
    %c0_i32 = arith.constant 0 : i32
    %c0_i32_0 = arith.constant 0 : i32
    %c0_i32_1 = arith.constant 0 : i32
    return %c0_i32, %c0_i32_0 : i32, i32
  }
}

</mosaic_0001>

<bundles_post_ra>
// kernel: tpu_custom_call.1
= control target key start
LH: loop header
LB: loop body
LE: loop exit
PB: predicated region body
PF: predicated region fallthrough
CT: control target
= control target key end

     0   :  { %vm41_vm0 = vcmask 261120   ;;  %s6577_s0 = inlined_call_operand.vmem [shape: f32[32,32], index: 0, kind: input, shape index: {}]   ;;  %s6578_s1 = inlined_call_operand.vmem [shape: f32[32,32], index: 1, kind: input, shape index: {}]   ;;  %s6579_s2 = inlined_call_operand.vmem [shape: f32[2,32,384], index: 2, kind: input, shape index: {}]   ;;  %s6580_s3 = inlined_call_operand.vmem [shape: f32[2,128,32], index: 3, kind: input, shape index: {}]   ;;  %s6581_s4 = inlined_call_operand.vmem [shape: f32[2,8,128], index: 4, kind: input, shape index: {}]   ;;  %s6582_s5 = inlined_call_operand.vmem [shape: f32[40,128], index: 5, kind: input, shape index: {}]   ;;  %s6583_s6 = inlined_call_operand.hbm [shape: f32[32,128], index: 6, kind: output, shape index: {}]  }
   0x1   :  { %v32_v0 = vld [vmem:[%s6579_s2] sm:$0xff]  ;;  %v33_v1 = vld [vmem:[%s6579_s2 + $0x18] sm:$0xff]  ;;  %v34_v2 = vld [vmem:[%s6579_s2 + $0x30] sm:$0xff] }
   0x2   :  { %v4965_v3 = vpack.c.bf16 %v33_v1, %v32_v0  ;;  %v35_v4 = vld [vmem:[%s6579_s2 + $0x48] sm:$0xff]  ;;  %v24_v5 = vld [vmem:[%s6577_s0] sm:$0xff] }
   0x3   :  { %v4969_v6 = vpack.c.bf16 %v35_v4, %v34_v2  ;;  %4539 = vmatprep.mubr.msk.f32.mxu1 %vm41_vm0, %v24_v5 }
   0x4   :  { %11 = vsyncpa [#allocation3], 0  ;;  %4966 = vmatprep.subr.bf16.mxu1 %v4965_v3  ;;  %v5693_v7 = vld [vmem:[%s6577_s0 + $0x8] sm:$0xff]  ;;  %v26_v8 = vld [vmem:[%s6577_s0 + $0x10] sm:$0xff]  ;;  %vm152_vm1 = vcmask 64512   ;;  %s5625_s15 = smov 88  }
   0x5   :  { %4968 = vmatpush3.bf16.msra.mxu1 %v4965_v3  ;;  %v5704_v9 = vld [vmem:[%s6577_s0 + $0x18] sm:$0xff]  ;;  %v4082_v10 = vld [vmem:[%s6581_s4] ss:$0 sm:$0xff]  ;;  %s5626_s16 = smov 96   ;;  %s5627_s17 = smov 120   ;;  %vm5747_vm2 = vmpackc.low %vm152_vm1, %vm152_vm1 }
   0x6   :  { %4970 = vmatprep.subr.bf16.mxu1 %v4969_v6  ;;  %v5780_v42 = vld [vmem:[%s6578_s1 + $0x8] sm:$0xff]  ;;  %v5785_v43 = vld [vmem:[%s6578_s1] sm:$0xff]  ;;  %v5793_v49 = vld [vmem:[%s6578_s1 + $0x10] sm:$0xff]  ;;  %s5628_s26 = smov 64   ;;  %s5629_s27 = smov 80  }
   0x7   :  { %v5799_v52 = vld [vmem:[%s6578_s1 + $0x18] sm:$0xff]  ;;  %s5630_s28 = smov 112   ;;  %s5631_s7 = smov 56  }
   0x8   :  { %s5632_s8 = smov 72   ;;  %s5633_s9 = smov 104  }
   0x9   :  { %4972 = vmatpush3.bf16.msra.mxu1 %v4969_v6  ;;  %s5634_s12 = smov 48   ;;  %s5635_s18 = smov 40  }
   0xa   :  { %s5636_s13 = smov [#allocation2]  }
   0xb   :  { %s4071_s14 = sshll.u32 %s5636_s13, 4  ;;  %s4072_s14 = int_to_ptr.vmem [resolvable:$true] %s4071_s14 }
   0xc   :  { %4540 = vmatmul.mubr.msk.f32.vlgmr.msra.gmra.mrb[0].mxu1 %vm41_vm0, %v5693_v7  ;;  %p5606_p1 = scmp.lt.s32.totalorder %s4072_s14, %s4072_s14 }
   0xd   :  { %4542 = vmatprep.mubr.msk.f32.mxu1 %vm41_vm0, %v26_v8 }
  0x10   :  { %4543 = vmatmul.mubr.msk.f32.gmra.mrb[2].mxu1 %vm41_vm0, %v5704_v9 }
  0xdf   :  { %v4541_v11 = vpop.f32.mrb[0].mxu1 }
  0xe0   :  { %v5711_v12 = vadd.f32 %v4541_v11, %v4082_v10  ;;  %v120_v13 = vpop.f32.mrb[1].mxu1 }
  0xe1   :  { %v5713_v14 = vadd.f32 %v4082_v10, %v120_v13 }
  0xe3   :  { %v4544_v15 = vpop.f32.mrb[2].mxu1  ;;  %4553 = vmatprep.mubr.msk.f32.mxu1 %vm152_vm1, %v5713_v14  ;;  %v5719_v16 = vpack.i.bf16 %v5711_v12, %v5713_v14 }
  0xe4   :  { %v5721_v17 = vadd.f32 %v4544_v15, %v4082_v10  ;;  %v130_v18 = vpop.f32.mrb[3].mxu1 }
  0xe5   :  { %v5723_v19 = vadd.f32 %v4082_v10, %v130_v18  ;;  %5286 = vrot.lane.b32.xlu1 %v5719_v16, %s5625_s15  ;;  %5276 = vrot.lane.b32.xlu0 %v5719_v16, %s5626_s16 }
  0xe7   :  { %v5731_v20 = vpack.i.bf16 %v5721_v17, %v5723_v19 }
  0xe9   :  { %5291 = vrot.lane.b32.xlu1 %v5731_v20, %s5625_s15  ;;  %5281 = vrot.lane.b32.xlu0 %v5731_v20, %s5626_s16 }
  0xed   :  { %515 = vrot.lane.b32.xlu1 %v5711_v12, %s5627_s17  ;;  %513 = vrot.lane.b32.xlu0 %v5713_v14, %s5627_s17 }
  0xf1   :  { %519 = vrot.lane.b32.xlu1 %v5721_v17, %s5627_s17  ;;  %517 = vrot.lane.b32.xlu0 %v5723_v19, %s5627_s17 }
 0x157   :  { %v5277_v21 = vpop.permute.xlu0 %5276  ;;  %v5287_v29 = vpop.permute.xlu1 %5286 }
 0x158   :  { %v5279_v22 = vunpack.i.h.bf16 %v5277_v21  ;;  %v5278_v23 = vunpack.i.l.bf16 %v5277_v21  ;;  %v5289_v31 = vunpack.i.h.bf16 %v5287_v29  ;;  %v5288_v32 = vunpack.i.l.bf16 %v5287_v29 }
 0x15a   :  { %v4973_v25 = vpack.c.bf16 %v5279_v22, %v5278_v23  ;;  %v4993_v33 = vpack.c.bf16 %v5289_v31, %v5288_v32 }
 0x15b   :  { %v5282_v26 = vpop.permute.xlu0 %5281  ;;  %v5292_v34 = vpop.permute.xlu1 %5291 }
 0x15c   :  { %v5284_v27 = vunpack.i.h.bf16 %v5282_v26  ;;  %v5283_v28 = vunpack.i.l.bf16 %v5282_v26  ;;  %4975 = vmatprep.subr.msk.bf16.mxu1 %vm5747_vm2, %v4973_v25  ;;  %v5294_v35 = vunpack.i.h.bf16 %v5292_v34  ;;  %v5293_v36 = vunpack.i.l.bf16 %v5292_v34 }
 0x15d   :  { %4978 = vmatpush3.bf16.xpose.msk.msra.mxu1 %vm5747_vm2, %v4973_v25 }
 0x15e   :  { %v4979_v30 = vpack.c.bf16 %v5284_v27, %v5283_v28  ;;  %v4999_v37 = vpack.c.bf16 %v5294_v35, %v5293_v36 }
 0x15f   :  { %v514_v38 = vpop.permute.xlu0 %513  ;;  %v516_v39 = vpop.permute.xlu1 %515 }
 0x160   :  { %4981 = vmatprep.subr.msk.bf16.mxu1 %vm5747_vm2, %v4979_v30 }
 0x163   :  { %v518_v40 = vpop.permute.xlu0 %517  ;;  %v520_v41 = vpop.permute.xlu1 %519 }
 0x165   :  { %4984 = vmatpush3.bf16.xpose.msk.msra.mxu1 %vm5747_vm2, %v4979_v30 }
 0x166   :  { %4995 = vmatprep.subr.msk.bf16.mxu1 %vm5747_vm2, %v4993_v33 }
 0x16c   :  { %4554 = vmatmul.mubr.msk.f32.vlgmr.msra.gmra.mrb[4].mxu1 %vm152_vm1, %v5711_v12 }
 0x16d   :  { %4556 = vmatprep.mubr.msk.f32.mxu1 %vm152_vm1, %v5723_v19  ;;  %4998 = vmatpush3.bf16.xpose.msk.msra.mxu1 %vm5747_vm2, %v4993_v33 }
 0x16e   :  { %5001 = vmatprep.subr.msk.bf16.mxu1 %vm5747_vm2, %v4999_v37 }
 0x170   :  { %4557 = vmatmul.mubr.msk.f32.gmra.mrb[6].mxu1 %vm152_vm1, %v5721_v17 }
 0x171   :  { %4589 = vmatprep.mubr.msk.f32.mxu1 %vm152_vm1, %v514_v38 }
 0x175   :  { %5004 = vmatpush3.bf16.xpose.msk.msra.mxu1 %vm5747_vm2, %v4999_v37 }
 0x17c   :  { %4590 = vmatmul.mubr.msk.f32.vlgmr.msra.gmra.mrb[8].mxu1 %vm152_vm1, %v516_v39 }
 0x17d   :  { %4592 = vmatprep.mubr.msk.f32.mxu1 %vm152_vm1, %v518_v40 }
 0x180   :  { %4593 = vmatmul.mubr.msk.f32.gmra.mrb[10].mxu1 %vm152_vm1, %v520_v41 }
 0x23f   :  { %v4555_v44 = vpop.f32.mrb[4].mxu1 }
 0x240   :  { %v241_v45 = vadd.f32 %v4555_v44, %v5780_v42  ;;  %v235_v46 = vpop.f32.mrb[5].mxu1 }
 0x241   :  { %v236_v47 = vadd.f32 %v235_v46, %v5785_v43 }
 0x242   :  { %v257_v48 = vsel %vm41_vm0, %v241_v45, -inf }
 0x243   :  { %258 = vmax.xlane.f32.xlu1 %v257_v48  ;;  %v4558_v50 = vpop.f32.mrb[6].mxu1  ;;  %v254_v51 = vsel %vm41_vm0, %v236_v47, -inf }
 0x244   :  { %v245_v53 = vpop.f32.mrb[7].mxu1  ;;  %255 = vmax.xlane.f32.xlu0 %v254_v51  ;;  %v251_v55 = vadd.f32 %v4558_v50, %v5799_v52 }
 0x245   :  { %v246_v54 = vadd.f32 %v245_v53, %v5793_v49 }
 0x246   :  { %v263_v57 = vsel %vm41_vm0, %v251_v55, -inf }
 0x247   :  { %v260_v56 = vsel %vm41_vm0, %v246_v54, -inf }
 0x248   :  { %261 = vmax.xlane.f32.xlu0 %v260_v56 }
 0x24c   :  { %264 = vmax.xlane.f32.xlu0 %v263_v57 }
 0x24f   :  { %v4591_v58 = vpop.f32.mrb[8].mxu1 }
 0x250   :  { %v611_v59 = vpop.f32.mrb[9].mxu1  ;;  %v5838_v28 = vadd.f32 %v4591_v58, %v5780_v42 }
 0x251   :  { %v5835_v27 = vadd.f32 %v611_v59, %v5785_v43 }
 0x252   :  { %v633_v32 = vsel %vm41_vm0, %v5838_v28, -inf }
 0x253   :  { %v4594_v60 = vpop.f32.mrb[10].mxu1  ;;  %v630_v30 = vsel %vm41_vm0, %v5835_v27, -inf }
 0x254   :  { %v621_v61 = vpop.f32.mrb[11].mxu1  ;;  %v5846_v31 = vadd.f32 %v4594_v60, %v5799_v52 }
 0x255   :  { %v5841_v29 = vadd.f32 %v621_v61, %v5793_v49 }
 0x256   :  { %v639_v34 = vsel %vm41_vm0, %v5846_v31, -inf }
 0x257   :  { %v636_v33 = vsel %vm41_vm0, %v5841_v29, -inf }
 0x2d0   :  { %v259_v62 = vpop.xlane.xlu1 %258 }
 0x2d1   :  { %v267_v63 = vsub.f32 %v241_v45, %v259_v62  ;;  %v256_v0 = vpop.xlane.xlu0 %255 }
 0x2d2   :  { %v266_v1 = vsub.f32 %v236_v47, %v256_v0 }
 0x2d3   :  { %v272_v2 = vmul.f32 1.442695, %v267_v63 }
 0x2d4   :  { %v270_v3 = vmul.f32 1.442695, %v266_v1 }
 0x2d5   :  { %5435 = vpow2.f32 %v272_v2  ;;  %v262_v4 = vpop.xlane.xlu0 %261 }
 0x2d6   :  { %5437 = vpow2.f32 %v270_v3  ;;  %v268_v5 = vsub.f32 %v246_v54, %v262_v4 }
 0x2d8   :  { %v274_v6 = vmul.f32 1.442695, %v268_v5 }
 0x2d9   :  { %v265_v8 = vpop.xlane.xlu0 %264 }
 0x2da   :  { %5439 = vpow2.f32 %v274_v6  ;;  %v269_v10 = vsub.f32 %v251_v55, %v265_v8 }
 0x2dc   :  { %v276_v11 = vmul.f32 1.442695, %v269_v10 }
 0x2de   :  { %5441 = vpow2.f32 %v276_v11 }
 0x2df   :  { %v5805_v13 = vpop.eup %5435 }
 0x2e0   :  { %v5438_v15 = vpop.eup %5437  ;;  %v281_v18 = vsel %vm41_vm0, %v5805_v13, 0.0 }
 0x2e1   :  { %282 = vadd.xlane.f32.xlu0 %v281_v18  ;;  %v278_v21 = vsel %vm41_vm0, %v5438_v15, 0.0 }
 0x2e2   :  { %279 = vadd.xlane.f32.xlu1 %v278_v21 }
 0x2e4   :  { %v5810_v22 = vpop.eup %5439 }
 0x2e5   :  { %v284_v23 = vsel %vm41_vm0, %v5810_v22, 0.0 }
 0x2e6   :  { %285 = vadd.xlane.f32.xlu1 %v284_v23 }
 0x2e8   :  { %v5814_v25 = vpop.eup %5441 }
 0x2e9   :  { %v287_v26 = vsel %vm41_vm0, %v5814_v25, 0.0 }
 0x2ea   :  { %288 = vadd.xlane.f32.xlu0 %v287_v26 }
 0x2f7   :  { %5296 = vrot.lane.b32.xlu1 %v5719_v16, %s5628_s26 }
 0x2fb   :  { %5306 = vrot.lane.b32.xlu1 %v5719_v16, %s5629_s27 }
 0x2ff   :  { %5311 = vrot.lane.b32.xlu1 %v5731_v20, %s5629_s27 }
 0x300   :  { %5301 = vrot.lane.b32.xlu0 %v5731_v20, %s5628_s26 }
 0x303   :  { %887 = vrot.lane.b32.xlu1 %v5711_v12, %s5630_s28 }
 0x304   :  { %885 = vrot.lane.b32.xlu0 %v5713_v14, %s5630_s28 }
 0x307   :  { %891 = vrot.lane.b32.xlu1 %v5721_v17, %s5630_s28 }
 0x308   :  { %889 = vrot.lane.b32.xlu0 %v5723_v19, %s5630_s28 }
 0x327   :  { %631 = vmax.xlane.f32.xlu0 %v630_v30 }
 0x32b   :  { %634 = vmax.xlane.f32.xlu1 %v633_v32  ;;  %637 = vmax.xlane.f32.xlu0 %v636_v33 }
 0x32f   :  { %640 = vmax.xlane.f32.xlu0 %v639_v34 }
 0x36e   :  { %v283_v36 = vpop.xlane.xlu0 %282 }
 0x36f   :  { %v280_v35 = vpop.xlane.xlu1 %279 }
 0x370   :  { %5443 = vrcp.f32 %v280_v35 }
 0x371   :  { %5445 = vrcp.f32 %v283_v36  ;;  %v407_v36 = vld [vmem:[%s6579_s2 + $0x8] sm:$0xff] }
 0x373   :  { %v286_v37 = vpop.xlane.xlu1 %285 }
 0x374   :  { %5447 = vrcp.f32 %v286_v37 }
 0x377   :  { %v5297_v38 = vpop.permute.xlu1 %5296  ;;  %v289_v39 = vpop.xlane.xlu0 %288 }
 0x378   :  { %v5299_v40 = vunpack.i.h.bf16 %v5297_v38  ;;  %v5298_v41 = vunpack.i.l.bf16 %v5297_v38  ;;  %5449 = vrcp.f32 %v289_v39 }
 0x37a   :  { %v5444_v44 = vpop.eup %5443  ;;  %v4985_v45 = vpack.c.bf16 %v5299_v40, %v5298_v41 }
 0x37b   :  { %v5307_v46 = vpop.permute.xlu1 %5306  ;;  %v5302_v47 = vpop.permute.xlu0 %5301  ;;  %v294_v48 = vmul.f32 %v5444_v44, %v5438_v15 }
 0x37c   :  { %v5309_v50 = vunpack.i.h.bf16 %v5307_v46  ;;  %v5308_v51 = vunpack.i.l.bf16 %v5307_v46  ;;  %v5304_v53 = vunpack.i.h.bf16 %v5302_v47  ;;  %v5303_v54 = vunpack.i.l.bf16 %v5302_v47  ;;  %4986 = vmatprep.subr.bf16.mxu0 %v4985_v45  ;;  %v5446_v57 = vpop.eup %5445 }
 0x37d   :  { %4988 = vmatpush3.bf16.msra.mxu0 %v4985_v45  ;;  %4567 = vmatprep.mubr.msk.f32.mxu0 %vm41_vm0, %v294_v48  ;;  %v295_v0 = vmul.f32 %v5446_v57, %v5805_v13 }
 0x37e   :  { %v5013_v55 = vpack.c.bf16 %v5309_v50, %v5308_v51  ;;  %v4989_v56 = vpack.c.bf16 %v5304_v53, %v5303_v54  ;;  %v5448_v60 = vpop.eup %5447 }
 0x37f   :  { %v5312_v58 = vpop.permute.xlu1 %5311  ;;  %v886_v59 = vpop.permute.xlu0 %885  ;;  %v296_v2 = vmul.f32 %v5448_v60, %v5810_v22 }
 0x380   :  { %v5314_v61 = vunpack.i.h.bf16 %v5312_v58  ;;  %v5313_v62 = vunpack.i.l.bf16 %v5312_v58  ;;  %4990 = vmatprep.subr.bf16.mxu0 %v4989_v56  ;;  %5015 = vmatprep.subr.msk.bf16.mxu1 %vm5747_vm2, %v5013_v55 }
 0x381   :  { %4625 = vmatprep.mubr.msk.f32.mxu1 %vm152_vm1, %v886_v59  ;;  %4992 = vmatpush3.bf16.msra.mxu0 %v4989_v56 }
 0x382   :  { %v5019_v63 = vpack.c.bf16 %v5314_v61, %v5313_v62  ;;  %5018 = vmatpush3.bf16.xpose.msk.msra.mxu1 %vm5747_vm2, %v5013_v55  ;;  %v5450_v1 = vpop.eup %5449  ;;  %4573 = vmatprep.subr.mxu0 %v407_v36 }
 0x383   :  { %v297_v3 = vmul.f32 %v5450_v1, %v5814_v25  ;;  %v888_v4 = vpop.permute.xlu1 %887  ;;  %v890_v5 = vpop.permute.xlu0 %889 }
 0x384   :  { %4568 = vmatmul.mubr.msk.f32.vlgmr.msra.gmra.mrb[0].mxu0 %vm41_vm0, %v295_v0  ;;  %5021 = vmatprep.subr.msk.bf16.mxu1 %vm5747_vm2, %v5019_v63 }
 0x385   :  { %4570 = vmatprep.mubr.msk.f32.mxu0 %vm41_vm0, %v296_v2  ;;  %4574 = vmatpush3.msra.mxu0 %v407_v36 }
 0x387   :  { %v892_v6 = vpop.permute.xlu1 %891 }
 0x388   :  { %4571 = vmatmul.mubr.msk.f32.gmra.mrb[2].mxu0 %vm41_vm0, %v297_v3 }
 0x38a   :  { %5024 = vmatpush3.bf16.xpose.msk.msra.mxu1 %vm5747_vm2, %v5019_v63 }
 0x391   :  { %4626 = vmatmul.mubr.msk.f32.vlgmr.msra.gmra.mrb[12].mxu1 %vm152_vm1, %v888_v4 }
 0x392   :  { %4628 = vmatprep.mubr.msk.f32.mxu1 %vm152_vm1, %v890_v5 }
 0x395   :  { %4629 = vmatmul.mubr.msk.f32.gmra.mrb[14].mxu1 %vm152_vm1, %v892_v6 }
 0x3b4   :  { %v632_v8 = vpop.xlane.xlu0 %631 }
 0x3b5   :  { %v642_v10 = vsub.f32 %v5835_v27, %v632_v8 }
 0x3b7   :  { %v646_v11 = vmul.f32 1.442695, %v642_v10 }
 0x3b8   :  { %v635_v13 = vpop.xlane.xlu1 %634  ;;  %v638_v15 = vpop.xlane.xlu0 %637 }
 0x3b9   :  { %5451 = vpow2.f32 %v646_v11  ;;  %v643_v18 = vsub.f32 %v5838_v28, %v635_v13  ;;  %v644_v21 = vsub.f32 %v5841_v29, %v638_v15 }
 0x3bb   :  { %v648_v22 = vmul.f32 1.442695, %v643_v18  ;;  %v650_v23 = vmul.f32 1.442695, %v644_v21 }
 0x3bc   :  { %v641_v25 = vpop.xlane.xlu0 %640 }
 0x3bd   :  { %5453 = vpow2.f32 %v648_v22  ;;  %v645_v26 = vsub.f32 %v5846_v31, %v641_v25 }
 0x3be   :  { %5455 = vpow2.f32 %v650_v23 }
 0x3bf   :  { %v652_v30 = vmul.f32 1.442695, %v645_v26 }
 0x3c1   :  { %5457 = vpow2.f32 %v652_v30 }
 0x3c3   :  { %v5452_v32 = vpop.eup %5451 }
 0x3c4   :  { %v654_v27 = vsel %vm41_vm0, %v5452_v32, 0.0 }
 0x3c5   :  { %655 = vadd.xlane.f32.xlu1 %v654_v27 }
 0x3c7   :  { %v5878_v33 = vpop.eup %5453 }
 0x3c8   :  { %v5880_v34 = vpop.eup %5455  ;;  %v657_v28 = vsel %vm41_vm0, %v5878_v33, 0.0 }
 0x3c9   :  { %658 = vadd.xlane.f32.xlu0 %v657_v28  ;;  %v660_v29 = vsel %vm41_vm0, %v5880_v34, 0.0 }
 0x3ca   :  { %661 = vadd.xlane.f32.xlu1 %v660_v29 }
 0x3cb   :  { %v5886_v31 = vpop.eup %5457 }
 0x3cc   :  { %v663_v35 = vsel %vm41_vm0, %v5886_v31, 0.0 }
 0x3cd   :  { %664 = vadd.xlane.f32.xlu0 %v663_v35 }
 0x3db   :  { %5316 = vrot.lane.b32.xlu1 %v5719_v16, %s5631_s7 }
 0x3df   :  { %5326 = vrot.lane.b32.xlu1 %v5719_v16, %s5632_s8 }
 0x3e3   :  { %5331 = vrot.lane.b32.xlu1 %v5731_v20, %s5632_s8  ;;  %5321 = vrot.lane.b32.xlu0 %v5731_v20, %s5631_s7 }
 0x3e7   :  { %1259 = vrot.lane.b32.xlu1 %v5711_v12, %s5633_s9  ;;  %1257 = vrot.lane.b32.xlu0 %v5713_v14, %s5633_s9 }
 0x3eb   :  { %1263 = vrot.lane.b32.xlu1 %v5721_v17, %s5633_s9  ;;  %1261 = vrot.lane.b32.xlu0 %v5723_v19, %s5633_s9 }
 0x452   :  { %v656_v37 = vpop.xlane.xlu1 %655 }
 0x453   :  { %5459 = vrcp.f32 %v656_v37 }
 0x456   :  { %v659_v38 = vpop.xlane.xlu0 %658 }
 0x457   :  { %v662_v39 = vpop.xlane.xlu1 %661  ;;  %v4569_v40 = vpop.f32.mrb[0].mxu0  ;;  %5461 = vrcp.f32 %v659_v38 }
 0x458   :  { %v388_v41 = vpop.f32.mrb[1].mxu0  ;;  %5463 = vrcp.f32 %v662_v39 }
 0x459   :  { %4575 = vmatprep.mubr.msk.f32.mxu0 %vm152_vm1, %v388_v41 }
 0x45a   :  { %v665_v44 = vpop.xlane.xlu0 %664  ;;  %4576 = vmatmul.mubr.msk.f32.vlgmr.msra.gmra.mrb[4].mxu0 %vm152_vm1, %v4569_v40 }
 0x45b   :  { %v5317_v12 = vpop.permute.xlu1 %5316  ;;  %v4572_v14 = vpop.f32.mrb[2].mxu0  ;;  %5465 = vrcp.f32 %v665_v44 }
 0x45c   :  { %v5319_v45 = vunpack.i.h.bf16 %v5317_v12  ;;  %v5318_v17 = vunpack.i.l.bf16 %v5317_v12  ;;  %v398_v46 = vpop.f32.mrb[3].mxu0 }
 0x45d   :  { %v5460_v47 = vpop.eup %5459  ;;  %4578 = vmatprep.mubr.msk.f32.mxu0 %vm152_vm1, %v398_v46 }
 0x45e   :  { %v5322_v19 = vpop.permute.xlu0 %5321  ;;  %4579 = vmatmul.mubr.msk.f32.gmra.mrb[6].mxu0 %vm152_vm1, %v4572_v14  ;;  %v5005_v48 = vpack.c.bf16 %v5319_v45, %v5318_v17  ;;  %v670_v50 = vmul.f32 %v5460_v47, %v5452_v32 }
 0x45f   :  { %v5327_v51 = vpop.permute.xlu1 %5326  ;;  %v5324_v53 = vunpack.i.h.bf16 %v5322_v19  ;;  %v5323_v54 = vunpack.i.l.bf16 %v5322_v19 }
 0x460   :  { %v5329_v55 = vunpack.i.h.bf16 %v5327_v51  ;;  %v5328_v56 = vunpack.i.l.bf16 %v5327_v51  ;;  %5006 = vmatprep.subr.bf16.mxu0 %v5005_v48  ;;  %4603 = vmatprep.mubr.msk.f32.mxu0 %vm41_vm0, %v670_v50 }
 0x461   :  { %5008 = vmatpush3.bf16.msra.mxu0 %v5005_v48  ;;  %v5009_v57 = vpack.c.bf16 %v5324_v53, %v5323_v54  ;;  %v5462_v60 = vpop.eup %5461 }
 0x462   :  { %v5033_v58 = vpack.c.bf16 %v5329_v55, %v5328_v56  ;;  %v1258_v59 = vpop.permute.xlu0 %1257  ;;  %v5464_v1 = vpop.eup %5463  ;;  %v671_v4 = vmul.f32 %v5462_v60, %v5878_v33  ;;  %v783_v33 = vld [vmem:[%s6579_s2 + $0x20] sm:$0xff] }
 0x463   :  { %v5332_v61 = vpop.permute.xlu1 %5331  ;;  %5010 = vmatprep.subr.bf16.mxu0 %v5009_v57  ;;  %4661 = vmatprep.mubr.msk.f32.mxu1 %vm152_vm1, %v1258_v59  ;;  %v672_v15 = vmul.f32 %v5464_v1, %v5880_v34 }
 0x464   :  { %v5334_v62 = vunpack.i.h.bf16 %v5332_v61  ;;  %v5333_v63 = vunpack.i.l.bf16 %v5332_v61  ;;  %v4627_v0 = vpop.f32.mrb[12].mxu1  ;;  %5035 = vmatprep.subr.msk.bf16.mxu1 %vm5747_vm2, %v5033_v58 }
 0x465   :  { %v989_v2 = vadd.f32 %v4627_v0, %v5780_v42  ;;  %5012 = vmatpush3.bf16.msra.mxu0 %v5009_v57  ;;  %v983_v3 = vpop.f32.mrb[13].mxu1  ;;  %5038 = vmatpush3.bf16.xpose.msk.msra.mxu1 %vm5747_vm2, %v5033_v58  ;;  %v5466_v8 = vpop.eup %5465 }
 0x466   :  { %v5039_v5 = vpack.c.bf16 %v5334_v62, %v5333_v63  ;;  %v984_v6 = vadd.f32 %v983_v3, %v5785_v43  ;;  %v673_v22 = vmul.f32 %v5466_v8, %v5886_v31  ;;  %v1262_v32 = vpop.permute.xlu0 %1261  ;;  %4609 = vmatprep.subr.mxu0 %v783_v33 }
 0x467   :  { %v1005_v10 = vsel %vm41_vm0, %v989_v2, -inf  ;;  %v1260_v30 = vpop.permute.xlu1 %1259 }
 0x468   :  { %v4630_v11 = vpop.f32.mrb[14].mxu1  ;;  %1006 = vmax.xlane.f32.xlu1 %v1005_v10  ;;  %4604 = vmatmul.mubr.msk.f32.vlgmr.msra.gmra.mrb[8].mxu0 %vm41_vm0, %v671_v4  ;;  %v1002_v13 = vsel %vm41_vm0, %v984_v6, -inf }
 0x469   :  { %5041 = vmatprep.subr.msk.bf16.mxu1 %vm5747_vm2, %v5039_v5  ;;  %v993_v18 = vpop.f32.mrb[15].mxu1  ;;  %1003 = vmax.xlane.f32.xlu0 %v1002_v13  ;;  %v999_v23 = vadd.f32 %v4630_v11, %v5799_v52 }
 0x46a   :  { %v994_v21 = vadd.f32 %v993_v18, %v5793_v49  ;;  %4606 = vmatprep.mubr.msk.f32.mxu0 %vm41_vm0, %v672_v15  ;;  %4610 = vmatpush3.msra.mxu0 %v783_v33 }
 0x46b   :  { %v1011_v26 = vsel %vm41_vm0, %v999_v23, -inf  ;;  %v1264_v27 = vpop.permute.xlu1 %1263 }
 0x46c   :  { %4607 = vmatmul.mubr.msk.f32.gmra.mrb[10].mxu0 %vm41_vm0, %v673_v22  ;;  %v1008_v25 = vsel %vm41_vm0, %v994_v21, -inf }
 0x46d   :  { %5044 = vmatpush3.bf16.xpose.msk.msra.mxu1 %vm5747_vm2, %v5039_v5  ;;  %1009 = vmax.xlane.f32.xlu0 %v1008_v25 }
 0x471   :  { %1012 = vmax.xlane.f32.xlu0 %v1011_v26 }
 0x474   :  { %4662 = vmatmul.mubr.msk.f32.vlgmr.msra.gmra.mrb[16].mxu1 %vm152_vm1, %v1260_v30 }
 0x475   :  { %4664 = vmatprep.mubr.msk.f32.mxu1 %vm152_vm1, %v1262_v32 }
 0x478   :  { %4665 = vmatmul.mubr.msk.f32.gmra.mrb[18].mxu1 %vm152_vm1, %v1264_v27 }
 0x4f5   :  { %v1007_v34 = vpop.xlane.xlu1 %1006 }
 0x4f6   :  { %v1015_v28 = vsub.f32 %v989_v2, %v1007_v34  ;;  %v1004_v29 = vpop.xlane.xlu0 %1003 }
 0x4f7   :  { %v1014_v31 = vsub.f32 %v984_v6, %v1004_v29 }
 0x4f8   :  { %v1020_v35 = vmul.f32 1.442695, %v1015_v28 }
 0x4f9   :  { %v1018_v36 = vmul.f32 1.442695, %v1014_v31 }
 0x4fa   :  { %5467 = vpow2.f32 %v1020_v35  ;;  %v1010_v37 = vpop.xlane.xlu0 %1009 }
 0x4fb   :  { %5469 = vpow2.f32 %v1018_v36  ;;  %v1016_v38 = vsub.f32 %v994_v21, %v1010_v37 }
 0x4fd   :  { %v1022_v39 = vmul.f32 1.442695, %v1016_v38 }
 0x4fe   :  { %v1013_v40 = vpop.xlane.xlu0 %1012 }
 0x4ff   :  { %5471 = vpow2.f32 %v1022_v39  ;;  %v1017_v41 = vsub.f32 %v999_v23, %v1013_v40 }
 0x501   :  { %v1024_v44 = vmul.f32 1.442695, %v1017_v41 }
 0x503   :  { %5473 = vpow2.f32 %v1024_v44 }
 0x504   :  { %v5943_v12 = vpop.eup %5467 }
 0x505   :  { %v5470_v14 = vpop.eup %5469  ;;  %v1029_v45 = vsel %vm41_vm0, %v5943_v12, 0.0 }
 0x506   :  { %1030 = vadd.xlane.f32.xlu0 %v1029_v45  ;;  %v1026_v17 = vsel %vm41_vm0, %v5470_v14, 0.0 }
 0x507   :  { %1027 = vadd.xlane.f32.xlu1 %v1026_v17 }
 0x509   :  { %v5472_v46 = vpop.eup %5471 }
 0x50a   :  { %v1032_v47 = vsel %vm41_vm0, %v5472_v46, 0.0 }
 0x50b   :  { %1033 = vadd.xlane.f32.xlu1 %v1032_v47  ;;  %v1155_v47 = vld [vmem:[%s6579_s2 + $0x38] sm:$0xff] }
 0x50d   :  { %v5474_v19 = vpop.eup %5473 }
 0x50e   :  { %v1035_v48 = vsel %vm41_vm0, %v5474_v19, 0.0 }
 0x50f   :  { %1036 = vadd.xlane.f32.xlu0 %v1035_v48 }
 0x51c   :  { %5336 = vrot.lane.b32.xlu1 %v5719_v16, %s5634_s12 }
 0x525   :  { %5341 = vrot.lane.b32.xlu0 %v5731_v20, %s5634_s12 }
 0x53b   :  { %v4605_v50 = vpop.f32.mrb[8].mxu0 }
 0x53c   :  { %v764_v51 = vpop.f32.mrb[9].mxu0 }
 0x53d   :  { %4611 = vmatprep.mubr.msk.f32.mxu0 %vm152_vm1, %v764_v51 }
 0x53e   :  { %4612 = vmatmul.mubr.msk.f32.vlgmr.msra.gmra.mrb[4].mxu0 %vm152_vm1, %v4605_v50 }
 0x53f   :  { %v4608_v53 = vpop.f32.mrb[10].mxu0 }
 0x540   :  { %v774_v54 = vpop.f32.mrb[11].mxu0 }
 0x541   :  { %4614 = vmatprep.mubr.msk.f32.mxu0 %vm152_vm1, %v774_v54 }
 0x542   :  { %4615 = vmatmul.mubr.msk.f32.gmra.mrb[6].mxu0 %vm152_vm1, %v4608_v53 }
 0x547   :  { %v4663_v55 = vpop.f32.mrb[16].mxu1 }
 0x548   :  { %v1361_v56 = vadd.f32 %v4663_v55, %v5780_v42  ;;  %v1355_v57 = vpop.f32.mrb[17].mxu1 }
 0x549   :  { %v1356_v58 = vadd.f32 %v1355_v57, %v5785_v43 }
 0x54a   :  { %v1377_v59 = vsel %vm41_vm0, %v1361_v56, -inf }
 0x54b   :  { %v4666_v60 = vpop.f32.mrb[18].mxu1  ;;  %1378 = vmax.xlane.f32.xlu0 %v1377_v59  ;;  %v1374_v61 = vsel %vm41_vm0, %v1356_v58, -inf }
 0x54c   :  { %v1371_v62 = vadd.f32 %v4666_v60, %v5799_v52  ;;  %v1365_v63 = vpop.f32.mrb[19].mxu1  ;;  %1375 = vmax.xlane.f32.xlu1 %v1374_v61 }
 0x54d   :  { %v1366_v0 = vadd.f32 %v1365_v63, %v5793_v49 }
 0x54e   :  { %v1383_v1 = vsel %vm41_vm0, %v1371_v62, -inf }
 0x54f   :  { %1384 = vmax.xlane.f32.xlu0 %v1383_v1  ;;  %v1380_v42 = vsel %vm41_vm0, %v1366_v0, -inf }
 0x550   :  { %1381 = vmax.xlane.f32.xlu1 %v1380_v42  ;;  %v1527_v42 = vld [vmem:[%s6579_s2 + $0x50] sm:$0xff] }
 0x593   :  { %v1031_v43 = vpop.xlane.xlu0 %1030 }
 0x594   :  { %v1028_v2 = vpop.xlane.xlu1 %1027 }
 0x595   :  { %5475 = vrcp.f32 %v1028_v2 }
 0x596   :  { %5477 = vrcp.f32 %v1031_v43 }
 0x598   :  { %v1034_v3 = vpop.xlane.xlu1 %1033 }
 0x599   :  { %5479 = vrcp.f32 %v1034_v3 }
 0x59c   :  { %v5337_v4 = vpop.permute.xlu1 %5336  ;;  %v1037_v5 = vpop.xlane.xlu0 %1036 }
 0x59d   :  { %v5339_v6 = vunpack.i.h.bf16 %v5337_v4  ;;  %v5338_v52 = vunpack.i.l.bf16 %v5337_v4  ;;  %5481 = vrcp.f32 %v1037_v5 }
 0x59f   :  { %v5476_v8 = vpop.eup %5475  ;;  %v5025_v10 = vpack.c.bf16 %v5339_v6, %v5338_v52 }
 0x5a0   :  { %v5342_v49 = vpop.permute.xlu0 %5341  ;;  %v1042_v11 = vmul.f32 %v5476_v8, %v5470_v14  ;;  %v5478_v21 = vpop.eup %5477 }
 0x5a1   :  { %v5344_v13 = vunpack.i.h.bf16 %v5342_v49  ;;  %v5343_v15 = vunpack.i.l.bf16 %v5342_v49  ;;  %5026 = vmatprep.subr.bf16.mxu0 %v5025_v10  ;;  %v1043_v23 = vmul.f32 %v5478_v21, %v5943_v12  ;;  %v4103_v49 = vld [vmem:[%s6581_s4 + $0x1] ss:$0 sm:$0xff] }
 0x5a2   :  { %5028 = vmatpush3.bf16.msra.mxu0 %v5025_v10  ;;  %4639 = vmatprep.mubr.msk.f32.mxu0 %vm41_vm0, %v1042_v11 }
 0x5a3   :  { %v5029_v18 = vpack.c.bf16 %v5344_v13, %v5343_v15  ;;  %v5480_v22 = vpop.eup %5479 }
 0x5a4   :  { %v1044_v26 = vmul.f32 %v5480_v22, %v5472_v46 }
 0x5a5   :  { %5030 = vmatprep.subr.bf16.mxu0 %v5029_v18 }
 0x5a6   :  { %5032 = vmatpush3.bf16.msra.mxu0 %v5029_v18 }
 0x5a7   :  { %v5482_v25 = vpop.eup %5481  ;;  %4645 = vmatprep.subr.mxu0 %v1155_v47 }
 0x5a8   :  { %v1045_v30 = vmul.f32 %v5482_v25, %v5474_v19 }
 0x5a9   :  { %4640 = vmatmul.mubr.msk.f32.vlgmr.msra.gmra.mrb[12].mxu0 %vm41_vm0, %v1043_v23  ;;  %v5595_v23 = vld [vmem:[%s6577_s0] sm:$0xff] }
 0x5aa   :  { %4642 = vmatprep.mubr.msk.f32.mxu0 %vm41_vm0, %v1044_v26  ;;  %4646 = vmatpush3.msra.mxu0 %v1155_v47 }
 0x5ad   :  { %4643 = vmatmul.mubr.msk.f32.gmra.mrb[14].mxu0 %vm41_vm0, %v1045_v30 }
 0x5d8   :  { %v1379_v32 = vpop.xlane.xlu0 %1378 }
 0x5d9   :  { %v1387_v27 = vsub.f32 %v1361_v56, %v1379_v32  ;;  %v1376_v33 = vpop.xlane.xlu1 %1375 }
 0x5da   :  { %v1386_v34 = vsub.f32 %v1356_v58, %v1376_v33 }
 0x5db   :  { %v1392_v28 = vmul.f32 1.442695, %v1387_v27 }
 0x5dc   :  { %v1390_v29 = vmul.f32 1.442695, %v1386_v34  ;;  %v1385_v31 = vpop.xlane.xlu0 %1384 }
 0x5dd   :  { %5483 = vpow2.f32 %v1392_v28  ;;  %v1389_v35 = vsub.f32 %v1371_v62, %v1385_v31  ;;  %v1382_v36 = vpop.xlane.xlu1 %1381 }
 0x5de   :  { %5485 = vpow2.f32 %v1390_v29  ;;  %v1388_v37 = vsub.f32 %v1366_v0, %v1382_v36 }
 0x5df   :  { %v1396_v38 = vmul.f32 1.442695, %v1389_v35 }
 0x5e0   :  { %v1394_v39 = vmul.f32 1.442695, %v1388_v37 }
 0x5e1   :  { %5487 = vpow2.f32 %v1396_v38 }
 0x5e2   :  { %5489 = vpow2.f32 %v1394_v39 }
 0x5e7   :  { %v5484_v40 = vpop.eup %5483 }
 0x5e8   :  { %v5486_v41 = vpop.eup %5485  ;;  %v1401_v44 = vsel %vm41_vm0, %v5484_v40, 0.0 }
 0x5e9   :  { %1402 = vadd.xlane.f32.xlu0 %v1401_v44  ;;  %v1398_v12 = vsel %vm41_vm0, %v5486_v41, 0.0 }
 0x5ea   :  { %1399 = vadd.xlane.f32.xlu1 %v1398_v12 }
 0x5eb   :  { %v5488_v14 = vpop.eup %5487 }
 0x5ec   :  { %v5490_v45 = vpop.eup %5489  ;;  %v1407_v17 = vsel %vm41_vm0, %v5488_v14, 0.0 }
 0x5ed   :  { %1408 = vadd.xlane.f32.xlu0 %v1407_v17  ;;  %v1404_v46 = vsel %vm41_vm0, %v5490_v45, 0.0 }
 0x5ee   :  { %1405 = vadd.xlane.f32.xlu1 %v1404_v46 }
 0x5ff   :  { %5346 = vrot.lane.b32.xlu1 %v5719_v16, %s5635_s18 }
 0x603   :  { %5351 = vrot.lane.b32.xlu0 %v5731_v20, %s5635_s18 }
 0x676   :  { %v1403_v19 = vpop.xlane.xlu0 %1402 }
 0x677   :  { %v1400_v48 = vpop.xlane.xlu1 %1399 }
 0x678   :  { %5491 = vrcp.f32 %v1400_v48 }
 0x679   :  { %5493 = vrcp.f32 %v1403_v19 }
 0x67a   :  { %v1409_v50 = vpop.xlane.xlu0 %1408 }
 0x67b   :  { %v1406_v51 = vpop.xlane.xlu1 %1405 }
 0x67c   :  { %v4641_v53 = vpop.f32.mrb[12].mxu0  ;;  %5495 = vrcp.f32 %v1406_v51 }
 0x67d   :  { %v1136_v54 = vpop.f32.mrb[13].mxu0  ;;  %5497 = vrcp.f32 %v1409_v50 }
 0x67e   :  { %v5352_v55 = vpop.permute.xlu0 %5351  ;;  %4647 = vmatprep.mubr.msk.f32.mxu0 %vm152_vm1, %v1136_v54  ;;  %v1704_v54 = vld [vmem:[%s6579_s2 + $0x10] sm:$0xff] }
 0x67f   :  { %v5347_v56 = vpop.permute.xlu1 %5346  ;;  %4648 = vmatmul.mubr.msk.f32.vlgmr.msra.gmra.mrb[4].mxu0 %vm152_vm1, %v4641_v53  ;;  %v5354_v16 = vunpack.i.h.bf16 %v5352_v55  ;;  %v5353_v57 = vunpack.i.l.bf16 %v5352_v55  ;;  %v1705_v55 = vld [vmem:[%s6579_s2 + $0x28] sm:$0xff] }
 0x680   :  { %v5349_v58 = vunpack.i.h.bf16 %v5347_v56  ;;  %v5348_v59 = vunpack.i.l.bf16 %v5347_v56  ;;  %v4644_v20 = vpop.f32.mrb[14].mxu0  ;;  %v5053_v56 = vpack.c.bf16 %v1705_v55, %v1704_v54 }
 0x681   :  { %v1146_v60 = vpop.f32.mrb[15].mxu0  ;;  %v5049_v0 = vpack.c.bf16 %v5354_v16, %v5353_v57  ;;  %v1706_v16 = vld [vmem:[%s6579_s2 + $0x40] sm:$0xff]  ;;  %v1707_v57 = vld [vmem:[%s6579_s2 + $0x58] sm:$0xff] }
 0x682   :  { %v5492_v61 = vpop.eup %5491  ;;  %v5045_v62 = vpack.c.bf16 %v5349_v58, %v5348_v59  ;;  %4650 = vmatprep.mubr.msk.f32.mxu0 %vm152_vm1, %v1146_v60  ;;  %5054 = vmatprep.subr.bf16.mxu1 %v5053_v56  ;;  %v5057_v58 = vpack.c.bf16 %v1707_v57, %v1706_v16  ;;  %v1814_v59 = vld [vmem:[%s6580_s3] sm:$0xff]  ;;  %v1816_v60 = vld [vmem:[%s6580_s3 + $0x10] sm:$0xff] }
 0x683   :  { %4651 = vmatmul.mubr.msk.f32.gmra.mrb[6].mxu0 %vm152_vm1, %v4644_v20  ;;  %v1414_v63 = vmul.f32 %v5492_v61, %v5486_v41  ;;  %v5494_v1 = vpop.eup %5493  ;;  %5056 = vmatpush3.bf16.msra.mxu1 %v5053_v56  ;;  %v1815_v20 = vld [vmem:[%s6580_s3 + $0x8] sm:$0xff] }
 0x684   :  { %5046 = vmatprep.subr.bf16.mxu0 %v5045_v62  ;;  %v1415_v43 = vmul.f32 %v5494_v1, %v5484_v40  ;;  %5058 = vmatprep.subr.bf16.mxu1 %v5057_v58  ;;  %v5061_v61 = vpack.c.bf16 %v1815_v20, %v1814_v59  ;;  %v1819_v1 = vld [vmem:[%s6580_s3 + $0x28] sm:$0xff] }
 0x685   :  { %5048 = vmatpush3.bf16.msra.mxu0 %v5045_v62  ;;  %4675 = vmatprep.mubr.msk.f32.mxu0 %vm41_vm0, %v1414_v63  ;;  %v1817_v62 = vld [vmem:[%s6580_s3 + $0x18] sm:$0xff] }
 0x686   :  { %5050 = vmatprep.subr.bf16.mxu0 %v5049_v0  ;;  %v5496_v2 = vpop.eup %5495  ;;  %v5065_v63 = vpack.c.bf16 %v1817_v62, %v1816_v60  ;;  %v4159_v62 = vld [vmem:[%s6581_s4 + $0x5] ss:$0 sm:$0xff] }
 0x687   :  { %v5498_v3 = vpop.eup %5497  ;;  %v1416_v4 = vmul.f32 %v5496_v2, %v5490_v45  ;;  %5060 = vmatpush3.bf16.msra.mxu1 %v5057_v58  ;;  %v1820_v2 = vld [vmem:[%s6580_s3 + $0x30] sm:$0xff] }
 0x688   :  { %v1417_v5 = vmul.f32 %v5498_v3, %v5488_v14 }
 0x689   :  { %5052 = vmatpush3.bf16.msra.mxu0 %v5049_v0  ;;  %v1818_v0 = vld [vmem:[%s6580_s3 + $0x20] sm:$0xff] }
 0x68a   :  { %4681 = vmatprep.subr.mxu0 %v1527_v42 }
 0x68c   :  { %4676 = vmatmul.mubr.msk.f32.vlgmr.msra.gmra.mrb[16].mxu0 %vm41_vm0, %v1415_v43  ;;  %v1821_v43 = vld [vmem:[%s6580_s3 + $0x38] sm:$0xff] }
 0x68d   :  { %4678 = vmatprep.mubr.msk.f32.mxu0 %vm41_vm0, %v1416_v4  ;;  %4682 = vmatpush3.msra.mxu0 %v1527_v42  ;;  %v5069_v42 = vpack.c.bf16 %v1819_v1, %v1818_v0  ;;  %v5073_v3 = vpack.c.bf16 %v1821_v43, %v1820_v2  ;;  %v1822_v4 = vld [vmem:[%s6580_s3 + $0x40] sm:$0xff] }
 0x68e   :  { %5062 = vmatprep.subr.bf16.mxu0 %v5061_v61 }
 0x690   :  { %4679 = vmatmul.mubr.msk.f32.gmra.mrb[18].mxu0 %vm41_vm0, %v1417_v5  ;;  %v1823_v5 = vld [vmem:[%s6580_s3 + $0x48] sm:$0xff] }
 0x75f   :  { %v4677_v6 = vpop.f32.mrb[16].mxu0 }
 0x760   :  { %v1508_v52 = vpop.f32.mrb[17].mxu0 }
 0x761   :  { %4683 = vmatprep.mubr.msk.f32.mxu0 %vm152_vm1, %v1508_v52  ;;  %v1824_v52 = vld [vmem:[%s6580_s3 + $0x50] sm:$0xff] }
 0x762   :  { %4684 = vmatmul.mubr.msk.f32.vlgmr.msra.gmra.mrb[4].mxu0 %vm152_vm1, %v4677_v6  ;;  %v5077_v6 = vpack.c.bf16 %v1823_v5, %v1822_v4 }
 0x763   :  { %v4680_v8 = vpop.f32.mrb[18].mxu0  ;;  %5064 = vmatpush3.bf16.msra.mxu0 %v5061_v61 }
 0x764   :  { %v1518_v10 = vpop.f32.mrb[19].mxu0  ;;  %5066 = vmatprep.subr.bf16.mxu0 %v5065_v63 }
 0x765   :  { %4686 = vmatprep.mubr.msk.f32.mxu0 %vm152_vm1, %v1518_v10 }
 0x766   :  { %4687 = vmatmul.mubr.msk.f32.gmra.mrb[6].mxu0 %vm152_vm1, %v4680_v8  ;;  %v1825_v8 = vld [vmem:[%s6580_s3 + $0x58] sm:$0xff] }
 0x767   :  { %5068 = vmatpush3.bf16.msra.mxu0 %v5065_v63  ;;  %v5081_v10 = vpack.c.bf16 %v1825_v8, %v1824_v52 }
 0x768   :  { %5070 = vmatprep.subr.bf16.mxu0 %v5069_v42 }
 0x76b   :  { %5072 = vmatpush3.bf16.msra.mxu0 %v5069_v42 }
 0x76c   :  { %5074 = vmatprep.subr.bf16.mxu0 %v5073_v3 }
 0x76f   :  { %5076 = vmatpush3.bf16.msra.mxu0 %v5073_v3 }
 0x770   :  { %5078 = vmatprep.subr.bf16.mxu0 %v5077_v6 }
 0x773   :  { %5080 = vmatpush3.bf16.msra.mxu0 %v5077_v6 }
 0x774   :  { %5082 = vmatprep.subr.bf16.mxu0 %v5081_v10 }
 0x777   :  { %5084 = vmatpush3.bf16.msra.mxu0 %v5081_v10 }
 0x835   :  { %v4685_v11 = vpop.f32.mrb[4].mxu0 }
 0x836   :  { %v5229_v13 = vadd.f32 %v4685_v11, %v4103_v49  ;;  %v1606_v15 = vpop.f32.mrb[5].mxu0  ;;  %v1827_v11 = vld [vmem:[%s6580_s3 + $0x68] sm:$0xff] }
 0x837   :  { %v5230_v18 = vadd.f32 %v4103_v49, %v1606_v15 }
 0x838   :  { %v1630_v21 = vadd.f32 %v5229_v13, %v5693_v7  ;;  %v5596_v7 = vld [vmem:[%s6577_s0 + $0x10] sm:$0xff] }
 0x839   :  { %v4688_v22 = vpop.f32.mrb[6].mxu0  ;;  %v1629_v25 = vadd.f32 %v5595_v23, %v5230_v18 }
 0x83a   :  { %v5231_v26 = vadd.f32 %v4688_v22, %v4103_v49  ;;  %v1616_v30 = vpop.f32.mrb[7].mxu0  ;;  %v1638_v32 = vsel %vm41_vm0, %v1630_v21, 0.0 }
 0x83b   :  { %v5232_v27 = vadd.f32 %v4103_v49, %v1616_v30  ;;  %1639 = vadd.xlane.f32.xlu0 %v1638_v32  ;;  %v1635_v33 = vsel %vm41_vm0, %v1629_v25, 0.0  ;;  %v1826_v49 = vld [vmem:[%s6580_s3 + $0x60] sm:$0xff] }
 0x83c   :  { %1636 = vadd.xlane.f32.xlu1 %v1635_v33  ;;  %v1632_v34 = vadd.f32 %v5231_v26, %v5704_v9  ;;  %v5085_v13 = vpack.c.bf16 %v1827_v11, %v1826_v49 }
 0x83d   :  { %v1631_v28 = vadd.f32 %v5596_v7, %v5232_v27 }
 0x83e   :  { %v1644_v29 = vsel %vm41_vm0, %v1632_v34, 0.0  ;;  %5086 = vmatprep.subr.bf16.mxu0 %v5085_v13 }
 0x83f   :  { %1645 = vadd.xlane.f32.xlu0 %v1644_v29  ;;  %v1641_v31 = vsel %vm41_vm0, %v1631_v28, 0.0  ;;  %5088 = vmatpush3.bf16.msra.mxu0 %v5085_v13 }
 0x840   :  { %1642 = vadd.xlane.f32.xlu1 %v1641_v31 }
 0x8c8   :  { %v1640_v35 = vpop.xlane.xlu0 %1639 }
 0x8c9   :  { %v1649_v36 = vmul.f32 0.03125, %v1640_v35  ;;  %v1637_v37 = vpop.xlane.xlu1 %1636 }
 0x8ca   :  { %v1648_v38 = vmul.f32 0.03125, %v1637_v37 }
 0x8cb   :  { %v6012_v39 = vsub.f32 %v1630_v21, %v1649_v36  ;;  %v4153_v36 = vld [vmem:[%s6581_s4 + $0x3] ss:$0 sm:$0xff] }
 0x8cc   :  { %v6014_v40 = vsub.f32 %v1629_v25, %v1648_v38  ;;  %v1646_v9 = vpop.xlane.xlu0 %1645 }
 0x8cd   :  { %v1651_v41 = vmul.f32 0.03125, %v1646_v9  ;;  %v1643_v44 = vpop.xlane.xlu1 %1642  ;;  %v1657_v12 = vmul.f32 %v6012_v39, %v6012_v39 }
 0x8ce   :  { %v1650_v14 = vmul.f32 0.03125, %v1643_v44  ;;  %v1656_v45 = vmul.f32 %v6014_v40, %v6014_v40 }
 0x8cf   :  { %v6020_v17 = vsub.f32 %v1632_v34, %v1651_v41  ;;  %v1663_v46 = vsel %vm41_vm0, %v1657_v12, 0.0 }
 0x8d0   :  { %v6023_v47 = vsub.f32 %v1631_v28, %v1650_v14  ;;  %1664 = vadd.xlane.f32.xlu0 %v1663_v46  ;;  %v1660_v19 = vsel %vm41_vm0, %v1656_v45, 0.0  ;;  %v4152_v28 = vld [vmem:[%s6581_s4 + $0x2] ss:$0 sm:$0xff] }
 0x8d1   :  { %1661 = vadd.xlane.f32.xlu1 %v1660_v19  ;;  %v1659_v48 = vmul.f32 %v6020_v17, %v6020_v17 }
 0x8d2   :  { %v1658_v50 = vmul.f32 %v6023_v47, %v6023_v47 }
 0x8d3   :  { %v1669_v51 = vsel %vm41_vm0, %v1659_v48, 0.0 }
 0x8d4   :  { %1670 = vadd.xlane.f32.xlu0 %v1669_v51  ;;  %v1666_v53 = vsel %vm41_vm0, %v1658_v50, 0.0  ;;  %v4154_v50 = vld [vmem:[%s6581_s4 + $0x4] ss:$0 sm:$0xff] }
 0x8d5   :  { %1667 = vadd.xlane.f32.xlu1 %v1666_v53 }
 0x95d   :  { %v1665_v15 = vpop.xlane.xlu0 %1664 }
 0x95e   :  { %v1673_v18 = vmul.f32 0.03125, %v1665_v15  ;;  %v1662_v21 = vpop.xlane.xlu1 %1661 }
 0x95f   :  { %v1672_v22 = vmul.f32 0.03125, %v1662_v21 }
 0x960   :  { %v1677_v23 = vadd.f32 1e-05, %v1673_v18 }
 0x961   :  { %v1676_v25 = vadd.f32 1e-05, %v1672_v22  ;;  %v1671_v26 = vpop.xlane.xlu0 %1670 }
 0x962   :  { %5499 = vrsqrt.f32 %v1677_v23  ;;  %v1675_v30 = vmul.f32 0.03125, %v1671_v26  ;;  %v1668_v32 = vpop.xlane.xlu1 %1667 }
 0x963   :  { %5501 = vrsqrt.f32 %v1676_v25  ;;  %v1674_v27 = vmul.f32 0.03125, %v1668_v32 }
 0x964   :  { %v1679_v33 = vadd.f32 1e-05, %v1675_v30 }
 0x965   :  { %v1678_v34 = vadd.f32 1e-05, %v1674_v27 }
 0x966   :  { %5503 = vrsqrt.f32 %v1679_v33 }
 0x967   :  { %5505 = vrsqrt.f32 %v1678_v34 }
 0x96c   :  { %v5500_v7 = vpop.eup %5499 }
 0x96d   :  { %v5502_v29 = vpop.eup %5501  ;;  %v1685_v31 = vmul.f32 %v5500_v7, %v6012_v39 }
 0x96e   :  { %v1684_v35 = vmul.f32 %v5502_v29, %v6014_v40 }
 0x96f   :  { %v1693_v37 = vmul.f32 %v4152_v28, %v1685_v31 }
 0x970   :  { %v5504_v38 = vpop.eup %5503  ;;  %v1692_v9 = vmul.f32 %v4152_v28, %v1684_v35 }
 0x971   :  { %v5506_v41 = vpop.eup %5505  ;;  %v1687_v44 = vmul.f32 %v5504_v38, %v6020_v17  ;;  %v1701_v45 = vadd.f32 %v4153_v36, %v1693_v37  ;;  %v1828_v17 = vld [vmem:[%s6580_s3 + $0x70] sm:$0xff] }
 0x972   :  { %v1700_v12 = vadd.f32 %v4153_v36, %v1692_v9  ;;  %v1686_v14 = vmul.f32 %v5506_v41, %v6023_v47  ;;  %v1829_v47 = vld [vmem:[%s6580_s3 + $0x78] sm:$0xff]  ;;  %v4162_v9 = vld [vmem:[%s6579_s2 + $0x60] sm:$0xff] }
 0x973   :  { %v1695_v46 = vmul.f32 %v4152_v28, %v1687_v44  ;;  %v5089_v48 = vpack.c.bf16 %v1829_v47, %v1828_v17  ;;  %v4163_v41 = vld [vmem:[%s6579_s2 + $0x78] sm:$0xff] }
 0x974   :  { %4697 = vmatprep.mubr.msk.f32.mxu1 %vm41_vm0, %v1700_v12  ;;  %v1694_v39 = vmul.f32 %v4152_v28, %v1686_v14  ;;  %v5093_v44 = vpack.c.bf16 %v4163_v41, %v4162_v9  ;;  %v4165_v14 = vld [vmem:[%s6579_s2 + $0xa8] sm:$0xff]  ;;  %v6210_v41 = vld [vmem:[%s6578_s1 + $0x18] sm:$0xff] }
 0x975   :  { %4698 = vmatmul.mubr.msk.f32.vlgmr.msra.gmra.mrb[20].mxu1 %vm41_vm0, %v1701_v45  ;;  %v1703_v19 = vadd.f32 %v4153_v36, %v1695_v46  ;;  %5090 = vmatprep.subr.bf16.mxu0 %v5089_v48 }
 0x976   :  { %v1702_v40 = vadd.f32 %v4153_v36, %v1694_v39  ;;  %5092 = vmatpush3.bf16.msra.mxu0 %v5089_v48  ;;  %5094 = vmatprep.subr.bf16.mxu1 %v5093_v44 }
 0x977   :  { %5096 = vmatpush3.bf16.msra.mxu1 %v5093_v44 }
 0x978   :  { %4700 = vmatprep.mubr.msk.f32.mxu1 %vm41_vm0, %v1702_v40 }
 0x979   :  { %4701 = vmatmul.mubr.msk.f32.gmra.mrb[22].mxu1 %vm41_vm0, %v1703_v19 }
 0xa48   :  { %v4699_v51 = vpop.f32.mrb[20].mxu1 }
 0xa49   :  { %v1797_v53 = vadd.f32 %v4699_v51, %v4154_v50  ;;  %v1791_v54 = vpop.f32.mrb[21].mxu1 }
 0xa4a   :  { %v1792_v55 = vadd.f32 %v4154_v50, %v1791_v54 }
 0xa4b   :  { %v1811_v57 = vmax.f32 %v1797_v53, 0.0 }
 0xa4c   :  { %v1810_v56 = vmax.f32 %v1792_v55, 0.0  ;;  %v4702_v16 = vpop.f32.mrb[22].mxu1 }
 0xa4d   :  { %v1807_v58 = vadd.f32 %v4702_v16, %v4154_v50  ;;  %v1801_v59 = vpop.f32.mrb[23].mxu1  ;;  %v4160_v16 = vld [vmem:[%s6581_s4 + $0x6] ss:$0 sm:$0xff] }
 0xa4e   :  { %v1802_v20 = vadd.f32 %v4154_v50, %v1801_v59  ;;  %4735 = vmatprep.mubr.f32.mxu0 %v1810_v56 }
 0xa4f   :  { %4736 = vmatmul.mubr.f32.vlgmr.msra.gmra.mrb[20].mxu0 %v1811_v57  ;;  %v1813_v61 = vmax.f32 %v1807_v58, 0.0 }
 0xa50   :  { %v1812_v60 = vmax.f32 %v1802_v20, 0.0  ;;  %v4161_v20 = vld [vmem:[%s6581_s4 + $0x7] ss:$0 sm:$0xff] }
 0xa52   :  { %4738 = vmatprep.mubr.f32.mxu0 %v1812_v60 }
 0xa53   :  { %4739 = vmatmul.mubr.f32.gmra.mrb[22].mxu0 %v1813_v61 }
 0xb22   :  { %v4737_v63 = vpop.f32.mrb[20].mxu0 }
 0xb23   :  { %v1907_v0 = vadd.f32 %v4737_v63, %v4159_v62  ;;  %v1901_v1 = vpop.f32.mrb[21].mxu0 }
 0xb24   :  { %v1902_v42 = vadd.f32 %v4159_v62, %v1901_v1 }
 0xb25   :  { %v1921_v2 = vadd.f32 %v1907_v0, %v1701_v45 }
 0xb26   :  { %v4740_v43 = vpop.f32.mrb[22].mxu0  ;;  %v1920_v3 = vadd.f32 %v1902_v42, %v1700_v12  ;;  %v4164_v12 = vld [vmem:[%s6579_s2 + $0x90] sm:$0xff] }
 0xb27   :  { %v1917_v4 = vadd.f32 %v4740_v43, %v4159_v62  ;;  %v1911_v5 = vpop.f32.mrb[23].mxu0  ;;  %v1929_v6 = vsel %vm41_vm0, %v1921_v2, 0.0  ;;  %v5097_v45 = vpack.c.bf16 %v4165_v14, %v4164_v12 }
 0xb28   :  { %v1912_v52 = vadd.f32 %v4159_v62, %v1911_v5  ;;  %1930 = vadd.xlane.f32.xlu0 %v1929_v6  ;;  %v1926_v8 = vsel %vm41_vm0, %v1920_v3, 0.0  ;;  %v4167_v6 = vld [vmem:[%s6581_s4 + $0x8] ss:$0 sm:$0xff] }
 0xb29   :  { %1927 = vadd.xlane.f32.xlu1 %v1926_v8  ;;  %v1923_v10 = vadd.f32 %v1917_v4, %v1703_v19  ;;  %5098 = vmatprep.subr.bf16.mxu1 %v5097_v45 }
 0xb2a   :  { %v1922_v49 = vadd.f32 %v1912_v52, %v1702_v40  ;;  %5100 = vmatpush3.bf16.msra.mxu1 %v5097_v45  ;;  %v6219_v45 = vld [vmem:[%s6578_s1 + $0x10] sm:$0xff] }
 0xb2b   :  { %v1935_v11 = vsel %vm41_vm0, %v1923_v10, 0.0 }
 0xb2c   :  { %1936 = vadd.xlane.f32.xlu0 %v1935_v11  ;;  %v1932_v13 = vsel %vm41_vm0, %v1922_v49, 0.0 }
 0xb2d   :  { %1933 = vadd.xlane.f32.xlu1 %v1932_v13 }
 0xbb5   :  { %v1931_v15 = vpop.xlane.xlu0 %1930 }
 0xbb6   :  { %v1939_v18 = vmul.f32 0.03125, %v1931_v15  ;;  %v1928_v21 = vpop.xlane.xlu1 %1927 }
 0xbb7   :  { %v1938_v22 = vmul.f32 0.03125, %v1928_v21 }
 0xbb8   :  { %v1943_v23 = vsub.f32 %v1921_v2, %v1939_v18 }
 0xbb9   :  { %v1942_v25 = vsub.f32 %v1920_v3, %v1938_v22  ;;  %v1937_v26 = vpop.xlane.xlu0 %1936 }
 0xbba   :  { %v1941_v30 = vmul.f32 0.03125, %v1937_v26  ;;  %v1934_v32 = vpop.xlane.xlu1 %1933  ;;  %v1947_v27 = vmul.f32 %v1943_v23, %v1943_v23 }
 0xbbb   :  { %v1940_v33 = vmul.f32 0.03125, %v1934_v32  ;;  %v1946_v34 = vmul.f32 %v1942_v25, %v1942_v25 }
 0xbbc   :  { %v1945_v7 = vsub.f32 %v1923_v10, %v1941_v30  ;;  %v1953_v28 = vsel %vm41_vm0, %v1947_v27, 0.0 }
 0xbbd   :  { %v1944_v29 = vsub.f32 %v1922_v49, %v1940_v33  ;;  %1954 = vadd.xlane.f32.xlu0 %v1953_v28  ;;  %v1950_v31 = vsel %vm41_vm0, %v1946_v34, 0.0  ;;  %v6196_v28 = vld [vmem:[%s6578_s1 + $0x8] sm:$0xff] }
 0xbbe   :  { %1951 = vadd.xlane.f32.xlu1 %v1950_v31  ;;  %v1949_v35 = vmul.f32 %v1945_v7, %v1945_v7 }
 0xbbf   :  { %v1948_v36 = vmul.f32 %v1944_v29, %v1944_v29 }
 0xbc0   :  { %v1959_v37 = vsel %vm41_vm0, %v1949_v35, 0.0  ;;  %v6202_v35 = vld [vmem:[%s6578_s1] sm:$0xff] }
 0xbc1   :  { %1960 = vadd.xlane.f32.xlu0 %v1959_v37  ;;  %v1956_v38 = vsel %vm41_vm0, %v1948_v36, 0.0 }
 0xbc2   :  { %1957 = vadd.xlane.f32.xlu1 %v1956_v38 }
 0xc4a   :  { %v1955_v46 = vpop.xlane.xlu0 %1954 }
 0xc4b   :  { %v1963_v39 = vmul.f32 0.03125, %v1955_v46  ;;  %v1952_v40 = vpop.xlane.xlu1 %1951 }
 0xc4c   :  { %v1962_v19 = vmul.f32 0.03125, %v1952_v40 }
 0xc4d   :  { %v1967_v17 = vadd.f32 1e-05, %v1963_v39 }
 0xc4e   :  { %v1966_v47 = vadd.f32 1e-05, %v1962_v19  ;;  %v1961_v48 = vpop.xlane.xlu0 %1960 }
 0xc4f   :  { %5507 = vrsqrt.f32 %v1967_v17  ;;  %v1965_v50 = vmul.f32 0.03125, %v1961_v48  ;;  %v1958_v51 = vpop.xlane.xlu1 %1957 }
 0xc50   :  { %5509 = vrsqrt.f32 %v1966_v47  ;;  %v1964_v53 = vmul.f32 0.03125, %v1958_v51 }
 0xc51   :  { %v1969_v54 = vadd.f32 1e-05, %v1965_v50 }
 0xc52   :  { %v1968_v55 = vadd.f32 1e-05, %v1964_v53 }
 0xc53   :  { %5511 = vrsqrt.f32 %v1969_v54 }
 0xc54   :  { %5513 = vrsqrt.f32 %v1968_v55 }
 0xc59   :  { %v5508_v56 = vpop.eup %5507 }
 0xc5a   :  { %v5510_v57 = vpop.eup %5509  ;;  %v1975_v58 = vmul.f32 %v5508_v56, %v1943_v23 }
 0xc5b   :  { %v1974_v59 = vmul.f32 %v5510_v57, %v1942_v25 }
 0xc5c   :  { %v1983_v60 = vmul.f32 %v4160_v16, %v1975_v58 }
 0xc5d   :  { %v5512_v61 = vpop.eup %5511  ;;  %v1982_v62 = vmul.f32 %v4160_v16, %v1974_v59 }
 0xc5e   :  { %v5514_v63 = vpop.eup %5513  ;;  %v1977_v0 = vmul.f32 %v5512_v61, %v1945_v7  ;;  %v6140_v2 = vadd.f32 %v4161_v20, %v1983_v60 }
 0xc5f   :  { %v6138_v1 = vadd.f32 %v4161_v20, %v1982_v62  ;;  %v1976_v42 = vmul.f32 %v5514_v63, %v1944_v29 }
 0xc60   :  { %v1985_v43 = vmul.f32 %v4160_v16, %v1977_v0 }
 0xc61   :  { %4749 = vmatprep.mubr.msk.f32.mxu1 %vm41_vm0, %v6138_v1  ;;  %v1984_v3 = vmul.f32 %v4160_v16, %v1976_v42 }
 0xc62   :  { %4750 = vmatmul.mubr.msk.f32.vlgmr.msra.gmra.mrb[24].mxu1 %vm41_vm0, %v6140_v2  ;;  %v6148_v5 = vadd.f32 %v4161_v20, %v1985_v43 }
 0xc63   :  { %v6146_v4 = vadd.f32 %v4161_v20, %v1984_v3 }
 0xc65   :  { %4752 = vmatprep.mubr.msk.f32.mxu1 %vm41_vm0, %v6146_v4 }
 0xc66   :  { %4753 = vmatmul.mubr.msk.f32.gmra.mrb[26].mxu1 %vm41_vm0, %v6148_v5 }
 0xd35   :  { %v4751_v52 = vpop.f32.mrb[24].mxu1 }
 0xd36   :  { %v6157_v8 = vadd.f32 %v4751_v52, %v4167_v6  ;;  %v2083_v10 = vpop.f32.mrb[25].mxu1 }
 0xd37   :  { %v6159_v49 = vadd.f32 %v4167_v6, %v2083_v10 }
 0xd39   :  { %v4754_v11 = vpop.f32.mrb[26].mxu1  ;;  %4763 = vmatprep.mubr.msk.f32.mxu1 %vm152_vm1, %v6159_v49  ;;  %v6165_v13 = vpack.i.bf16 %v6157_v8, %v6159_v49 }
 0xd3a   :  { %v6167_v15 = vadd.f32 %v4754_v11, %v4167_v6  ;;  %v2093_v18 = vpop.f32.mrb[27].mxu1 }
 0xd3b   :  { %v6169_v21 = vadd.f32 %v4167_v6, %v2093_v18  ;;  %5356 = vrot.lane.b32.xlu1 %v6165_v13, %s5626_s16 }
 0xd3d   :  { %v6175_v22 = vpack.i.bf16 %v6167_v15, %v6169_v21 }
 0xd3f   :  { %5361 = vrot.lane.b32.xlu0 %v6175_v22, %s5626_s16  ;;  %s5601_s16 = scalar_lea.vmem %s4072_s14, 512 }
 0xd40   :  { %p5602_p0 = scmp.ne.s32.totalorder %s4072_s14, %s5601_s16  ;;  %p5607_p2 = scmp.lt.s32.totalorder %s5601_s16, %s5601_s16 }
 0xd42   :  { %p5608_p3 = por %p5607_p2, %p5606_p1 }
 0xd44   :  { %p5609_p4 = pnand %p5608_p3, %p5602_p0 }
 0xdad   :  { %v5357_v23 = vpop.permute.xlu1 %5356 }
 0xdae   :  { %v5359_v25 = vunpack.i.h.bf16 %v5357_v23  ;;  %v5358_v26 = vunpack.i.l.bf16 %v5357_v23 }
 0xdb0   :  { %v5101_v30 = vpack.c.bf16 %v5359_v25, %v5358_v26 }
 0xdb1   :  { %v5362_v32 = vpop.permute.xlu0 %5361 }
 0xdb2   :  { %v5364_v27 = vunpack.i.h.bf16 %v5362_v32  ;;  %v5363_v33 = vunpack.i.l.bf16 %v5362_v32  ;;  %5103 = vmatprep.subr.msk.bf16.mxu1 %vm5747_vm2, %v5101_v30 }
 0xdb3   :  { %5106 = vmatpush3.bf16.xpose.msk.msra.mxu1 %vm5747_vm2, %v5101_v30 }
 0xdb4   :  { %v5107_v34 = vpack.c.bf16 %v5364_v27, %v5363_v33 }
 0xdb6   :  { %5109 = vmatprep.subr.msk.bf16.mxu1 %vm5747_vm2, %v5107_v34 }
 0xdbb   :  { %5112 = vmatpush3.bf16.xpose.msk.msra.mxu1 %vm5747_vm2, %v5107_v34 }
 0xdc2   :  { %4764 = vmatmul.mubr.msk.f32.vlgmr.msra.gmra.mrb[28].mxu1 %vm152_vm1, %v6157_v8 }
 0xdc3   :  { %4766 = vmatprep.mubr.msk.f32.mxu1 %vm152_vm1, %v6169_v21 }
 0xdc6   :  { %4767 = vmatmul.mubr.msk.f32.gmra.mrb[30].mxu1 %vm152_vm1, %v6167_v15 }
 0xe95   :  { %v4765_v7 = vpop.f32.mrb[28].mxu1 }
 0xe96   :  { %v2203_v29 = vadd.f32 %v6196_v28, %v4765_v7  ;;  %v2197_v31 = vpop.f32.mrb[29].mxu1 }
 0xe97   :  { %v2198_v36 = vadd.f32 %v6202_v35, %v2197_v31 }
 0xe98   :  { %v2219_v37 = vsel %vm41_vm0, %v2203_v29, -inf }
 0xe99   :  { %2220 = vmax.xlane.f32.xlu0 %v2219_v37  ;;  %v4768_v38 = vpop.f32.mrb[30].mxu1  ;;  %v2216_v9 = vsel %vm41_vm0, %v2198_v36, -inf }
 0xe9a   :  { %v2213_v44 = vadd.f32 %v6210_v41, %v4768_v38  ;;  %v2207_v12 = vpop.f32.mrb[31].mxu1  ;;  %2217 = vmax.xlane.f32.xlu1 %v2216_v9 }
 0xe9b   :  { %v2208_v46 = vadd.f32 %v6219_v45, %v2207_v12 }
 0xe9c   :  { %v2225_v14 = vsel %vm41_vm0, %v2213_v44, -inf }
 0xe9d   :  { %2226 = vmax.xlane.f32.xlu0 %v2225_v14  ;;  %v2222_v39 = vsel %vm41_vm0, %v2208_v46, -inf }
 0xeab   :  { %5366 = vrot.lane.b32.xlu1 %v6165_v13, %s5628_s26 }
 0xecf   :  { %2223 = vmax.xlane.f32.xlu1 %v2222_v39 }
 0xee0   :  { %5376 = vrot.lane.b32.xlu1 %v6165_v13, %s5625_s15 }
 0xee4   :  { %5381 = vrot.lane.b32.xlu1 %v6175_v22, %s5625_s15 }
 0xf26   :  { %v2221_v40 = vpop.xlane.xlu0 %2220 }
 0xf27   :  { %v2229_v19 = vsub.f32 %v2203_v29, %v2221_v40  ;;  %v2218_v17 = vpop.xlane.xlu1 %2217 }
 0xf28   :  { %v2228_v47 = vsub.f32 %v2198_v36, %v2218_v17 }
 0xf29   :  { %v2234_v48 = vmul.f32 1.442695, %v2229_v19 }
 0xf2a   :  { %v2232_v50 = vmul.f32 1.442695, %v2228_v47  ;;  %v2227_v59 = vpop.xlane.xlu0 %2226 }
 0xf2b   :  { %5515 = vpow2.f32 %v2234_v48  ;;  %v5367_v51 = vpop.permute.xlu1 %5366  ;;  %v2231_v20 = vsub.f32 %v2213_v44, %v2227_v59 }
 0xf2c   :  { %5517 = vpow2.f32 %v2232_v50  ;;  %v5369_v53 = vunpack.i.h.bf16 %v5367_v51  ;;  %v5368_v54 = vunpack.i.l.bf16 %v5367_v51 }
 0xf2d   :  { %v2238_v60 = vmul.f32 1.442695, %v2231_v20  ;;  %v4185_v20 = vld [vmem:[%s6579_s2 + $0x68] sm:$0xff] }
 0xf2e   :  { %v5113_v55 = vpack.c.bf16 %v5369_v53, %v5368_v54  ;;  %4783 = vmatprep.subr.mxu0 %v4185_v20 }
 0xf2f   :  { %5519 = vpow2.f32 %v2238_v60  ;;  %4784 = vmatpush3.msra.mxu0 %v4185_v20 }
 0xf30   :  { %5114 = vmatprep.subr.bf16.mxu1 %v5113_v55 }
 0xf31   :  { %5116 = vmatpush3.bf16.msra.mxu1 %v5113_v55 }
 0xf35   :  { %v5516_v56 = vpop.eup %5515 }
 0xf36   :  { %v5518_v16 = vpop.eup %5517  ;;  %v2243_v57 = vsel %vm41_vm0, %v5516_v56, 0.0 }
 0xf37   :  { %2244 = vadd.xlane.f32.xlu0 %v2243_v57  ;;  %v2240_v58 = vsel %vm41_vm0, %v5518_v16, 0.0 }
 0xf38   :  { %2241 = vadd.xlane.f32.xlu1 %v2240_v58 }
 0xf39   :  { %v5520_v0 = vpop.eup %5519 }
 0xf3a   :  { %v2249_v43 = vsel %vm41_vm0, %v5520_v0, 0.0 }
 0xf49   :  { %2477 = vrot.lane.b32.xlu1 %v6157_v8, %s5627_s17 }
 0xf4d   :  { %5371 = vrot.lane.b32.xlu0 %v6175_v22, %s5628_s26 }
 0xf5c   :  { %v2224_v61 = vpop.xlane.xlu1 %2223 }
 0xf5d   :  { %v2230_v62 = vsub.f32 %v2208_v46, %v2224_v61 }
 0xf5f   :  { %v2236_v63 = vmul.f32 1.442695, %v2230_v62 }
 0xf60   :  { %v5377_v6 = vpop.permute.xlu1 %5376 }
 0xf61   :  { %5521 = vpow2.f32 %v2236_v63  ;;  %v5379_v23 = vunpack.i.h.bf16 %v5377_v6  ;;  %v5378_v25 = vunpack.i.l.bf16 %v5377_v6 }
 0xf63   :  { %v5121_v27 = vpack.c.bf16 %v5379_v23, %v5378_v25 }
 0xf64   :  { %v5382_v52 = vpop.permute.xlu1 %5381 }
 0xf65   :  { %v5384_v29 = vunpack.i.h.bf16 %v5382_v52  ;;  %v5383_v31 = vunpack.i.l.bf16 %v5382_v52 }
 0xf67   :  { %v5127_v37 = vpack.c.bf16 %v5384_v29, %v5383_v31 }
 0xf6b   :  { %v5522_v42 = vpop.eup %5521 }
 0xf6c   :  { %2250 = vadd.xlane.f32.xlu0 %v2249_v43  ;;  %v2246_v3 = vsel %vm41_vm0, %v5522_v42, 0.0 }
 0xf6d   :  { %2247 = vadd.xlane.f32.xlu1 %v2246_v3 }
 0xf7e   :  { %2481 = vrot.lane.b32.xlu1 %v6167_v15, %s5627_s17 }
 0xf82   :  { %2475 = vrot.lane.b32.xlu0 %v6159_v49, %s5627_s17  ;;  %5391 = vrot.lane.b32.xlu1 %v6175_v22, %s5629_s27 }
 0xf86   :  { %2479 = vrot.lane.b32.xlu0 %v6169_v21, %s5627_s17  ;;  %2849 = vrot.lane.b32.xlu1 %v6157_v8, %s5630_s28 }
 0xf8a   :  { %5386 = vrot.lane.b32.xlu0 %v6165_v13, %s5629_s27  ;;  %2853 = vrot.lane.b32.xlu1 %v6167_v15, %s5630_s28 }
 0xf8e   :  { %2847 = vrot.lane.b32.xlu0 %v6159_v49, %s5630_s28 }
 0xf92   :  { %2851 = vrot.lane.b32.xlu0 %v6169_v21, %s5630_s28 }
 0xfc4   :  { %v2245_v10 = vpop.xlane.xlu0 %2244 }
 0xfc5   :  { %5523 = vrcp.f32 %v2245_v10  ;;  %v2242_v11 = vpop.xlane.xlu1 %2241 }
 0xfc6   :  { %5525 = vrcp.f32 %v2242_v11 }
 0xfc8   :  { %v5372_v18 = vpop.permute.xlu0 %5371 }
 0xfc9   :  { %v5374_v26 = vunpack.i.h.bf16 %v5372_v18  ;;  %v5373_v30 = vunpack.i.l.bf16 %v5372_v18  ;;  %v2478_v38 = vpop.permute.xlu1 %2477 }
 0xfcb   :  { %v5117_v32 = vpack.c.bf16 %v5374_v26, %v5373_v30 }
 0xfcd   :  { %5118 = vmatprep.subr.bf16.mxu1 %v5117_v32 }
 0xfce   :  { %5120 = vmatpush3.bf16.msra.mxu1 %v5117_v32 }
 0xfcf   :  { %v5524_v33 = vpop.eup %5523  ;;  %5123 = vmatprep.subr.msk.bf16.mxu1 %vm5747_vm2, %v5121_v27 }
 0xfd0   :  { %v5526_v34 = vpop.eup %5525  ;;  %v2257_v36 = vmul.f32 %v5524_v33, %v5516_v56 }
 0xfd1   :  { %v2256_v7 = vmul.f32 %v5526_v34, %v5518_v16 }
 0xfd3   :  { %4777 = vmatprep.mubr.msk.f32.mxu1 %vm41_vm0, %v2256_v7 }
 0xfd4   :  { %4778 = vmatmul.mubr.msk.f32.vlgmr.msra.gmra.mrb[32].mxu1 %vm41_vm0, %v2257_v36 }
 0xfd7   :  { %5126 = vmatpush3.bf16.xpose.msk.msra.mxu1 %vm5747_vm2, %v5121_v27 }
 0xfd8   :  { %5129 = vmatprep.subr.msk.bf16.mxu1 %vm5747_vm2, %v5127_v37 }
 0xfdf   :  { %5132 = vmatpush3.bf16.xpose.msk.msra.mxu1 %vm5747_vm2, %v5127_v37 }
 0xff9   :  { %v2251_v9 = vpop.xlane.xlu0 %2250 }
 0xffa   :  { %5527 = vrcp.f32 %v2251_v9  ;;  %v2248_v44 = vpop.xlane.xlu1 %2247 }
 0xffb   :  { %5529 = vrcp.f32 %v2248_v44 }
 0xffd   :  { %v2476_v12 = vpop.permute.xlu0 %2475 }
 0xffe   :  { %v2482_v14 = vpop.permute.xlu1 %2481 }
0x1001   :  { %v2480_v46 = vpop.permute.xlu0 %2479 }
0x1002   :  { %v5392_v17 = vpop.permute.xlu1 %5391 }
0x1003   :  { %v5394_v54 = vunpack.i.h.bf16 %v5392_v17  ;;  %v5393_v55 = vunpack.i.l.bf16 %v5392_v17 }
0x1004   :  { %v5528_v39 = vpop.eup %5527 }
0x1005   :  { %v5530_v40 = vpop.eup %5529  ;;  %v5387_v19 = vpop.permute.xlu0 %5386  ;;  %v2259_v51 = vmul.f32 %v5528_v39, %v5520_v0  ;;  %v5147_v56 = vpack.c.bf16 %v5394_v54, %v5393_v55 }
0x1006   :  { %v5389_v47 = vunpack.i.h.bf16 %v5387_v19  ;;  %v5388_v48 = vunpack.i.l.bf16 %v5387_v19  ;;  %v2258_v50 = vmul.f32 %v5530_v40, %v5522_v42  ;;  %v2850_v57 = vpop.permute.xlu1 %2849 }
0x1008   :  { %v5141_v53 = vpack.c.bf16 %v5389_v47, %v5388_v48  ;;  %4780 = vmatprep.mubr.msk.f32.mxu1 %vm41_vm0, %v2258_v50 }
0x1009   :  { %4781 = vmatmul.mubr.msk.f32.gmra.mrb[34].mxu1 %vm41_vm0, %v2259_v51  ;;  %v2848_v16 = vpop.permute.xlu0 %2847 }
0x100a   :  { %4799 = vmatprep.mubr.msk.f32.mxu1 %vm152_vm1, %v2476_v12  ;;  %5143 = vmatprep.subr.msk.bf16.mxu1 %vm5747_vm2, %v5141_v53  ;;  %v2854_v59 = vpop.permute.xlu1 %2853 }
0x100d   :  { %4800 = vmatmul.mubr.msk.f32.vlgmr.msra.gmra.mrb[36].mxu1 %vm152_vm1, %v2478_v38  ;;  %v2852_v58 = vpop.permute.xlu0 %2851 }
0x100e   :  { %5146 = vmatpush3.bf16.xpose.msk.msra.mxu1 %vm5747_vm2, %v5141_v53  ;;  %4802 = vmatprep.mubr.msk.f32.mxu1 %vm152_vm1, %v2480_v46 }
0x100f   :  { %5149 = vmatprep.subr.msk.bf16.mxu1 %vm5747_vm2, %v5147_v56 }
0x1011   :  { %4803 = vmatmul.mubr.msk.f32.gmra.mrb[38].mxu1 %vm152_vm1, %v2482_v14 }
0x1012   :  { %4835 = vmatprep.mubr.msk.f32.mxu1 %vm152_vm1, %v2848_v16 }
0x1016   :  { %5152 = vmatpush3.bf16.xpose.msk.msra.mxu1 %vm5747_vm2, %v5147_v56 }
0x101d   :  { %4836 = vmatmul.mubr.msk.f32.vlgmr.msra.gmra.mrb[40].mxu1 %vm152_vm1, %v2850_v57 }
0x101e   :  { %4838 = vmatprep.mubr.msk.f32.mxu1 %vm152_vm1, %v2852_v58 }
0x1021   :  { %4839 = vmatmul.mubr.msk.f32.gmra.mrb[42].mxu1 %vm152_vm1, %v2854_v59 }
0x10a7   :  { %v4779_v60 = vpop.f32.mrb[32].mxu1 }
0x10a8   :  { %v2350_v61 = vpop.f32.mrb[33].mxu1 }
0x10a9   :  { %4785 = vmatprep.mubr.msk.f32.mxu0 %vm152_vm1, %v2350_v61 }
0x10aa   :  { %4786 = vmatmul.mubr.msk.f32.vlgmr.msra.gmra.mrb[24].mxu0 %vm152_vm1, %v4779_v60 }
0x10dc   :  { %v4782_v62 = vpop.f32.mrb[34].mxu1 }
0x10dd   :  { %v2360_v63 = vpop.f32.mrb[35].mxu1 }
0x10de   :  { %4788 = vmatprep.mubr.msk.f32.mxu0 %vm152_vm1, %v2360_v63 }
0x10df   :  { %4789 = vmatmul.mubr.msk.f32.gmra.mrb[26].mxu0 %vm152_vm1, %v4782_v62 }
0x10e0   :  { %v4801_v0 = vpop.f32.mrb[36].mxu1 }
0x10e1   :  { %v2579_v42 = vadd.f32 %v6196_v28, %v4801_v0  ;;  %v2573_v43 = vpop.f32.mrb[37].mxu1 }
0x10e2   :  { %v2574_v3 = vadd.f32 %v6202_v35, %v2573_v43 }
0x10e3   :  { %v2595_v6 = vsel %vm41_vm0, %v2579_v42, -inf }
0x10e4   :  { %2596 = vmax.xlane.f32.xlu1 %v2595_v6  ;;  %v4804_v52 = vpop.f32.mrb[38].mxu1  ;;  %v2592_v10 = vsel %vm41_vm0, %v2574_v3, -inf }
0x10e5   :  { %v2583_v11 = vpop.f32.mrb[39].mxu1  ;;  %2593 = vmax.xlane.f32.xlu0 %v2592_v10  ;;  %v2589_v23 = vadd.f32 %v6210_v41, %v4804_v52 }
0x10e6   :  { %v2584_v18 = vadd.f32 %v6219_v45, %v2583_v11 }
0x10e7   :  { %v2601_v26 = vsel %vm41_vm0, %v2589_v23, -inf }
0x10e8   :  { %v2598_v25 = vsel %vm41_vm0, %v2584_v18, -inf }
0x10e9   :  { %2599 = vmax.xlane.f32.xlu0 %v2598_v25 }
0x10ed   :  { %2602 = vmax.xlane.f32.xlu0 %v2601_v26 }
0x10f0   :  { %v4837_v30 = vpop.f32.mrb[40].mxu1 }
0x10f1   :  { %v2945_v32 = vpop.f32.mrb[41].mxu1  ;;  %v6329_v54 = vadd.f32 %v6196_v28, %v4837_v30 }
0x10f2   :  { %v6326_v53 = vadd.f32 %v6202_v35, %v2945_v32 }
0x10f4   :  { %v4840_v27 = vpop.f32.mrb[42].mxu1 }
0x10f5   :  { %v2955_v33 = vpop.f32.mrb[43].mxu1 }
0x10f6   :  { %v6332_v55 = vadd.f32 %v6219_v45, %v2955_v33 }
0x1171   :  { %v2597_v34 = vpop.xlane.xlu1 %2596 }
0x1172   :  { %v2605_v7 = vsub.f32 %v2579_v42, %v2597_v34  ;;  %v2594_v29 = vpop.xlane.xlu0 %2593 }
0x1173   :  { %v2604_v31 = vsub.f32 %v2574_v3, %v2594_v29 }
0x1174   :  { %v2610_v36 = vmul.f32 1.442695, %v2605_v7 }
0x1175   :  { %v2608_v37 = vmul.f32 1.442695, %v2604_v31 }
0x1176   :  { %5531 = vpow2.f32 %v2610_v36  ;;  %v2600_v38 = vpop.xlane.xlu0 %2599 }
0x1177   :  { %5533 = vpow2.f32 %v2608_v37  ;;  %v2606_v9 = vsub.f32 %v2584_v18, %v2600_v38 }
0x1179   :  { %v2612_v44 = vmul.f32 1.442695, %v2606_v9 }
0x117a   :  { %v2603_v12 = vpop.xlane.xlu0 %2602 }
0x117b   :  { %5535 = vpow2.f32 %v2612_v44  ;;  %v2607_v14 = vsub.f32 %v2589_v23, %v2603_v12 }
0x117d   :  { %v2614_v46 = vmul.f32 1.442695, %v2607_v14 }
0x117f   :  { %5537 = vpow2.f32 %v2614_v46 }
0x1180   :  { %v6296_v39 = vpop.eup %5531 }
0x1181   :  { %v5534_v40 = vpop.eup %5533  ;;  %v2619_v19 = vsel %vm41_vm0, %v6296_v39, 0.0 }
0x1182   :  { %2620 = vadd.xlane.f32.xlu0 %v2619_v19  ;;  %v2616_v17 = vsel %vm41_vm0, %v5534_v40, 0.0 }
0x1183   :  { %2617 = vadd.xlane.f32.xlu1 %v2616_v17 }
0x1185   :  { %v6301_v47 = vpop.eup %5535 }
0x1186   :  { %v2622_v48 = vsel %vm41_vm0, %v6301_v47, 0.0 }
0x1187   :  { %2623 = vadd.xlane.f32.xlu1 %v2622_v48 }
0x1189   :  { %v6305_v50 = vpop.eup %5537 }
0x118a   :  { %v2625_v51 = vsel %vm41_vm0, %v6305_v50, 0.0 }
0x118b   :  { %2626 = vadd.xlane.f32.xlu0 %v2625_v51 }
0x1198   :  { %5396 = vrot.lane.b32.xlu1 %v6165_v13, %s5631_s7 }
0x119c   :  { %5406 = vrot.lane.b32.xlu1 %v6165_v13, %s5632_s8 }
0x11a0   :  { %5411 = vrot.lane.b32.xlu1 %v6175_v22, %s5632_s8 }
0x11a1   :  { %5401 = vrot.lane.b32.xlu0 %v6175_v22, %s5631_s7 }
0x11a4   :  { %3221 = vrot.lane.b32.xlu1 %v6157_v8, %s5633_s9  ;;  %v2964_v8 = vsel %vm41_vm0, %v6326_v53, -inf }
0x11a5   :  { %3219 = vrot.lane.b32.xlu0 %v6159_v49, %s5633_s9  ;;  %v6337_v49 = vadd.f32 %v6210_v41, %v4840_v27 }
0x11a7   :  { %v2973_v56 = vsel %vm41_vm0, %v6337_v49, -inf }
0x11a8   :  { %3225 = vrot.lane.b32.xlu1 %v6167_v15, %s5633_s9  ;;  %v2967_v15 = vsel %vm41_vm0, %v6329_v54, -inf }
0x11a9   :  { %3223 = vrot.lane.b32.xlu0 %v6169_v21, %s5633_s9  ;;  %v2970_v21 = vsel %vm41_vm0, %v6332_v55, -inf }
0x11c8   :  { %2965 = vmax.xlane.f32.xlu0 %v2964_v8 }
0x11cc   :  { %2968 = vmax.xlane.f32.xlu1 %v2967_v15  ;;  %2971 = vmax.xlane.f32.xlu0 %v2970_v21 }
0x11d0   :  { %2974 = vmax.xlane.f32.xlu0 %v2973_v56 }
0x120f   :  { %v2621_v57 = vpop.xlane.xlu0 %2620 }
0x1210   :  { %v2618_v16 = vpop.xlane.xlu1 %2617 }
0x1211   :  { %5539 = vrcp.f32 %v2618_v16 }
0x1212   :  { %5541 = vrcp.f32 %v2621_v57 }
0x1214   :  { %v2624_v58 = vpop.xlane.xlu1 %2623 }
0x1215   :  { %5543 = vrcp.f32 %v2624_v58 }
0x1218   :  { %v5397_v59 = vpop.permute.xlu1 %5396  ;;  %v2627_v20 = vpop.xlane.xlu0 %2626 }
0x1219   :  { %v5399_v60 = vunpack.i.h.bf16 %v5397_v59  ;;  %v5398_v61 = vunpack.i.l.bf16 %v5397_v59  ;;  %5545 = vrcp.f32 %v2627_v20 }
0x121b   :  { %v5540_v62 = vpop.eup %5539  ;;  %v5133_v63 = vpack.c.bf16 %v5399_v60, %v5398_v61 }
0x121c   :  { %v5407_v0 = vpop.permute.xlu1 %5406  ;;  %v5402_v42 = vpop.permute.xlu0 %5401  ;;  %v2632_v43 = vmul.f32 %v5540_v62, %v5534_v40 }
0x121d   :  { %v5409_v3 = vunpack.i.h.bf16 %v5407_v0  ;;  %v5408_v6 = vunpack.i.l.bf16 %v5407_v0  ;;  %v5404_v52 = vunpack.i.h.bf16 %v5402_v42  ;;  %v5403_v10 = vunpack.i.l.bf16 %v5402_v42  ;;  %5134 = vmatprep.subr.bf16.mxu0 %v5133_v63  ;;  %v5542_v23 = vpop.eup %5541 }
0x121e   :  { %5136 = vmatpush3.bf16.msra.mxu0 %v5133_v63  ;;  %4813 = vmatprep.mubr.msk.f32.mxu0 %vm41_vm0, %v2632_v43  ;;  %v2633_v33 = vmul.f32 %v5542_v23, %v6296_v39 }
0x121f   :  { %v5161_v11 = vpack.c.bf16 %v5409_v3, %v5408_v6  ;;  %v5137_v18 = vpack.c.bf16 %v5404_v52, %v5403_v10  ;;  %v5544_v30 = vpop.eup %5543 }
0x1220   :  { %v5412_v25 = vpop.permute.xlu1 %5411  ;;  %v3220_v26 = vpop.permute.xlu0 %3219  ;;  %v2634_v29 = vmul.f32 %v5544_v30, %v6301_v47 }
0x1221   :  { %v5414_v32 = vunpack.i.h.bf16 %v5412_v25  ;;  %v5413_v27 = vunpack.i.l.bf16 %v5412_v25  ;;  %5138 = vmatprep.subr.bf16.mxu0 %v5137_v18  ;;  %5163 = vmatprep.subr.msk.bf16.mxu1 %vm5747_vm2, %v5161_v11 }
0x1222   :  { %4871 = vmatprep.mubr.msk.f32.mxu1 %vm152_vm1, %v3220_v26  ;;  %5140 = vmatpush3.bf16.msra.mxu0 %v5137_v18 }
0x1223   :  { %v5167_v34 = vpack.c.bf16 %v5414_v32, %v5413_v27  ;;  %5166 = vmatpush3.bf16.xpose.msk.msra.mxu1 %vm5747_vm2, %v5161_v11  ;;  %v5546_v7 = vpop.eup %5545 }
0x1224   :  { %v2635_v31 = vmul.f32 %v5546_v7, %v6305_v50  ;;  %v3222_v36 = vpop.permute.xlu1 %3221  ;;  %v3224_v37 = vpop.permute.xlu0 %3223 }
0x1225   :  { %4814 = vmatmul.mubr.msk.f32.vlgmr.msra.gmra.mrb[28].mxu0 %vm41_vm0, %v2633_v33  ;;  %5169 = vmatprep.subr.msk.bf16.mxu1 %vm5747_vm2, %v5167_v34 }
0x1226   :  { %4816 = vmatprep.mubr.msk.f32.mxu0 %vm41_vm0, %v2634_v29 }
0x1228   :  { %v3226_v38 = vpop.permute.xlu1 %3225 }
0x1229   :  { %4817 = vmatmul.mubr.msk.f32.gmra.mrb[30].mxu0 %vm41_vm0, %v2635_v31 }
0x122b   :  { %5172 = vmatpush3.bf16.xpose.msk.msra.mxu1 %vm5747_vm2, %v5167_v34 }
0x1232   :  { %4872 = vmatmul.mubr.msk.f32.vlgmr.msra.gmra.mrb[44].mxu1 %vm152_vm1, %v3222_v36 }
0x1233   :  { %4874 = vmatprep.mubr.msk.f32.mxu1 %vm152_vm1, %v3224_v37 }
0x1236   :  { %4875 = vmatmul.mubr.msk.f32.gmra.mrb[46].mxu1 %vm152_vm1, %v3226_v38 }
0x1255   :  { %v2966_v9 = vpop.xlane.xlu0 %2965 }
0x1256   :  { %v2976_v44 = vsub.f32 %v6326_v53, %v2966_v9 }
0x1258   :  { %v2980_v12 = vmul.f32 1.442695, %v2976_v44  ;;  %v4220_v44 = vld [vmem:[%s6579_s2 + $0x98] sm:$0xff] }
0x1259   :  { %v2969_v14 = vpop.xlane.xlu1 %2968  ;;  %v2972_v46 = vpop.xlane.xlu0 %2971 }
0x125a   :  { %5547 = vpow2.f32 %v2980_v12  ;;  %v2977_v39 = vsub.f32 %v6329_v54, %v2969_v14  ;;  %v2978_v24 = vsub.f32 %v6332_v55, %v2972_v46 }
0x125c   :  { %v2982_v40 = vmul.f32 1.442695, %v2977_v39  ;;  %v2984_v19 = vmul.f32 1.442695, %v2978_v24 }
0x125d   :  { %v2975_v17 = vpop.xlane.xlu0 %2974 }
0x125e   :  { %5549 = vpow2.f32 %v2982_v40  ;;  %v2979_v47 = vsub.f32 %v6337_v49, %v2975_v17  ;;  %v4203_v49 = vld [vmem:[%s6579_s2 + $0x80] sm:$0xff] }
0x125f   :  { %5551 = vpow2.f32 %v2984_v19  ;;  %4819 = vmatprep.subr.mxu0 %v4203_v49 }
0x1260   :  { %v2986_v48 = vmul.f32 1.442695, %v2979_v47  ;;  %4820 = vmatpush3.msra.mxu0 %v4203_v49 }
0x1262   :  { %5553 = vpow2.f32 %v2986_v48 }
0x1264   :  { %v5548_v50 = vpop.eup %5547 }
0x1265   :  { %v2988_v51 = vsel %vm41_vm0, %v5548_v50, 0.0 }
0x1266   :  { %2989 = vadd.xlane.f32.xlu1 %v2988_v51 }
0x1268   :  { %v5550_v53 = vpop.eup %5549 }
0x1269   :  { %v5552_v8 = vpop.eup %5551  ;;  %v2991_v15 = vsel %vm41_vm0, %v5550_v53, 0.0 }
0x126a   :  { %2992 = vadd.xlane.f32.xlu0 %v2991_v15  ;;  %v2994_v54 = vsel %vm41_vm0, %v5552_v8, 0.0 }
0x126b   :  { %2995 = vadd.xlane.f32.xlu1 %v2994_v54 }
0x126c   :  { %v5554_v55 = vpop.eup %5553 }
0x126d   :  { %v2997_v21 = vsel %vm41_vm0, %v5554_v55, 0.0 }
0x126e   :  { %2998 = vadd.xlane.f32.xlu0 %v2997_v21 }
0x127c   :  { %5416 = vrot.lane.b32.xlu1 %v6165_v13, %s5634_s12 }
0x1284   :  { %5421 = vrot.lane.b32.xlu0 %v6175_v22, %s5634_s12 }
0x12f3   :  { %v2990_v56 = vpop.xlane.xlu1 %2989 }
0x12f4   :  { %5555 = vrcp.f32 %v2990_v56 }
0x12f7   :  { %v2993_v16 = vpop.xlane.xlu0 %2992 }
0x12f8   :  { %v2996_v57 = vpop.xlane.xlu1 %2995  ;;  %v4815_v58 = vpop.f32.mrb[28].mxu0  ;;  %5557 = vrcp.f32 %v2993_v16 }
0x12f9   :  { %v2726_v59 = vpop.f32.mrb[29].mxu0  ;;  %5559 = vrcp.f32 %v2996_v57 }
0x12fa   :  { %4821 = vmatprep.mubr.msk.f32.mxu0 %vm152_vm1, %v2726_v59 }
0x12fb   :  { %v2999_v20 = vpop.xlane.xlu0 %2998  ;;  %4822 = vmatmul.mubr.msk.f32.vlgmr.msra.gmra.mrb[24].mxu0 %vm152_vm1, %v4815_v58 }
0x12fc   :  { %v5417_v60 = vpop.permute.xlu1 %5416  ;;  %v4818_v61 = vpop.f32.mrb[30].mxu0  ;;  %5561 = vrcp.f32 %v2999_v20 }
0x12fd   :  { %v5419_v62 = vunpack.i.h.bf16 %v5417_v60  ;;  %v5418_v63 = vunpack.i.l.bf16 %v5417_v60  ;;  %v2736_v0 = vpop.f32.mrb[31].mxu0 }
0x12fe   :  { %v5556_v42 = vpop.eup %5555  ;;  %4824 = vmatprep.mubr.msk.f32.mxu0 %vm152_vm1, %v2736_v0 }
0x12ff   :  { %v5153_v43 = vpack.c.bf16 %v5419_v62, %v5418_v63  ;;  %v5422_v3 = vpop.permute.xlu0 %5421  ;;  %4825 = vmatmul.mubr.msk.f32.gmra.mrb[26].mxu0 %vm152_vm1, %v4818_v61  ;;  %v3004_v6 = vmul.f32 %v5556_v42, %v5548_v50 }
0x1300   :  { %v5424_v52 = vunpack.i.h.bf16 %v5422_v3  ;;  %v5423_v10 = vunpack.i.l.bf16 %v5422_v3 }
0x1301   :  { %5154 = vmatprep.subr.bf16.mxu0 %v5153_v43  ;;  %4849 = vmatprep.mubr.msk.f32.mxu0 %vm41_vm0, %v3004_v6 }
0x1302   :  { %v5157_v11 = vpack.c.bf16 %v5424_v52, %v5423_v10  ;;  %5156 = vmatpush3.bf16.msra.mxu0 %v5153_v43  ;;  %v5558_v18 = vpop.eup %5557  ;;  %v4237_v10 = vld [vmem:[%s6579_s2 + $0xb0] sm:$0xff] }
0x1303   :  { %v5560_v23 = vpop.eup %5559  ;;  %v3005_v32 = vmul.f32 %v5558_v18, %v5550_v53 }
0x1304   :  { %5158 = vmatprep.subr.bf16.mxu0 %v5157_v11  ;;  %v3006_v7 = vmul.f32 %v5560_v23, %v5552_v8 }
0x1305   :  { %v4873_v25 = vpop.f32.mrb[44].mxu1 }
0x1306   :  { %v3323_v26 = vadd.f32 %v6196_v28, %v4873_v25  ;;  %5160 = vmatpush3.bf16.msra.mxu0 %v5157_v11  ;;  %v3317_v30 = vpop.f32.mrb[45].mxu1  ;;  %v5562_v33 = vpop.eup %5561 }
0x1307   :  { %v3318_v27 = vadd.f32 %v6202_v35, %v3317_v30  ;;  %v3007_v38 = vmul.f32 %v5562_v33, %v5554_v55  ;;  %4855 = vmatprep.subr.mxu0 %v4220_v44 }
0x1308   :  { %v3339_v34 = vsel %vm41_vm0, %v3323_v26, -inf }
0x1309   :  { %v4876_v29 = vpop.f32.mrb[46].mxu1  ;;  %3340 = vmax.xlane.f32.xlu0 %v3339_v34  ;;  %4850 = vmatmul.mubr.msk.f32.vlgmr.msra.gmra.mrb[32].mxu0 %vm41_vm0, %v3005_v32  ;;  %v3336_v31 = vsel %vm41_vm0, %v3318_v27, -inf  ;;  %v4190_v34 = vld [vmem:[%s6581_s4 + $0x9] ss:$0 sm:$0xff] }
0x130a   :  { %v3333_v36 = vadd.f32 %v6210_v41, %v4876_v29  ;;  %v3327_v37 = vpop.f32.mrb[47].mxu1  ;;  %3337 = vmax.xlane.f32.xlu1 %v3336_v31  ;;  %4852 = vmatprep.mubr.msk.f32.mxu0 %vm41_vm0, %v3006_v7 }
0x130b   :  { %v3328_v28 = vadd.f32 %v6219_v45, %v3327_v37  ;;  %4856 = vmatpush3.msra.mxu0 %v4220_v44 }
0x130c   :  { %v3345_v35 = vsel %vm41_vm0, %v3333_v36, -inf }
0x130d   :  { %3346 = vmax.xlane.f32.xlu0 %v3345_v35  ;;  %4853 = vmatmul.mubr.msk.f32.gmra.mrb[34].mxu0 %vm41_vm0, %v3007_v38  ;;  %v3342_v9 = vsel %vm41_vm0, %v3328_v28, -inf }
0x130e   :  { %3343 = vmax.xlane.f32.xlu1 %v3342_v9 }
0x1396   :  { %v3341_v41 = vpop.xlane.xlu0 %3340 }
0x1397   :  { %v3349_v12 = vsub.f32 %v3323_v26, %v3341_v41  ;;  %v3338_v14 = vpop.xlane.xlu1 %3337 }
0x1398   :  { %v3348_v46 = vsub.f32 %v3318_v27, %v3338_v14 }
0x1399   :  { %v3354_v45 = vmul.f32 1.442695, %v3349_v12 }
0x139a   :  { %v3352_v39 = vmul.f32 1.442695, %v3348_v46  ;;  %v3347_v24 = vpop.xlane.xlu0 %3346 }
0x139b   :  { %5563 = vpow2.f32 %v3354_v45  ;;  %v3351_v40 = vsub.f32 %v3333_v36, %v3347_v24  ;;  %v3344_v19 = vpop.xlane.xlu1 %3343 }
0x139c   :  { %5565 = vpow2.f32 %v3352_v39  ;;  %v3350_v17 = vsub.f32 %v3328_v28, %v3344_v19 }
0x139d   :  { %v3358_v47 = vmul.f32 1.442695, %v3351_v40 }
0x139e   :  { %v3356_v48 = vmul.f32 1.442695, %v3350_v17 }
0x139f   :  { %5567 = vpow2.f32 %v3358_v47 }
0x13a0   :  { %5569 = vpow2.f32 %v3356_v48 }
0x13a5   :  { %v5564_v50 = vpop.eup %5563 }
0x13a6   :  { %v5566_v51 = vpop.eup %5565  ;;  %v3363_v53 = vsel %vm41_vm0, %v5564_v50, 0.0 }
0x13a7   :  { %3364 = vadd.xlane.f32.xlu0 %v3363_v53  ;;  %v3360_v8 = vsel %vm41_vm0, %v5566_v51, 0.0 }
0x13a8   :  { %3361 = vadd.xlane.f32.xlu1 %v3360_v8 }
0x13a9   :  { %v5568_v15 = vpop.eup %5567 }
0x13aa   :  { %v5570_v54 = vpop.eup %5569  ;;  %v3369_v55 = vsel %vm41_vm0, %v5568_v15, 0.0 }
0x13ab   :  { %3370 = vadd.xlane.f32.xlu0 %v3369_v55  ;;  %v3366_v21 = vsel %vm41_vm0, %v5570_v54, 0.0 }
0x13ac   :  { %3367 = vadd.xlane.f32.xlu1 %v3366_v21 }
0x13bd   :  { %5426 = vrot.lane.b32.xlu1 %v6165_v13, %s5635_s18 }
0x13c1   :  { %5431 = vrot.lane.b32.xlu0 %v6175_v22, %s5635_s18 }
0x13dc   :  { %v4851_v49 = vpop.f32.mrb[32].mxu0 }
0x13dd   :  { %v3098_v56 = vpop.f32.mrb[33].mxu0 }
0x13de   :  { %4857 = vmatprep.mubr.msk.f32.mxu0 %vm152_vm1, %v3098_v56 }
0x13df   :  { %4858 = vmatmul.mubr.msk.f32.vlgmr.msra.gmra.mrb[24].mxu0 %vm152_vm1, %v4851_v49 }
0x13e0   :  { %v4854_v16 = vpop.f32.mrb[34].mxu0 }
0x13e1   :  { %v3108_v57 = vpop.f32.mrb[35].mxu0 }
0x13e2   :  { %4860 = vmatprep.mubr.msk.f32.mxu0 %vm152_vm1, %v3108_v57  ;;  %v4247_v57 = vld [vmem:[%s6579_s2 + $0x88] sm:$0xff] }
0x13e3   :  { %4861 = vmatmul.mubr.msk.f32.gmra.mrb[26].mxu0 %vm152_vm1, %v4854_v16  ;;  %v4246_v16 = vld [vmem:[%s6579_s2 + $0x70] sm:$0xff] }
0x1434   :  { %v3365_v58 = vpop.xlane.xlu0 %3364 }
0x1435   :  { %v3362_v59 = vpop.xlane.xlu1 %3361 }
0x1436   :  { %5571 = vrcp.f32 %v3362_v59  ;;  %v4248_v59 = vld [vmem:[%s6579_s2 + $0xa0] sm:$0xff] }
0x1437   :  { %5573 = vrcp.f32 %v3365_v58  ;;  %v5181_v58 = vpack.c.bf16 %v4247_v57, %v4246_v16 }
0x1438   :  { %v3371_v20 = vpop.xlane.xlu0 %3370 }
0x1439   :  { %v3368_v13 = vpop.xlane.xlu1 %3367  ;;  %5182 = vmatprep.subr.bf16.mxu1 %v5181_v58 }
0x143a   :  { %5575 = vrcp.f32 %v3368_v13  ;;  %5184 = vmatpush3.bf16.msra.mxu1 %v5181_v58 }
0x143b   :  { %5577 = vrcp.f32 %v3371_v20  ;;  %v4249_v20 = vld [vmem:[%s6579_s2 + $0xb8] sm:$0xff] }
0x143c   :  { %v5432_v22 = vpop.permute.xlu0 %5431  ;;  %v5185_v13 = vpack.c.bf16 %v4249_v20, %v4248_v59 }
0x143d   :  { %v5427_v60 = vpop.permute.xlu1 %5426  ;;  %v5434_v61 = vunpack.i.h.bf16 %v5432_v22  ;;  %v5433_v62 = vunpack.i.l.bf16 %v5432_v22  ;;  %v4256_v22 = vld [vmem:[%s6580_s3 + $0x80] sm:$0xff] }
0x143e   :  { %v5429_v63 = vunpack.i.h.bf16 %v5427_v60  ;;  %v5428_v0 = vunpack.i.l.bf16 %v5427_v60  ;;  %5186 = vmatprep.subr.bf16.mxu1 %v5185_v13  ;;  %v4257_v60 = vld [vmem:[%s6580_s3 + $0x88] sm:$0xff] }
0x143f   :  { %v5177_v6 = vpack.c.bf16 %v5434_v61, %v5433_v62  ;;  %5188 = vmatpush3.bf16.msra.mxu1 %v5185_v13  ;;  %v4258_v61 = vld [vmem:[%s6580_s3 + $0x90] sm:$0xff]  ;;  %v5189_v62 = vpack.c.bf16 %v4257_v60, %v4256_v22 }
0x1440   :  { %v5572_v42 = vpop.eup %5571  ;;  %v5173_v43 = vpack.c.bf16 %v5429_v63, %v5428_v0  ;;  %v4259_v63 = vld [vmem:[%s6580_s3 + $0x98] sm:$0xff] }
0x1441   :  { %v3376_v3 = vmul.f32 %v5572_v42, %v5566_v51  ;;  %v5574_v52 = vpop.eup %5573  ;;  %v5193_v0 = vpack.c.bf16 %v4259_v63, %v4258_v61  ;;  %v4260_v42 = vld [vmem:[%s6580_s3 + $0xa0] sm:$0xff] }
0x1442   :  { %5174 = vmatprep.subr.bf16.mxu0 %v5173_v43  ;;  %v3377_v18 = vmul.f32 %v5574_v52, %v5564_v50  ;;  %v4263_v52 = vld [vmem:[%s6580_s3 + $0xb8] sm:$0xff] }
0x1443   :  { %5176 = vmatpush3.bf16.msra.mxu0 %v5173_v43  ;;  %4885 = vmatprep.mubr.msk.f32.mxu0 %vm41_vm0, %v3376_v3  ;;  %v4261_v43 = vld [vmem:[%s6580_s3 + $0xa8] sm:$0xff] }
0x1444   :  { %5178 = vmatprep.subr.bf16.mxu0 %v5177_v6  ;;  %v5576_v11 = vpop.eup %5575  ;;  %v5197_v3 = vpack.c.bf16 %v4261_v43, %v4260_v42 }
0x1445   :  { %v5578_v23 = vpop.eup %5577  ;;  %v3378_v25 = vmul.f32 %v5576_v11, %v5570_v54  ;;  %v4264_v11 = vld [vmem:[%s6580_s3 + $0xc0] sm:$0xff] }
0x1446   :  { %v3379_v26 = vmul.f32 %v5578_v23, %v5568_v15 }
0x1447   :  { %5180 = vmatpush3.bf16.msra.mxu0 %v5177_v6  ;;  %v4262_v6 = vld [vmem:[%s6580_s3 + $0xb0] sm:$0xff] }
0x1448   :  { %4891 = vmatprep.subr.mxu0 %v4237_v10 }
0x144a   :  { %4886 = vmatmul.mubr.msk.f32.vlgmr.msra.gmra.mrb[36].mxu0 %vm41_vm0, %v3377_v18  ;;  %v4265_v18 = vld [vmem:[%s6580_s3 + $0xc8] sm:$0xff] }
0x144b   :  { %4888 = vmatprep.mubr.msk.f32.mxu0 %vm41_vm0, %v3378_v25  ;;  %4892 = vmatpush3.msra.mxu0 %v4237_v10  ;;  %v5201_v10 = vpack.c.bf16 %v4263_v52, %v4262_v6  ;;  %v5205_v23 = vpack.c.bf16 %v4265_v18, %v4264_v11  ;;  %v4266_v25 = vld [vmem:[%s6580_s3 + $0xd0] sm:$0xff] }
0x144c   :  { %5190 = vmatprep.subr.bf16.mxu0 %v5189_v62 }
0x144e   :  { %4889 = vmatmul.mubr.msk.f32.gmra.mrb[38].mxu0 %vm41_vm0, %v3379_v26  ;;  %v4267_v26 = vld [vmem:[%s6580_s3 + $0xd8] sm:$0xff] }
0x151d   :  { %v4887_v30 = vpop.f32.mrb[36].mxu0 }
0x151e   :  { %v3470_v32 = vpop.f32.mrb[37].mxu0 }
0x151f   :  { %4893 = vmatprep.mubr.msk.f32.mxu0 %vm152_vm1, %v3470_v32  ;;  %v4268_v32 = vld [vmem:[%s6580_s3 + $0xe0] sm:$0xff] }
0x1520   :  { %4894 = vmatmul.mubr.msk.f32.vlgmr.msra.gmra.mrb[24].mxu0 %vm152_vm1, %v4887_v30  ;;  %v5209_v30 = vpack.c.bf16 %v4267_v26, %v4266_v25 }
0x1521   :  { %v4890_v27 = vpop.f32.mrb[38].mxu0  ;;  %5192 = vmatpush3.bf16.msra.mxu0 %v5189_v62  ;;  %v4273_v62 = vld [vmem:[%s6581_s4 + $0xd] ss:$0 sm:$0xff] }
0x1522   :  { %v3480_v33 = vpop.f32.mrb[39].mxu0  ;;  %5194 = vmatprep.subr.bf16.mxu0 %v5193_v0 }
0x1523   :  { %4896 = vmatprep.mubr.msk.f32.mxu0 %vm152_vm1, %v3480_v33 }
0x1524   :  { %4897 = vmatmul.mubr.msk.f32.gmra.mrb[26].mxu0 %vm152_vm1, %v4890_v27  ;;  %v4269_v27 = vld [vmem:[%s6580_s3 + $0xe8] sm:$0xff] }
0x1525   :  { %5196 = vmatpush3.bf16.msra.mxu0 %v5193_v0  ;;  %v5213_v33 = vpack.c.bf16 %v4269_v27, %v4268_v32 }
0x1526   :  { %5198 = vmatprep.subr.bf16.mxu0 %v5197_v3 }
0x1529   :  { %5200 = vmatpush3.bf16.msra.mxu0 %v5197_v3 }
0x152a   :  { %5202 = vmatprep.subr.bf16.mxu0 %v5201_v10 }
0x152d   :  { %5204 = vmatpush3.bf16.msra.mxu0 %v5201_v10 }
0x152e   :  { %5206 = vmatprep.subr.bf16.mxu0 %v5205_v23 }
0x1531   :  { %5208 = vmatpush3.bf16.msra.mxu0 %v5205_v23 }
0x1532   :  { %5210 = vmatprep.subr.bf16.mxu0 %v5209_v30 }
0x1535   :  { %5212 = vmatpush3.bf16.msra.mxu0 %v5209_v30 }
0x1536   :  { %5214 = vmatprep.subr.bf16.mxu0 %v5213_v33 }
0x1539   :  { %5216 = vmatpush3.bf16.msra.mxu0 %v5213_v33 }
0x15f3   :  { %v4895_v7 = vpop.f32.mrb[24].mxu0 }
0x15f4   :  { %v5233_v29 = vadd.f32 %v4895_v7, %v4190_v34  ;;  %v3568_v31 = vpop.f32.mrb[25].mxu0 }
0x15f5   :  { %v5234_v36 = vadd.f32 %v4190_v34, %v3568_v31 }
0x15f6   :  { %v3592_v37 = vadd.f32 %v5233_v29, %v6140_v2 }
0x15f7   :  { %v3591_v28 = vadd.f32 %v5234_v36, %v6138_v1  ;;  %v4898_v38 = vpop.f32.mrb[26].mxu0 }
0x15f8   :  { %v5235_v35 = vadd.f32 %v4898_v38, %v4190_v34  ;;  %v3578_v9 = vpop.f32.mrb[27].mxu0  ;;  %v3600_v44 = vsel %vm41_vm0, %v3592_v37, 0.0 }
0x15f9   :  { %v5236_v41 = vadd.f32 %v4190_v34, %v3578_v9  ;;  %3601 = vadd.xlane.f32.xlu0 %v3600_v44  ;;  %v3597_v12 = vsel %vm41_vm0, %v3591_v28, 0.0 }
0x15fa   :  { %v3594_v14 = vadd.f32 %v5235_v35, %v6148_v5  ;;  %3598 = vadd.xlane.f32.xlu1 %v3597_v12 }
0x15fb   :  { %v3593_v46 = vadd.f32 %v5236_v41, %v6146_v4 }
0x15fc   :  { %v3606_v45 = vsel %vm41_vm0, %v3594_v14, 0.0 }
0x15fd   :  { %3607 = vadd.xlane.f32.xlu0 %v3606_v45  ;;  %v3603_v2 = vsel %vm41_vm0, %v3593_v46, 0.0 }
0x15fe   :  { %3604 = vadd.xlane.f32.xlu1 %v3603_v2 }
0x1686   :  { %v3602_v1 = vpop.xlane.xlu0 %3601 }
0x1687   :  { %v3610_v39 = vmul.f32 0.03125, %v3602_v1  ;;  %v3599_v24 = vpop.xlane.xlu1 %3598  ;;  %v4245_v1 = vld [vmem:[%s6581_s4 + $0xb] ss:$0 sm:$0xff] }
0x1688   :  { %v3609_v40 = vmul.f32 0.03125, %v3599_v24 }
0x1689   :  { %v6432_v19 = vsub.f32 %v3592_v37, %v3610_v39 }
0x168a   :  { %v6434_v17 = vsub.f32 %v3591_v28, %v3609_v40  ;;  %v3608_v47 = vpop.xlane.xlu0 %3607 }
0x168b   :  { %v3612_v48 = vmul.f32 0.03125, %v3608_v47  ;;  %v3605_v5 = vpop.xlane.xlu1 %3604  ;;  %v3618_v4 = vmul.f32 %v6432_v19, %v6432_v19 }
0x168c   :  { %v3611_v50 = vmul.f32 0.03125, %v3605_v5  ;;  %v3617_v51 = vmul.f32 %v6434_v17, %v6434_v17 }
0x168d   :  { %v6440_v53 = vsub.f32 %v3594_v14, %v3612_v48  ;;  %v3624_v8 = vsel %vm41_vm0, %v3618_v4, 0.0  ;;  %v4244_v14 = vld [vmem:[%s6581_s4 + $0xa] ss:$0 sm:$0xff] }
0x168e   :  { %v6443_v15 = vsub.f32 %v3593_v46, %v3611_v50  ;;  %3625 = vadd.xlane.f32.xlu0 %v3624_v8  ;;  %v3621_v54 = vsel %vm41_vm0, %v3617_v51, 0.0 }
0x168f   :  { %3622 = vadd.xlane.f32.xlu1 %v3621_v54  ;;  %v3620_v55 = vmul.f32 %v6440_v53, %v6440_v53 }
0x1690   :  { %v3619_v21 = vmul.f32 %v6443_v15, %v6443_v15 }
0x1691   :  { %v3630_v49 = vsel %vm41_vm0, %v3620_v55, 0.0  ;;  %v4251_v55 = vld [vmem:[%s6581_s4 + $0xc] ss:$0 sm:$0xff] }
0x1692   :  { %3631 = vadd.xlane.f32.xlu0 %v3630_v49  ;;  %v3627_v56 = vsel %vm41_vm0, %v3619_v21, 0.0 }
0x1693   :  { %3628 = vadd.xlane.f32.xlu1 %v3627_v56 }
0x171b   :  { %v3626_v34 = vpop.xlane.xlu0 %3625 }
0x171c   :  { %v3634_v7 = vmul.f32 0.03125, %v3626_v34  ;;  %v3623_v29 = vpop.xlane.xlu1 %3622 }
0x171d   :  { %v3633_v31 = vmul.f32 0.03125, %v3623_v29 }
0x171e   :  { %v3638_v36 = vadd.f32 1e-05, %v3634_v7 }
0x171f   :  { %v3637_v37 = vadd.f32 1e-05, %v3633_v31  ;;  %v3632_v28 = vpop.xlane.xlu0 %3631 }
0x1720   :  { %5579 = vrsqrt.f32 %v3638_v36  ;;  %v3636_v38 = vmul.f32 0.03125, %v3632_v28  ;;  %v3629_v35 = vpop.xlane.xlu1 %3628 }
0x1721   :  { %5581 = vrsqrt.f32 %v3637_v37  ;;  %v3635_v9 = vmul.f32 0.03125, %v3629_v35 }
0x1722   :  { %v3640_v44 = vadd.f32 1e-05, %v3636_v38 }
0x1723   :  { %v3639_v41 = vadd.f32 1e-05, %v3635_v9 }
0x1724   :  { %5583 = vrsqrt.f32 %v3640_v44 }
0x1725   :  { %5585 = vrsqrt.f32 %v3639_v41 }
0x172a   :  { %v5580_v12 = vpop.eup %5579 }
0x172b   :  { %v5582_v46 = vpop.eup %5581  ;;  %v3646_v45 = vmul.f32 %v5580_v12, %v6432_v19 }
0x172c   :  { %v3645_v2 = vmul.f32 %v5582_v46, %v6434_v17 }
0x172d   :  { %v3654_v39 = vmul.f32 %v4244_v14, %v3646_v45 }
0x172e   :  { %v5584_v24 = vpop.eup %5583  ;;  %v3653_v40 = vmul.f32 %v4244_v14, %v3645_v2 }
0x172f   :  { %v5586_v47 = vpop.eup %5585  ;;  %v3648_v48 = vmul.f32 %v5584_v24, %v6440_v53  ;;  %v3662_v50 = vadd.f32 %v4245_v1, %v3654_v39  ;;  %v4270_v53 = vld [vmem:[%s6580_s3 + $0xf0] sm:$0xff]  ;;  %v3956_v24 = vld [vmem:[%s6582_s5] sm:$0xff] }
0x1730   :  { %v3661_v5 = vadd.f32 %v4245_v1, %v3653_v40  ;;  %v3647_v4 = vmul.f32 %v5586_v47, %v6443_v15  ;;  %v4271_v15 = vld [vmem:[%s6580_s3 + $0xf8] sm:$0xff]  ;;  %v3957_v40 = vld [vmem:[%s6582_s5 + $0x8] sm:$0xff] }
0x1731   :  { %v3656_v51 = vmul.f32 %v4244_v14, %v3648_v48  ;;  %v5217_v54 = vpack.c.bf16 %v4271_v15, %v4270_v53  ;;  %v5221_v47 = vpack.c.bf16 %v3957_v40, %v3956_v24  ;;  %v3958_v48 = vld [vmem:[%s6582_s5 + $0x10] sm:$0xff] }
0x1732   :  { %4907 = vmatprep.mubr.msk.f32.mxu1 %vm41_vm0, %v3661_v5  ;;  %v3655_v19 = vmul.f32 %v4244_v14, %v3647_v4 }
0x1733   :  { %4908 = vmatmul.mubr.msk.f32.vlgmr.msra.gmra.mrb[48].mxu1 %vm41_vm0, %v3662_v50  ;;  %v3664_v8 = vadd.f32 %v4245_v1, %v3656_v51  ;;  %5218 = vmatprep.subr.bf16.mxu0 %v5217_v54 }
0x1734   :  { %v3663_v17 = vadd.f32 %v4245_v1, %v3655_v19  ;;  %5220 = vmatpush3.bf16.msra.mxu0 %v5217_v54  ;;  %5222 = vmatprep.subr.bf16.mxu1 %v5221_v47 }
0x1735   :  { %5224 = vmatpush3.bf16.msra.mxu1 %v5221_v47 }
0x1736   :  { %4910 = vmatprep.mubr.msk.f32.mxu1 %vm41_vm0, %v3663_v17 }
0x1737   :  { %4911 = vmatmul.mubr.msk.f32.gmra.mrb[50].mxu1 %vm41_vm0, %v3664_v8 }
0x1806   :  { %v4909_v21 = vpop.f32.mrb[48].mxu1 }
0x1807   :  { %v3758_v49 = vadd.f32 %v4909_v21, %v4251_v55  ;;  %v3752_v56 = vpop.f32.mrb[49].mxu1 }
0x1808   :  { %v3753_v16 = vadd.f32 %v4251_v55, %v3752_v56 }
0x1809   :  { %v3772_v59 = vmax.f32 %v3758_v49, 0.0 }
0x180a   :  { %v3771_v57 = vmax.f32 %v3753_v16, 0.0  ;;  %v4912_v58 = vpop.f32.mrb[50].mxu1 }
0x180b   :  { %v3768_v20 = vadd.f32 %v4912_v58, %v4251_v55  ;;  %v3762_v13 = vpop.f32.mrb[51].mxu1 }
0x180c   :  { %v3763_v22 = vadd.f32 %v4251_v55, %v3762_v13  ;;  %4945 = vmatprep.mubr.f32.mxu0 %v3771_v57  ;;  %v4276_v57 = vld [vmem:[%s6581_s4 + $0xe] ss:$0 sm:$0xff]  ;;  %v4277_v13 = vld [vmem:[%s6581_s4 + $0xf] ss:$0 sm:$0xff] }
0x180d   :  { %4946 = vmatmul.mubr.f32.vlgmr.msra.gmra.mrb[40].mxu0 %v3772_v59  ;;  %v3774_v61 = vmax.f32 %v3768_v20, 0.0 }
0x180e   :  { %v3773_v60 = vmax.f32 %v3763_v22, 0.0 }
0x1810   :  { %4948 = vmatprep.mubr.f32.mxu0 %v3773_v60 }
0x1811   :  { %4949 = vmatmul.mubr.f32.gmra.mrb[42].mxu0 %v3774_v61 }
0x18e0   :  { %v4947_v63 = vpop.f32.mrb[40].mxu0 }
0x18e1   :  { %v3869_v0 = vadd.f32 %v4947_v63, %v4273_v62  ;;  %v3863_v42 = vpop.f32.mrb[41].mxu0 }
0x18e2   :  { %v3864_v43 = vadd.f32 %v4273_v62, %v3863_v42 }
0x18e3   :  { %v3883_v3 = vadd.f32 %v3869_v0, %v3662_v50 }
0x18e4   :  { %v3882_v6 = vadd.f32 %v3864_v43, %v3661_v5  ;;  %v4950_v52 = vpop.f32.mrb[42].mxu0  ;;  %v3959_v5 = vld [vmem:[%s6582_s5 + $0x18] sm:$0xff] }
0x18e5   :  { %v3879_v10 = vadd.f32 %v4950_v52, %v4273_v62  ;;  %v3873_v11 = vpop.f32.mrb[43].mxu0  ;;  %v3891_v18 = vsel %vm41_vm0, %v3883_v3, 0.0  ;;  %v5225_v4 = vpack.c.bf16 %v3959_v5, %v3958_v48 }
0x18e6   :  { %v3874_v23 = vadd.f32 %v4273_v62, %v3873_v11  ;;  %3892 = vadd.xlane.f32.xlu0 %v3891_v18  ;;  %v3888_v25 = vsel %vm41_vm0, %v3882_v6, 0.0  ;;  %v4278_v11 = vld [vmem:[%s6582_s5 + $0x20] ss:$0 sm:$0xff] }
0x18e7   :  { %v3885_v26 = vadd.f32 %v3879_v10, %v3664_v8  ;;  %3889 = vadd.xlane.f32.xlu1 %v3888_v25  ;;  %5226 = vmatprep.subr.bf16.mxu1 %v5225_v4 }
0x18e8   :  { %v3884_v30 = vadd.f32 %v3874_v23, %v3663_v17  ;;  %5228 = vmatpush3.bf16.msra.mxu1 %v5225_v4 }
0x18e9   :  { %v3897_v32 = vsel %vm41_vm0, %v3885_v26, 0.0 }
0x18ea   :  { %3898 = vadd.xlane.f32.xlu0 %v3897_v32  ;;  %v3894_v27 = vsel %vm41_vm0, %v3884_v30, 0.0 }
0x18eb   :  { %3895 = vadd.xlane.f32.xlu1 %v3894_v27 }
0x1973   :  { %v3893_v33 = vpop.xlane.xlu0 %3892 }
0x1974   :  { %v3901_v34 = vmul.f32 0.03125, %v3893_v33  ;;  %v3890_v7 = vpop.xlane.xlu1 %3889 }
0x1975   :  { %v3900_v29 = vmul.f32 0.03125, %v3890_v7 }
0x1976   :  { %v3905_v31 = vsub.f32 %v3883_v3, %v3901_v34 }
0x1977   :  { %v3904_v36 = vsub.f32 %v3882_v6, %v3900_v29  ;;  %v3899_v37 = vpop.xlane.xlu0 %3898 }
0x1978   :  { %v3903_v28 = vmul.f32 0.03125, %v3899_v37  ;;  %v3896_v38 = vpop.xlane.xlu1 %3895  ;;  %v3909_v35 = vmul.f32 %v3905_v31, %v3905_v31 }
0x1979   :  { %v3902_v9 = vmul.f32 0.03125, %v3896_v38  ;;  %v3908_v44 = vmul.f32 %v3904_v36, %v3904_v36 }
0x197a   :  { %v3907_v41 = vsub.f32 %v3885_v26, %v3903_v28  ;;  %v3915_v12 = vsel %vm41_vm0, %v3909_v35, 0.0 }
0x197b   :  { %v3906_v14 = vsub.f32 %v3884_v30, %v3902_v9  ;;  %3916 = vadd.xlane.f32.xlu0 %v3915_v12  ;;  %v3912_v46 = vsel %vm41_vm0, %v3908_v44, 0.0 }
0x197c   :  { %3913 = vadd.xlane.f32.xlu1 %v3912_v46  ;;  %v3911_v45 = vmul.f32 %v3907_v41, %v3907_v41 }
0x197d   :  { %v3910_v2 = vmul.f32 %v3906_v14, %v3906_v14 }
0x197e   :  { %v3921_v1 = vsel %vm41_vm0, %v3911_v45, 0.0 }
0x197f   :  { %3922 = vadd.xlane.f32.xlu0 %v3921_v1  ;;  %v3918_v39 = vsel %vm41_vm0, %v3910_v2, 0.0 }
0x1980   :  { %3919 = vadd.xlane.f32.xlu1 %v3918_v39 }
0x1a08   :  { %v3917_v50 = vpop.xlane.xlu0 %3916 }
0x1a09   :  { %v3925_v51 = vmul.f32 0.03125, %v3917_v50  ;;  %v3914_v19 = vpop.xlane.xlu1 %3913 }
0x1a0a   :  { %v3924_v17 = vmul.f32 0.03125, %v3914_v19 }
0x1a0b   :  { %v3929_v8 = vadd.f32 1e-05, %v3925_v51 }
0x1a0c   :  { %v3928_v53 = vadd.f32 1e-05, %v3924_v17  ;;  %v3923_v15 = vpop.xlane.xlu0 %3922 }
0x1a0d   :  { %5587 = vrsqrt.f32 %v3929_v8  ;;  %v3927_v54 = vmul.f32 0.03125, %v3923_v15  ;;  %v3920_v55 = vpop.xlane.xlu1 %3919 }
0x1a0e   :  { %5589 = vrsqrt.f32 %v3928_v53  ;;  %v3926_v21 = vmul.f32 0.03125, %v3920_v55 }
0x1a0f   :  { %v3931_v49 = vadd.f32 1e-05, %v3927_v54 }
0x1a10   :  { %v3930_v56 = vadd.f32 1e-05, %v3926_v21 }
0x1a11   :  { %5591 = vrsqrt.f32 %v3931_v49 }
0x1a12   :  { %5593 = vrsqrt.f32 %v3930_v56 }
0x1a17   :  { %v5588_v16 = vpop.eup %5587 }
0x1a18   :  { %v5590_v58 = vpop.eup %5589  ;;  %v3937_v59 = vmul.f32 %v5588_v16, %v3905_v31 }
0x1a19   :  { %v3936_v20 = vmul.f32 %v5590_v58, %v3904_v36 }
0x1a1a   :  { %v3945_v22 = vmul.f32 %v4276_v57, %v3937_v59 }
0x1a1b   :  { %v5592_v60 = vpop.eup %5591  ;;  %v3944_v61 = vmul.f32 %v4276_v57, %v3936_v20 }
0x1a1c   :  { %v5594_v62 = vpop.eup %5593  ;;  %v3939_v63 = vmul.f32 %v5592_v60, %v3907_v41  ;;  %v3953_v43 = vadd.f32 %v4277_v13, %v3945_v22 }
0x1a1d   :  { %v3952_v0 = vadd.f32 %v4277_v13, %v3944_v61  ;;  %v3938_v42 = vmul.f32 %v5594_v62, %v3906_v14 }
0x1a1e   :  { %v3947_v3 = vmul.f32 %v4276_v57, %v3939_v63 }
0x1a1f   :  { %4959 = vmatprep.mubr.msk.f32.mxu1 %vm41_vm0, %v3952_v0  ;;  %v3946_v6 = vmul.f32 %v4276_v57, %v3938_v42 }
0x1a20   :  { %4960 = vmatmul.mubr.msk.f32.vlgmr.msra.gmra.mrb[52].mxu1 %vm41_vm0, %v3953_v43  ;;  %v3955_v10 = vadd.f32 %v4277_v13, %v3947_v3 }
0x1a21   :  { %v3954_v52 = vadd.f32 %v4277_v13, %v3946_v6 }
0x1a23   :  { %4962 = vmatprep.mubr.msk.f32.mxu1 %vm41_vm0, %v3954_v52 }
0x1a24   :  { %4963 = vmatmul.mubr.msk.f32.gmra.mrb[54].mxu1 %vm41_vm0, %v3955_v10 }
0x1af3   :  { %v4961_v18 = vpop.f32.mrb[52].mxu1 }
0x1af4   :  { %v4049_v23 = vadd.f32 %v4961_v18, %v4278_v11  ;;  %v4043_v25 = vpop.f32.mrb[53].mxu1 }
0x1af5   :  { %v4044_v26 = vadd.f32 %v4278_v11, %v4043_v25 }
0x1af6   :  { %4063 = vst [vmem:[#allocation2 + $0x8] sm:$0xff] %v4049_v23 }
0x1af7   :  { %4062 = vst [vmem:[#allocation2] sm:$0xff] %v4044_v26  ;;  %v4964_v30 = vpop.f32.mrb[54].mxu1 }
0x1af8   :  { %v4059_v32 = vadd.f32 %v4964_v30, %v4278_v11  ;;  %v4053_v27 = vpop.f32.mrb[55].mxu1 }
0x1af9   :  { %v4054_v33 = vadd.f32 %v4278_v11, %v4053_v27 }
0x1afa   :  { %4065 = vst [vmem:[#allocation2 + $0x18] sm:$0xff] %v4059_v32 }
0x1afb   :  { %4064 = vst [vmem:[#allocation2 + $0x10] sm:$0xff] %v4054_v33 }
0x1afc   :  { %5612 = shalt.err (!%p5609_p4)
}
0x1afd   :  { %s5613_s20 = scalar_lea.hbm %s6583_s6, 512 }
0x1afe   :  { %p5614_p5 = scmp.ne.s32.totalorder %s6583_s6, %s5613_s20  ;;  %p5617_p6 = scmp.lt.u32.totalorder %s5613_s20, %s6583_s6 }
0x1b00   :  { %p5619_p7 = pnand %p5617_p6, %p5614_p5 }
0x1b02   :  { %5622 = shalt.err (!%p5619_p7)
}
0x1b03   :  { %s5637_s2 = smov 128   ;;  %s5638_s25 = smov 8  }
0x1b04   :  { %4077 = dma.vmem_to_hbm [thread:$0]  %s4072_s14, 512, %s6583_s6, [#allocation3], %s5637_s2, %s5637_s2, %s5638_s25  }
0x1b05   :  { %5623 = dma.done.wait [#allocation3], 512  }
0x1b06   :  { %5624 = vsyncadd [#allocation3], 4294966784 }
0x1b07   :  { %4081 = vsyncpa [#allocation3], 1 }

</bundles_post_ra>
